<compile_context>
chip_gen: v7x
topology: tpu7x:2x2x1
jax: 0.10.0
libtpu: 0.0.40
codegen_flags: <defaults>
</compile_context>

<pallas_src>
import jax
import jax.numpy as jnp
from jax.experimental import pallas as pl
from jax.experimental.pallas import tpu as pltpu


# ----------------------------------------------------------------------------
# model configuration (small, deterministic test sizes)
# ----------------------------------------------------------------------------
CFG = dict(
    batch=2,
    seq_len_args=10,          # args.seq_len  -> self.seq_len = 8
    nSeries=8,
    lstm_hidden=16,
    gcn_indim=2,
    num_layers=2,
    apt_size=4,
    residual_channels=8,
)
CFG["T"] = CFG["seq_len_args"] - 2        # time length of the inputs
CFG["seq_out"] = CFG["seq_len_args"] - 2  # self.seq_len (channels of end_conv_2)


def _layer_time_lengths(T, N, L):
    """Time length of each layer's LSTM input (torch: x = x[..., 0:nSeries:2])."""
    Ts = [T]
    for _ in range(L - 1):
        Ts.append(len(range(0, min(N, Ts[-1]), 2)))
    return Ts


# ----------------------------------------------------------------------------
# the single fused kernel
# ----------------------------------------------------------------------------
def _build_fused_kernel(B, N, R, H, Cs, L, Ts):
    BN = B * N
    H2 = 2 * H
    n_in = 6 + 2 * L + 2 * (L - 1) + 14
    f32 = jnp.float32
    bf16 = jnp.bfloat16

    def kernel(*refs):
        ins = refs[:n_in]
        out_ref = refs[n_in]          # (B*Cs, N) final model output
        z3_ref = refs[n_in + 1]       # (B*N, Cs) pre-MLP output (validation aid)

        xcat0_ref, n2t_ref, n1t_ref, wih_ref, whh_ref, b_ref = ins[0:6]
        pos = 6
        gc_refs = []
        for _ in range(L):
            gc_refs.append((ins[pos], ins[pos + 1]))
            pos += 2
        bn_refs = []
        for _ in range(L - 1):
            bn_refs.append((ins[pos], ins[pos + 1]))
            pos += 2
        (we1_ref, be1_ref, we2_ref, be2_ref, wlin_ref, blin_ref,
         wf1a_ref, wf1b_ref, wf1c_ref, bf1_ref, wf2_ref, bf2_ref,
         y_ref, ym_ref) = ins[pos:pos + 14]

        # ---- adaptive adjacency, computed & stored transposed (A^T) ----------
        # M^T = nodevec2^T @ nodevec1^T ; softmax over torch dim=1 == axis 0 here.
        mT = jnp.dot(n2t_ref[...], n1t_ref[...], preferred_element_type=f32)
        mT = jnp.maximum(mT, 0.0)
        mT = mT - jnp.max(mT, axis=0, keepdims=True)
        eT = jnp.exp(mT)
        adpT = (eT / jnp.sum(eT, axis=0, keepdims=True)).astype(bf16)      # (N, N)

        # ---- fused bi-directional LSTM (both directions in one time loop) ----
        def bidir_lstm(xcat, T, layer):
            wih = wih_ref[layer]                    # (2F, 8H) bf16
            whh = whh_ref[layer]                    # (2H, 8H) bf16 block-diag
            bb = b_ref[layer]                       # (1, 8H)  f32
            # hoisted input projection for the whole sequence (lane-dense 128 wide)
            xw = jnp.dot(xcat, wih, preferred_element_type=f32) + bb       # (T*BN, 8H)
            h = jnp.zeros((BN, H2), f32)
            c = jnp.zeros((BN, H2), f32)
            hs = []
            for t in range(T):
                g = xw[t * BN:(t + 1) * BN, :] + jnp.dot(
                    h.astype(bf16), whh, preferred_element_type=f32)       # (BN, 8H)
                # columns: [i_fw, i_bw, f_fw, f_bw, o_fw, o_bw | g_fw, g_bw]
                sg = jax.nn.sigmoid(g[:, 0:6 * H])
                tg = jnp.tanh(g[:, 6 * H:8 * H])
                c = sg[:, 2 * H:4 * H] * c + sg[:, 0:2 * H] * tg
                h = sg[:, 4 * H:6 * H] * jnp.tanh(c)
                hs.append(h)
            return hs

        # ---- graph convolution on a node-major (BN, T*2H) slab ----------------
        def graph_conv(hs, T, layer):
            parts = []
            for t in range(T):
                parts.append(hs[t][:, 0:H])                 # fw hidden at time t
                parts.append(hs[T - 1 - t][:, H:H2])        # bw hidden aligned to t
            x0 = jnp.tanh(jnp.concatenate(parts, axis=1))   # (BN, T*2H) f32

            def mix(x):                                     # per-batch A^T @ x
                rows = [jnp.dot(adpT, x[b * N:(b + 1) * N, :].astype(bf16),
                                preferred_element_type=f32) for b in range(B)]
                return jnp.concatenate(rows, axis=0)

            x1 = mix(x0)
            x2 = mix(x1)
            wg_ref, bg_ref = gc_refs[layer]                 # (3, T*2H, T*R), (1, T*R)
            return (jnp.dot(x0.astype(bf16), wg_ref[0], preferred_element_type=f32)
                    + jnp.dot(x1.astype(bf16), wg_ref[1], preferred_element_type=f32)
                    + jnp.dot(x2.astype(bf16), wg_ref[2], preferred_element_type=f32)
                    + bg_ref[...])                          # (BN, T*R)

        # ---------------------------- layer stack ------------------------------
        acc = None
        xcat = xcat0_ref[...]                               # (T0*BN, 2R) bf16
        for layer in range(L):
            T = Ts[layer]
            hs = bidir_lstm(xcat, T, layer)
            g = graph_conv(hs, T, layer)                    # (BN, T*R)
            acc = g if acc is None else g + acc[:, acc.shape[1] - T * R:]
            if layer + 1 < L:
                Tn = Ts[layer + 1]
                bnsc_ref, bnsh_ref = bn_refs[layer]
                # stride-2 time slice (torch x[..., 0:nSeries:2]) + folded BatchNorm
                xn = jnp.concatenate(
                    [g[:, (2 * k) * R:(2 * k + 1) * R] for k in range(Tn)], axis=1)
                xn = xn * bnsc_ref[...] + bnsh_ref[...]
                # next layer's fused fw/bw input, rows ordered (t, bn)
                xparts = []
                for t in range(Tn):
                    xparts.append(jnp.concatenate(
                        [xn[:, t * R:(t + 1) * R],
                         xn[:, (Tn - 1 - t) * R:(Tn - t) * R]], axis=1))
                xcat = jnp.concatenate(xparts, axis=0).astype(bf16)

        # --------------------------- output tail -------------------------------
        z1 = jnp.dot(acc.astype(bf16), we1_ref[...],
                     preferred_element_type=f32) + be1_ref[...]             # (BN, Tf*H)
        z2 = jnp.dot(z1.astype(bf16), we2_ref[...],
                     preferred_element_type=f32) + be2_ref[...]             # (BN, Tf*Cs)
        z3 = jnp.dot(z2.astype(bf16), wlin_ref[...],
                     preferred_element_type=f32) + blin_ref[...]            # (BN, Cs)
        z3_ref[...] = z3

        # per-batch (node, cs) -> (cs, node) switch fused with the first block of
        # final_linear_out_1; done transpose-free with broadcast-mul + sublane sums
        wf1a = wf1a_ref[...]                                                # (N, 128) f32
        rows = []
        for b in range(B):
            z3b = z3[b * N:(b + 1) * N, :]                                  # (N, Cs)
            for csd in range(Cs):
                rows.append(jnp.sum(z3b[:, csd:csd + 1] * wf1a,
                                    axis=0, keepdims=True))                 # (1, 128)
        h1 = (jnp.concatenate(rows, axis=0)                                 # (B*Cs, 128)
              + jnp.dot(y_ref[...].astype(bf16), wf1b_ref[...],
                        preferred_element_type=f32)
              + jnp.dot(ym_ref[...].astype(bf16), wf1c_ref[...],
                        preferred_element_type=f32)
              + bf1_ref[...])
        out_ref[...] = jnp.dot(h1.astype(bf16), wf2_ref[...],
                               preferred_element_type=f32) + bf2_ref[...]   # (B*Cs, N)

    return kernel, n_in


# ----------------------------------------------------------------------------
# XLA glue: feature concat (start_conv + cat_feature_conv folded into mul/add)
# ----------------------------------------------------------------------------
def _feature_concat_rows(inp, mask, sw, cw, sb):
    """inp, mask: (B, T, N) -> (T*B*N, R), rows ordered (t, b, n)."""
    B, T, N = inp.shape
    it = jnp.transpose(inp, (1, 0, 2)).reshape(T * B * N, 1)
    mt = jnp.transpose(mask, (1, 0, 2)).reshape(T * B * N, 1)
    return it * sw[None, :] + mt * cw[None, :] + sb[None, :]


# ----------------------------------------------------------------------------
# full GCRINT forward (eval-mode semantics) -- one pallas_call
# ----------------------------------------------------------------------------
def gcrint_forward(kp, input_tensor, mask, input_bw, mask_bw, y, ymask):
    B, T, N = input_tensor.shape
    Cs = y.shape[1]
    L = kp["wih"].shape[0]
    H = kp["whh"].shape[1] // 2
    R = kp["wih"].shape[1] // 2
    Ts = _layer_time_lengths(T, N, L)

    xf = _feature_concat_rows(input_tensor, mask, kp["sw"], kp["cw"], kp["sb"])
    xb = _feature_concat_rows(input_bw, mask_bw, kp["sw"], kp["cw"], kp["sb"])
    xcat0 = jnp.concatenate([xf, xb], axis=1).astype(jnp.bfloat16)   # (T*BN, 2R)
    y2d = y.reshape(B * Cs, N)
    ym2d = ymask.reshape(B * Cs, N)

    kernel, n_in = _build_fused_kernel(B, N, R, H, Cs, L, Ts)
    args = [xcat0, kp["n2t"], kp["n1t"], kp["wih"], kp["whh"], kp["b"]]
    for l in range(L):
        args += [kp["wg"][l], kp["bg"][l]]
    for l in range(L - 1):
        args += [kp["bnsc"][l], kp["bnsh"][l]]
    args += [kp["we1"], kp["be1"], kp["we2"], kp["be2"], kp["wlin"], kp["blin"],
             kp["wf1a"], kp["wf1b"], kp["wf1c"], kp["bf1"], kp["wf2"], kp["bf2"],
             y2d, ym2d]
    assert len(args) == n_in

    out2d, z3 = pl.pallas_call(
        kernel,
        out_shape=(jax.ShapeDtypeStruct((B * Cs, N), jnp.float32),
                   jax.ShapeDtypeStruct((B * N, Cs), jnp.float32)),
        compiler_params=pltpu.CompilerParams(vmem_limit_bytes=32 * 1024 * 1024),
    )(*args)
    return out2d.reshape(B, Cs, N), z3


# ----------------------------------------------------------------------------
# deterministic parameter initialization (synthetic, PyTorch layout)
# ----------------------------------------------------------------------------
def init_params(key, cfg):
    N, H, R = cfg["nSeries"], cfg["lstm_hidden"], cfg["residual_channels"]
    L, apt = cfg["num_layers"], cfg["apt_size"]
    seq_out = cfg["seq_out"]
    t_final = int(seq_out / (2 ** (L - 1)))
    gcn_indim = cfg["gcn_indim"]
    keys = iter(jax.random.split(key, 96))

    def nrm(shape, s=0.25):
        return s * jax.random.normal(next(keys), shape, jnp.float32)

    def lstm_p(in_size):
        return dict(w_ih=nrm((4 * H, in_size)), w_hh=nrm((4 * H, H)),
                    b_ih=nrm((4 * H,)), b_hh=nrm((4 * H,)))

    def bn_p():
        return dict(gamma=1.0 + nrm((R,)), beta=nrm((R,)), rm=nrm((R,)),
                    rv=0.5 + jax.random.uniform(next(keys), (R,), jnp.float32))

    return dict(
        start_w=nrm((R, 1)), start_b=nrm((R,)),
        cat_w=nrm((R, gcn_indim - 1)), cat_b=nrm((R,)),
        nodevec1=jax.random.normal(next(keys), (N, apt), jnp.float32),
        nodevec2=jax.random.normal(next(keys), (apt, N), jnp.float32),
        lstm_1_fw=lstm_p(R), lstm_1_bw=lstm_p(R),
        lstm_bi=[dict(fw=lstm_p(R), bw=lstm_p(R)) for _ in range(L - 1)],
        gc=[dict(w=nrm((R, 3 * 2 * H)), b=nrm((R,))) for _ in range(L)],
        bn=[bn_p() for _ in range(L)],
        end1_w=nrm((H, R)), end1_b=nrm((H,)),
        end2_w=nrm((seq_out, H)), end2_b=nrm((seq_out,)),
        lin_out_w=nrm((1, t_final)), lin_out_b=nrm((1,)),
        fl1_w=nrm((128, 3 * N)), fl1_b=nrm((128,)),
        fl2_w=nrm((N, 128)), fl2_b=nrm((N,)),
    )


# ----------------------------------------------------------------------------
# one-time parameter prep: gate fusion, block-diag expansion, BN folding, bf16
# ----------------------------------------------------------------------------
def prepare_params(p, cfg):
    N = cfg["nSeries"]; L = cfg["num_layers"]
    H = cfg["lstm_hidden"]; R = cfg["residual_channels"]; Cs = cfg["seq_out"]
    Ts = _layer_time_lengths(cfg["T"], N, L)
    Tf = Ts[-1]
    eps = 1e-5
    bf16 = jnp.bfloat16

    def lstm_big(fw, bw):
        """Fuse both directions; columns [i_fw,i_bw,f_fw,f_bw,o_fw,o_bw,g_fw,g_bw]."""
        Fi = fw["w_ih"].shape[1]

        def gates(w):   # torch row order [i, f, g, o]
            return w[0:H], w[H:2 * H], w[2 * H:3 * H], w[3 * H:4 * H]

        ih = jnp.zeros((2 * Fi, 8 * H), jnp.float32)
        hh = jnp.zeros((2 * H, 8 * H), jnp.float32)
        gih_f, gih_b = gates(fw["w_ih"]), gates(bw["w_ih"])
        ghh_f, ghh_b = gates(fw["w_hh"]), gates(bw["w_hh"])
        for blk, gate in enumerate((0, 1, 3, 2)):          # i, f, o, g
            cf, cb = (2 * blk) * H, (2 * blk + 1) * H
            ih = ih.at[0:Fi, cf:cf + H].set(gih_f[gate].T)
            ih = ih.at[Fi:2 * Fi, cb:cb + H].set(gih_b[gate].T)
            hh = hh.at[0:H, cf:cf + H].set(ghh_f[gate].T)
            hh = hh.at[H:2 * H, cb:cb + H].set(ghh_b[gate].T)

        def bsplit(d):
            bb = d["b_ih"] + d["b_hh"]
            return bb[0:H], bb[H:2 * H], bb[2 * H:3 * H], bb[3 * H:4 * H]

        b_f, b_b = bsplit(fw), bsplit(bw)
        bb = jnp.concatenate([b_f[g] if s == 0 else b_b[g]
                              for g in (0, 1, 3, 2) for s in (0, 1)])[None, :]
        return ih, hh, bb

    wih_l, whh_l, b_l = [], [], []
    for l in range(L):
        if l == 0:
            ih, hh, bb = lstm_big(p["lstm_1_fw"], p["lstm_1_bw"])
        else:
            ih, hh, bb = lstm_big(p["lstm_bi"][l - 1]["fw"], p["lstm_bi"][l - 1]["bw"])
        wih_l.append(ih); whh_l.append(hh); b_l.append(bb)

    wg_l, bg_l = [], []
    for l in range(L):
        Tl = Ts[l]
        w = p["gc"][l]["w"]                                   # (R, 6H)
        eye = jnp.eye(Tl, dtype=jnp.float32)
        wg_l.append(jnp.stack([jnp.kron(eye, w[:, 0:2 * H].T),
                               jnp.kron(eye, w[:, 2 * H:4 * H].T),
                               jnp.kron(eye, w[:, 4 * H:6 * H].T)]).astype(bf16))
        bg_l.append(jnp.tile(p["gc"][l]["b"], (Tl,))[None, :])

    bnsc_l, bnsh_l = [], []
    for l in range(L - 1):
        Tn = Ts[l + 1]
        bn = p["bn"][l]
        sc = bn["gamma"] / jnp.sqrt(bn["rv"] + eps)
        sh = bn["beta"] - bn["rm"] * sc
        bnsc_l.append(jnp.tile(sc, (Tn,))[None, :])
        bnsh_l.append(jnp.tile(sh, (Tn,))[None, :])

    eye_tf = jnp.eye(Tf, dtype=jnp.float32)
    wf1t = p["fl1_w"].T                                       # (3N, 128)

    return dict(
        sw=p["start_w"][:, 0], cw=p["cat_w"][:, 0], sb=p["start_b"] + p["cat_b"],
        n2t=p["nodevec2"].T, n1t=p["nodevec1"].T,
        wih=jnp.stack(wih_l).astype(bf16),                    # (L, 2R, 8H)
        whh=jnp.stack(whh_l).astype(bf16),                    # (L, 2H, 8H)
        b=jnp.stack(b_l),                                     # (L, 1, 8H) f32
        wg=wg_l, bg=bg_l, bnsc=bnsc_l, bnsh=bnsh_l,
        we1=jnp.kron(eye_tf, p["end1_w"].T).astype(bf16),     # (Tf*R, Tf*H)
        be1=jnp.tile(p["end1_b"], (Tf,))[None, :],
        we2=jnp.kron(eye_tf, p["end2_w"].T).astype(bf16),     # (Tf*H, Tf*Cs)
        be2=jnp.tile(p["end2_b"], (Tf,))[None, :],
        wlin=jnp.kron(p["lin_out_w"][0].reshape(Tf, 1),
                      jnp.eye(Cs, dtype=jnp.float32)).astype(bf16),   # (Tf*Cs, Cs)
        blin=p["lin_out_b"].reshape(1, 1),
        wf1a=wf1t[0:N],                                       # f32 (VPU path)
        wf1b=wf1t[N:2 * N].astype(bf16),
        wf1c=wf1t[2 * N:3 * N].astype(bf16),
        bf1=p["fl1_b"][None, :],
        wf2=p["fl2_w"].T.astype(bf16),
        bf2=p["fl2_b"][None, :],
    )


# ----------------------------------------------------------------------------
# straightforward pure-JAX reference (torch-layout params) for validation
# ----------------------------------------------------------------------------
def gcrint_reference(p, inp, mask, inp_bw, mask_bw, y, ymask, cfg):
    B, T, N = inp.shape
    H = cfg["lstm_hidden"]; L = cfg["num_layers"]
    eps = 1e-5

    def feature_concat(a, m):
        av = jnp.transpose(a, (0, 2, 1))
        mv = jnp.transpose(m, (0, 2, 1))
        x1 = av[:, None, :, :] * p["start_w"][None, :, 0, None, None] \
            + p["start_b"][None, :, None, None]
        x2 = mv[:, None, :, :] * p["cat_w"][None, :, 0, None, None] \
            + p["cat_b"][None, :, None, None]
        return x1 + x2                                        # (B, R, N, T)

    def lstm_seq(x_seq, prm):
        rows, Tl, _ = x_seq.shape
        h = jnp.zeros((rows, H), jnp.float32)
        c = jnp.zeros((rows, H), jnp.float32)
        outs = []
        for t in range(Tl):
            gates = (x_seq[:, t, :] @ prm["w_ih"].T + prm["b_ih"]
                     + h @ prm["w_hh"].T + prm["b_hh"])
            i = jax.nn.sigmoid(gates[:, 0:H])
            f = jax.nn.sigmoid(gates[:, H:2 * H])
            g = jnp.tanh(gates[:, 2 * H:3 * H])
            o = jax.nn.sigmoid(gates[:, 3 * H:4 * H])
            c = f * c + i * g
            h = o * jnp.tanh(c)
            outs.append(h)
        return jnp.stack(outs, axis=1)

    def to_rows(x):          # (B, C, N, T) -> (B*N, T, C)
        Bb, C, Nn, Tt = x.shape
        return jnp.transpose(x, (0, 2, 3, 1)).reshape(Bb * Nn, Tt, C)

    def to_bcnt(rows):       # (B*N, T, C) -> (B, C, N, T)
        _, Tt, C = rows.shape
        return jnp.transpose(rows.reshape(B, N, Tt, C), (0, 3, 1, 2))

    def nconv(x, A):
        return jnp.einsum('bcvt,vw->bcwt', x, A)

    def graph_conv(x, A, w, b):
        x1 = nconv(x, A)
        x2 = nconv(x1, A)
        hcat = jnp.concatenate([x, x1, x2], axis=1)
        return jnp.einsum('bcnt,rc->brnt', hcat, w) + b[None, :, None, None]

    adp = jax.nn.softmax(jnp.maximum(p["nodevec1"] @ p["nodevec2"], 0.0), axis=1)
    x = feature_concat(inp, mask)
    x_bw = feature_concat(inp_bw, mask_bw)
    outputs = None
    for layer in range(L):
        seqlen = x.shape[2]
        if layer == 0:
            fw_out = lstm_seq(to_rows(x), p["lstm_1_fw"])
            bw_out = jnp.flip(lstm_seq(to_rows(x_bw), p["lstm_1_bw"]), axis=1)
        else:
            prm = p["lstm_bi"][layer - 1]
            xr = to_rows(x)
            fw_out = lstm_seq(xr, prm["fw"])
            bw_out = jnp.flip(lstm_seq(jnp.flip(xr, axis=1), prm["bw"]), axis=1)
        gcn_in = jnp.tanh(to_bcnt(jnp.concatenate([fw_out, bw_out], axis=-1)))
        g_out = graph_conv(gcn_in, adp, p["gc"][layer]["w"], p["gc"][layer]["b"])
        outputs = g_out if outputs is None else g_out + outputs[..., -g_out.shape[3]:]
        xn = g_out[..., 0:seqlen:2]
        bn = p["bn"][layer]
        sc = bn["gamma"] / jnp.sqrt(bn["rv"] + eps)
        x = xn * sc[None, :, None, None] + (bn["beta"] - bn["rm"] * sc)[None, :, None, None]
    z = jnp.einsum('brnt,hr->bhnt', outputs, p["end1_w"]) + p["end1_b"][None, :, None, None]
    z = jnp.einsum('bhnt,ch->bcnt', z, p["end2_w"]) + p["end2_b"][None, :, None, None]
    z3 = jnp.einsum('bcnt,t->bcn', z, p["lin_out_w"][0]) + p["lin_out_b"][0]
    q = jnp.concatenate([z3, y, ymask], axis=-1)
    h1 = jnp.einsum('bcj,mj->bcm', q, p["fl1_w"]) + p["fl1_b"][None, None, :]
    out = jnp.einsum('bcm,nm->bcn', h1, p["fl2_w"]) + p["fl2_b"][None, None, :]
    return out, z3


# ----------------------------------------------------------------------------
if __name__ == "__main__":
    key = jax.random.PRNGKey(0)
    kp_key, k0, k1, k2, k3 = jax.random.split(key, 5)
    params = init_params(kp_key, CFG)
    kparams = prepare_params(params, CFG)     # one-time prep, outside the hot path

    B, T, N, Cs = CFG["batch"], CFG["T"], CFG["nSeries"], CFG["seq_out"]
    input_tensor = jax.random.normal(k0, (B, T, N), jnp.float32)
    mask = (jax.random.uniform(k1, (B, T, N)) > 0.2).astype(jnp.float32)
    input_tensor_bw = jnp.flip(input_tensor, axis=1)
    mask_bw = jnp.flip(mask, axis=1)
    y = jax.random.normal(k2, (B, Cs, N), jnp.float32)
    ymask = (jax.random.uniform(k3, (B, Cs, N)) > 0.2).astype(jnp.float32)

    fwd = jax.jit(gcrint_forward)
    out, z3k = fwd(kparams, input_tensor, mask, input_tensor_bw, mask_bw, y, ymask)
    out = jax.block_until_ready(out)

    assert out.shape == (B, Cs, N), out.shape
    assert bool(jnp.all(jnp.isfinite(out)))

    # loose cross-check vs a straightforward pure-JAX reference (bf16 MXU operands
    # in the kernel => generous tolerances; guards against gross fusion/layout bugs)
    ref_out, ref_z3 = gcrint_reference(params, input_tensor, mask, input_tensor_bw,
                                       mask_bw, y, ymask, CFG)
    z3_bcn = jnp.transpose(z3k.reshape(B, N, Cs), (0, 2, 1))
    err_z3 = float(jnp.max(jnp.abs(z3_bcn - ref_z3)))
    err_out = float(jnp.max(jnp.abs(out - ref_out)))
    assert err_z3 < 0.2, f"pre-MLP mismatch vs reference: {err_z3}"
    assert err_out < 0.4, f"output mismatch vs reference: {err_out}"

    print("KERNEL_OK")
</pallas_src>

<mosaic_0001>
module attributes {stable_mosaic.version = 11 : i64} {
  func.func @kernel(%arg0: memref<128x16xbf16, #tpu.memory_space<vmem>>, %arg1: memref<8x4xf32, #tpu.memory_space<vmem>>, %arg2: memref<4x8xf32, #tpu.memory_space<vmem>>, %arg3: memref<2x16x128xbf16, #tpu.memory_space<vmem>>, %arg4: memref<2x32x128xbf16, #tpu.memory_space<vmem>>, %arg5: memref<2x1x128xf32, #tpu.memory_space<vmem>>, %arg6: memref<3x256x64xbf16, #tpu.memory_space<vmem>>, %arg7: memref<1x64xf32, #tpu.memory_space<vmem>>, %arg8: memref<3x128x32xbf16, #tpu.memory_space<vmem>>, %arg9: memref<1x32xf32, #tpu.memory_space<vmem>>, %arg10: memref<1x32xf32, #tpu.memory_space<vmem>>, %arg11: memref<1x32xf32, #tpu.memory_space<vmem>>, %arg12: memref<32x64xbf16, #tpu.memory_space<vmem>>, %arg13: memref<1x64xf32, #tpu.memory_space<vmem>>, %arg14: memref<64x32xbf16, #tpu.memory_space<vmem>>, %arg15: memref<1x32xf32, #tpu.memory_space<vmem>>, %arg16: memref<32x8xbf16, #tpu.memory_space<vmem>>, %arg17: memref<1x1xf32, #tpu.memory_space<vmem>>, %arg18: memref<8x128xf32, #tpu.memory_space<vmem>>, %arg19: memref<8x128xbf16, #tpu.memory_space<vmem>>, %arg20: memref<8x128xbf16, #tpu.memory_space<vmem>>, %arg21: memref<1x128xf32, #tpu.memory_space<vmem>>, %arg22: memref<128x8xbf16, #tpu.memory_space<vmem>>, %arg23: memref<1x8xf32, #tpu.memory_space<vmem>>, %arg24: memref<16x8xf32, #tpu.memory_space<vmem>>, %arg25: memref<16x8xf32, #tpu.memory_space<vmem>>, %arg26: memref<16x8xf32, #tpu.memory_space<vmem>>, %arg27: memref<16x8xf32, #tpu.memory_space<vmem>>) attributes {dimension_semantics = [], scalar_prefetch = 0 : i64, scratch_operands = 0 : i64, tpu.core_type = #tpu.core_type<tc>} {
    %c0 = arith.constant 0 : index
    %c0_0 = arith.constant 0 : index
    %0 = vector.load %arg1[%c0, %c0_0] : memref<8x4xf32, #tpu.memory_space<vmem>>, vector<8x4xf32>
    %c0_1 = arith.constant 0 : index
    %c0_2 = arith.constant 0 : index
    %1 = vector.load %arg2[%c0_1, %c0_2] : memref<4x8xf32, #tpu.memory_space<vmem>>, vector<4x8xf32>
    %cst = arith.constant dense<0.000000e+00> : vector<8x8xf32>
    %2 = tpu.matmul %0, %1, %cst {dimension_numbers = #tpu.dot_dimension_numbers<[1], [0], [0], [1], [0, 0, 1, 1], [], []>} : vector<8x4xf32>, vector<4x8xf32>, vector<8x8xf32> -> vector<8x8xf32>
    %cst_3 = arith.constant 0.000000e+00 : f32
    %3 = vector.broadcast %cst_3 : f32 to vector<8x8xf32>
    %4 = arith.maximumf %2, %3 : vector<8x8xf32>
    %cst_4 = arith.constant dense<0xFF800000> : vector<8xf32>
    %5 = vector.multi_reduction <maximumf>, %4, %cst_4 [0] : vector<8x8xf32> to vector<8xf32>
    %6 = vector.shape_cast %5 : vector<8xf32> to vector<1x8xf32>
    %7 = vector.broadcast %6 : vector<1x8xf32> to vector<8x8xf32>
    %8 = arith.subf %4, %7 : vector<8x8xf32>
    %9 = math.exp %8 : vector<8x8xf32>
    %cst_5 = arith.constant dense<0.000000e+00> : vector<8xf32>
    %10 = vector.multi_reduction <add>, %9, %cst_5 [0] : vector<8x8xf32> to vector<8xf32>
    %11 = vector.shape_cast %10 : vector<8xf32> to vector<1x8xf32>
    %12 = vector.broadcast %11 : vector<1x8xf32> to vector<8x8xf32>
    %13 = arith.divf %9, %12 : vector<8x8xf32>
    %14 = arith.truncf %13 : vector<8x8xf32> to vector<8x8xbf16>
    %c0_6 = arith.constant 0 : index
    %c0_7 = arith.constant 0 : index
    %15 = vector.load %arg0[%c0_6, %c0_7] : memref<128x16xbf16, #tpu.memory_space<vmem>>, vector<128x16xbf16>
    %c0_8 = arith.constant 0 : index
    %c0_9 = arith.constant 0 : index
    %c0_10 = arith.constant 0 : index
    %16 = vector.load %arg3[%c0_8, %c0_9, %c0_10] : memref<2x16x128xbf16, #tpu.memory_space<vmem>>, vector<1x16x128xbf16>
    %17 = vector.shape_cast %16 : vector<1x16x128xbf16> to vector<16x128xbf16>
    %c0_11 = arith.constant 0 : index
    %c0_12 = arith.constant 0 : index
    %c0_13 = arith.constant 0 : index
    %18 = vector.load %arg4[%c0_11, %c0_12, %c0_13] : memref<2x32x128xbf16, #tpu.memory_space<vmem>>, vector<1x32x128xbf16>
    %19 = vector.shape_cast %18 : vector<1x32x128xbf16> to vector<32x128xbf16>
    %c0_14 = arith.constant 0 : index
    %c0_15 = arith.constant 0 : index
    %c0_16 = arith.constant 0 : index
    %20 = vector.load %arg5[%c0_14, %c0_15, %c0_16] : memref<2x1x128xf32, #tpu.memory_space<vmem>>, vector<1x1x128xf32>
    %21 = vector.shape_cast %20 : vector<1x1x128xf32> to vector<1x128xf32>
    %cst_17 = arith.constant dense<0.000000e+00> : vector<128x128xf32>
    %22 = tpu.matmul %15, %17, %cst_17 {dimension_numbers = #tpu.dot_dimension_numbers<[1], [0], [0], [1], [0, 0, 1, 1], [], []>} : vector<128x16xbf16>, vector<16x128xbf16>, vector<128x128xf32> -> vector<128x128xf32>
    %23 = vector.broadcast %21 : vector<1x128xf32> to vector<128x128xf32>
    %24 = arith.addf %22, %23 : vector<128x128xf32>
    %cst_18 = arith.constant 0.000000e+00 : f32
    %25 = vector.broadcast %cst_18 : f32 to vector<16x32xf32>
    %cst_19 = arith.constant 0.000000e+00 : f32
    %26 = vector.broadcast %cst_19 : f32 to vector<16x32xf32>
    %27 = vector.extract_strided_slice %24 {offsets = [0, 0], sizes = [16, 128], strides = [1, 1]} : vector<128x128xf32> to vector<16x128xf32>
    %28 = arith.truncf %25 : vector<16x32xf32> to vector<16x32xbf16>
    %cst_20 = arith.constant dense<0.000000e+00> : vector<16x128xf32>
    %29 = tpu.matmul %28, %19, %cst_20 {dimension_numbers = #tpu.dot_dimension_numbers<[1], [0], [0], [1], [0, 0, 1, 1], [], []>} : vector<16x32xbf16>, vector<32x128xbf16>, vector<16x128xf32> -> vector<16x128xf32>
    %30 = arith.addf %27, %29 : vector<16x128xf32>
    %31 = vector.extract_strided_slice %30 {offsets = [0, 0], sizes = [16, 96], strides = [1, 1]} : vector<16x128xf32> to vector<16x96xf32>
    %32 = arith.negf %31 : vector<16x96xf32>
    %33 = math.exp %32 : vector<16x96xf32>
    %cst_21 = arith.constant 1.000000e+00 : f32
    %34 = vector.broadcast %cst_21 : f32 to vector<16x96xf32>
    %35 = arith.addf %34, %33 : vector<16x96xf32>
    %36 = arith.divf %34, %35 : vector<16x96xf32>
    %37 = vector.extract_strided_slice %30 {offsets = [0, 96], sizes = [16, 32], strides = [1, 1]} : vector<16x128xf32> to vector<16x32xf32>
    %38 = math.tanh %37 : vector<16x32xf32>
    %39 = vector.extract_strided_slice %36 {offsets = [0, 32], sizes = [16, 32], strides = [1, 1]} : vector<16x96xf32> to vector<16x32xf32>
    %40 = arith.mulf %39, %26 : vector<16x32xf32>
    %41 = vector.extract_strided_slice %36 {offsets = [0, 0], sizes = [16, 32], strides = [1, 1]} : vector<16x96xf32> to vector<16x32xf32>
    %42 = arith.mulf %41, %38 : vector<16x32xf32>
    %43 = arith.addf %40, %42 : vector<16x32xf32>
    %44 = vector.extract_strided_slice %36 {offsets = [0, 64], sizes = [16, 32], strides = [1, 1]} : vector<16x96xf32> to vector<16x32xf32>
    %45 = math.tanh %43 : vector<16x32xf32>
    %46 = arith.mulf %44, %45 : vector<16x32xf32>
    %47 = vector.extract_strided_slice %24 {offsets = [16, 0], sizes = [16, 128], strides = [1, 1]} : vector<128x128xf32> to vector<16x128xf32>
    %48 = arith.truncf %46 : vector<16x32xf32> to vector<16x32xbf16>
    %cst_22 = arith.constant dense<0.000000e+00> : vector<16x128xf32>
    %49 = tpu.matmul %48, %19, %cst_22 {dimension_numbers = #tpu.dot_dimension_numbers<[1], [0], [0], [1], [0, 0, 1, 1], [], []>} : vector<16x32xbf16>, vector<32x128xbf16>, vector<16x128xf32> -> vector<16x128xf32>
    %50 = arith.addf %47, %49 : vector<16x128xf32>
    %51 = vector.extract_strided_slice %50 {offsets = [0, 0], sizes = [16, 96], strides = [1, 1]} : vector<16x128xf32> to vector<16x96xf32>
    %52 = arith.negf %51 : vector<16x96xf32>
    %53 = math.exp %52 : vector<16x96xf32>
    %cst_23 = arith.constant 1.000000e+00 : f32
    %54 = vector.broadcast %cst_23 : f32 to vector<16x96xf32>
    %55 = arith.addf %54, %53 : vector<16x96xf32>
    %56 = arith.divf %54, %55 : vector<16x96xf32>
    %57 = vector.extract_strided_slice %50 {offsets = [0, 96], sizes = [16, 32], strides = [1, 1]} : vector<16x128xf32> to vector<16x32xf32>
    %58 = math.tanh %57 : vector<16x32xf32>
    %59 = vector.extract_strided_slice %56 {offsets = [0, 32], sizes = [16, 32], strides = [1, 1]} : vector<16x96xf32> to vector<16x32xf32>
    %60 = arith.mulf %59, %43 : vector<16x32xf32>
    %61 = vector.extract_strided_slice %56 {offsets = [0, 0], sizes = [16, 32], strides = [1, 1]} : vector<16x96xf32> to vector<16x32xf32>
    %62 = arith.mulf %61, %58 : vector<16x32xf32>
    %63 = arith.addf %60, %62 : vector<16x32xf32>
    %64 = vector.extract_strided_slice %56 {offsets = [0, 64], sizes = [16, 32], strides = [1, 1]} : vector<16x96xf32> to vector<16x32xf32>
    %65 = math.tanh %63 : vector<16x32xf32>
    %66 = arith.mulf %64, %65 : vector<16x32xf32>
    %67 = vector.extract_strided_slice %24 {offsets = [32, 0], sizes = [16, 128], strides = [1, 1]} : vector<128x128xf32> to vector<16x128xf32>
    %68 = arith.truncf %66 : vector<16x32xf32> to vector<16x32xbf16>
    %cst_24 = arith.constant dense<0.000000e+00> : vector<16x128xf32>
    %69 = tpu.matmul %68, %19, %cst_24 {dimension_numbers = #tpu.dot_dimension_numbers<[1], [0], [0], [1], [0, 0, 1, 1], [], []>} : vector<16x32xbf16>, vector<32x128xbf16>, vector<16x128xf32> -> vector<16x128xf32>
    %70 = arith.addf %67, %69 : vector<16x128xf32>
    %71 = vector.extract_strided_slice %70 {offsets = [0, 0], sizes = [16, 96], strides = [1, 1]} : vector<16x128xf32> to vector<16x96xf32>
    %72 = arith.negf %71 : vector<16x96xf32>
    %73 = math.exp %72 : vector<16x96xf32>
    %cst_25 = arith.constant 1.000000e+00 : f32
    %74 = vector.broadcast %cst_25 : f32 to vector<16x96xf32>
    %75 = arith.addf %74, %73 : vector<16x96xf32>
    %76 = arith.divf %74, %75 : vector<16x96xf32>
    %77 = vector.extract_strided_slice %70 {offsets = [0, 96], sizes = [16, 32], strides = [1, 1]} : vector<16x128xf32> to vector<16x32xf32>
    %78 = math.tanh %77 : vector<16x32xf32>
    %79 = vector.extract_strided_slice %76 {offsets = [0, 32], sizes = [16, 32], strides = [1, 1]} : vector<16x96xf32> to vector<16x32xf32>
    %80 = arith.mulf %79, %63 : vector<16x32xf32>
    %81 = vector.extract_strided_slice %76 {offsets = [0, 0], sizes = [16, 32], strides = [1, 1]} : vector<16x96xf32> to vector<16x32xf32>
    %82 = arith.mulf %81, %78 : vector<16x32xf32>
    %83 = arith.addf %80, %82 : vector<16x32xf32>
    %84 = vector.extract_strided_slice %76 {offsets = [0, 64], sizes = [16, 32], strides = [1, 1]} : vector<16x96xf32> to vector<16x32xf32>
    %85 = math.tanh %83 : vector<16x32xf32>
    %86 = arith.mulf %84, %85 : vector<16x32xf32>
    %87 = vector.extract_strided_slice %24 {offsets = [48, 0], sizes = [16, 128], strides = [1, 1]} : vector<128x128xf32> to vector<16x128xf32>
    %88 = arith.truncf %86 : vector<16x32xf32> to vector<16x32xbf16>
    %cst_26 = arith.constant dense<0.000000e+00> : vector<16x128xf32>
    %89 = tpu.matmul %88, %19, %cst_26 {dimension_numbers = #tpu.dot_dimension_numbers<[1], [0], [0], [1], [0, 0, 1, 1], [], []>} : vector<16x32xbf16>, vector<32x128xbf16>, vector<16x128xf32> -> vector<16x128xf32>
    %90 = arith.addf %87, %89 : vector<16x128xf32>
    %91 = vector.extract_strided_slice %90 {offsets = [0, 0], sizes = [16, 96], strides = [1, 1]} : vector<16x128xf32> to vector<16x96xf32>
    %92 = arith.negf %91 : vector<16x96xf32>
    %93 = math.exp %92 : vector<16x96xf32>
    %cst_27 = arith.constant 1.000000e+00 : f32
    %94 = vector.broadcast %cst_27 : f32 to vector<16x96xf32>
    %95 = arith.addf %94, %93 : vector<16x96xf32>
    %96 = arith.divf %94, %95 : vector<16x96xf32>
    %97 = vector.extract_strided_slice %90 {offsets = [0, 96], sizes = [16, 32], strides = [1, 1]} : vector<16x128xf32> to vector<16x32xf32>
    %98 = math.tanh %97 : vector<16x32xf32>
    %99 = vector.extract_strided_slice %96 {offsets = [0, 32], sizes = [16, 32], strides = [1, 1]} : vector<16x96xf32> to vector<16x32xf32>
    %100 = arith.mulf %99, %83 : vector<16x32xf32>
    %101 = vector.extract_strided_slice %96 {offsets = [0, 0], sizes = [16, 32], strides = [1, 1]} : vector<16x96xf32> to vector<16x32xf32>
    %102 = arith.mulf %101, %98 : vector<16x32xf32>
    %103 = arith.addf %100, %102 : vector<16x32xf32>
    %104 = vector.extract_strided_slice %96 {offsets = [0, 64], sizes = [16, 32], strides = [1, 1]} : vector<16x96xf32> to vector<16x32xf32>
    %105 = math.tanh %103 : vector<16x32xf32>
    %106 = arith.mulf %104, %105 : vector<16x32xf32>
    %107 = vector.extract_strided_slice %24 {offsets = [64, 0], sizes = [16, 128], strides = [1, 1]} : vector<128x128xf32> to vector<16x128xf32>
    %108 = arith.truncf %106 : vector<16x32xf32> to vector<16x32xbf16>
    %cst_28 = arith.constant dense<0.000000e+00> : vector<16x128xf32>
    %109 = tpu.matmul %108, %19, %cst_28 {dimension_numbers = #tpu.dot_dimension_numbers<[1], [0], [0], [1], [0, 0, 1, 1], [], []>} : vector<16x32xbf16>, vector<32x128xbf16>, vector<16x128xf32> -> vector<16x128xf32>
    %110 = arith.addf %107, %109 : vector<16x128xf32>
    %111 = vector.extract_strided_slice %110 {offsets = [0, 0], sizes = [16, 96], strides = [1, 1]} : vector<16x128xf32> to vector<16x96xf32>
    %112 = arith.negf %111 : vector<16x96xf32>
    %113 = math.exp %112 : vector<16x96xf32>
    %cst_29 = arith.constant 1.000000e+00 : f32
    %114 = vector.broadcast %cst_29 : f32 to vector<16x96xf32>
    %115 = arith.addf %114, %113 : vector<16x96xf32>
    %116 = arith.divf %114, %115 : vector<16x96xf32>
    %117 = vector.extract_strided_slice %110 {offsets = [0, 96], sizes = [16, 32], strides = [1, 1]} : vector<16x128xf32> to vector<16x32xf32>
    %118 = math.tanh %117 : vector<16x32xf32>
    %119 = vector.extract_strided_slice %116 {offsets = [0, 32], sizes = [16, 32], strides = [1, 1]} : vector<16x96xf32> to vector<16x32xf32>
    %120 = arith.mulf %119, %103 : vector<16x32xf32>
    %121 = vector.extract_strided_slice %116 {offsets = [0, 0], sizes = [16, 32], strides = [1, 1]} : vector<16x96xf32> to vector<16x32xf32>
    %122 = arith.mulf %121, %118 : vector<16x32xf32>
    %123 = arith.addf %120, %122 : vector<16x32xf32>
    %124 = vector.extract_strided_slice %116 {offsets = [0, 64], sizes = [16, 32], strides = [1, 1]} : vector<16x96xf32> to vector<16x32xf32>
    %125 = math.tanh %123 : vector<16x32xf32>
    %126 = arith.mulf %124, %125 : vector<16x32xf32>
    %127 = vector.extract_strided_slice %24 {offsets = [80, 0], sizes = [16, 128], strides = [1, 1]} : vector<128x128xf32> to vector<16x128xf32>
    %128 = arith.truncf %126 : vector<16x32xf32> to vector<16x32xbf16>
    %cst_30 = arith.constant dense<0.000000e+00> : vector<16x128xf32>
    %129 = tpu.matmul %128, %19, %cst_30 {dimension_numbers = #tpu.dot_dimension_numbers<[1], [0], [0], [1], [0, 0, 1, 1], [], []>} : vector<16x32xbf16>, vector<32x128xbf16>, vector<16x128xf32> -> vector<16x128xf32>
    %130 = arith.addf %127, %129 : vector<16x128xf32>
    %131 = vector.extract_strided_slice %130 {offsets = [0, 0], sizes = [16, 96], strides = [1, 1]} : vector<16x128xf32> to vector<16x96xf32>
    %132 = arith.negf %131 : vector<16x96xf32>
    %133 = math.exp %132 : vector<16x96xf32>
    %cst_31 = arith.constant 1.000000e+00 : f32
    %134 = vector.broadcast %cst_31 : f32 to vector<16x96xf32>
    %135 = arith.addf %134, %133 : vector<16x96xf32>
    %136 = arith.divf %134, %135 : vector<16x96xf32>
    %137 = vector.extract_strided_slice %130 {offsets = [0, 96], sizes = [16, 32], strides = [1, 1]} : vector<16x128xf32> to vector<16x32xf32>
    %138 = math.tanh %137 : vector<16x32xf32>
    %139 = vector.extract_strided_slice %136 {offsets = [0, 32], sizes = [16, 32], strides = [1, 1]} : vector<16x96xf32> to vector<16x32xf32>
    %140 = arith.mulf %139, %123 : vector<16x32xf32>
    %141 = vector.extract_strided_slice %136 {offsets = [0, 0], sizes = [16, 32], strides = [1, 1]} : vector<16x96xf32> to vector<16x32xf32>
    %142 = arith.mulf %141, %138 : vector<16x32xf32>
    %143 = arith.addf %140, %142 : vector<16x32xf32>
    %144 = vector.extract_strided_slice %136 {offsets = [0, 64], sizes = [16, 32], strides = [1, 1]} : vector<16x96xf32> to vector<16x32xf32>
    %145 = math.tanh %143 : vector<16x32xf32>
    %146 = arith.mulf %144, %145 : vector<16x32xf32>
    %147 = vector.extract_strided_slice %24 {offsets = [96, 0], sizes = [16, 128], strides = [1, 1]} : vector<128x128xf32> to vector<16x128xf32>
    %148 = arith.truncf %146 : vector<16x32xf32> to vector<16x32xbf16>
    %cst_32 = arith.constant dense<0.000000e+00> : vector<16x128xf32>
    %149 = tpu.matmul %148, %19, %cst_32 {dimension_numbers = #tpu.dot_dimension_numbers<[1], [0], [0], [1], [0, 0, 1, 1], [], []>} : vector<16x32xbf16>, vector<32x128xbf16>, vector<16x128xf32> -> vector<16x128xf32>
    %150 = arith.addf %147, %149 : vector<16x128xf32>
    %151 = vector.extract_strided_slice %150 {offsets = [0, 0], sizes = [16, 96], strides = [1, 1]} : vector<16x128xf32> to vector<16x96xf32>
    %152 = arith.negf %151 : vector<16x96xf32>
    %153 = math.exp %152 : vector<16x96xf32>
    %cst_33 = arith.constant 1.000000e+00 : f32
    %154 = vector.broadcast %cst_33 : f32 to vector<16x96xf32>
    %155 = arith.addf %154, %153 : vector<16x96xf32>
    %156 = arith.divf %154, %155 : vector<16x96xf32>
    %157 = vector.extract_strided_slice %150 {offsets = [0, 96], sizes = [16, 32], strides = [1, 1]} : vector<16x128xf32> to vector<16x32xf32>
    %158 = math.tanh %157 : vector<16x32xf32>
    %159 = vector.extract_strided_slice %156 {offsets = [0, 32], sizes = [16, 32], strides = [1, 1]} : vector<16x96xf32> to vector<16x32xf32>
    %160 = arith.mulf %159, %143 : vector<16x32xf32>
    %161 = vector.extract_strided_slice %156 {offsets = [0, 0], sizes = [16, 32], strides = [1, 1]} : vector<16x96xf32> to vector<16x32xf32>
    %162 = arith.mulf %161, %158 : vector<16x32xf32>
    %163 = arith.addf %160, %162 : vector<16x32xf32>
    %164 = vector.extract_strided_slice %156 {offsets = [0, 64], sizes = [16, 32], strides = [1, 1]} : vector<16x96xf32> to vector<16x32xf32>
    %165 = math.tanh %163 : vector<16x32xf32>
    %166 = arith.mulf %164, %165 : vector<16x32xf32>
    %167 = vector.extract_strided_slice %24 {offsets = [112, 0], sizes = [16, 128], strides = [1, 1]} : vector<128x128xf32> to vector<16x128xf32>
    %168 = arith.truncf %166 : vector<16x32xf32> to vector<16x32xbf16>
    %cst_34 = arith.constant dense<0.000000e+00> : vector<16x128xf32>
    %169 = tpu.matmul %168, %19, %cst_34 {dimension_numbers = #tpu.dot_dimension_numbers<[1], [0], [0], [1], [0, 0, 1, 1], [], []>} : vector<16x32xbf16>, vector<32x128xbf16>, vector<16x128xf32> -> vector<16x128xf32>
    %170 = arith.addf %167, %169 : vector<16x128xf32>
    %171 = vector.extract_strided_slice %170 {offsets = [0, 0], sizes = [16, 96], strides = [1, 1]} : vector<16x128xf32> to vector<16x96xf32>
    %172 = arith.negf %171 : vector<16x96xf32>
    %173 = math.exp %172 : vector<16x96xf32>
    %cst_35 = arith.constant 1.000000e+00 : f32
    %174 = vector.broadcast %cst_35 : f32 to vector<16x96xf32>
    %175 = arith.addf %174, %173 : vector<16x96xf32>
    %176 = arith.divf %174, %175 : vector<16x96xf32>
    %177 = vector.extract_strided_slice %170 {offsets = [0, 96], sizes = [16, 32], strides = [1, 1]} : vector<16x128xf32> to vector<16x32xf32>
    %178 = math.tanh %177 : vector<16x32xf32>
    %179 = vector.extract_strided_slice %176 {offsets = [0, 32], sizes = [16, 32], strides = [1, 1]} : vector<16x96xf32> to vector<16x32xf32>
    %180 = arith.mulf %179, %163 : vector<16x32xf32>
    %181 = vector.extract_strided_slice %176 {offsets = [0, 0], sizes = [16, 32], strides = [1, 1]} : vector<16x96xf32> to vector<16x32xf32>
    %182 = arith.mulf %181, %178 : vector<16x32xf32>
    %183 = arith.addf %180, %182 : vector<16x32xf32>
    %184 = vector.extract_strided_slice %176 {offsets = [0, 64], sizes = [16, 32], strides = [1, 1]} : vector<16x96xf32> to vector<16x32xf32>
    %185 = math.tanh %183 : vector<16x32xf32>
    %186 = arith.mulf %184, %185 : vector<16x32xf32>
    %187 = vector.extract_strided_slice %46 {offsets = [0, 0], sizes = [16, 16], strides = [1, 1]} : vector<16x32xf32> to vector<16x16xf32>
    %188 = vector.extract_strided_slice %186 {offsets = [0, 16], sizes = [16, 16], strides = [1, 1]} : vector<16x32xf32> to vector<16x16xf32>
    %189 = vector.extract_strided_slice %66 {offsets = [0, 0], sizes = [16, 16], strides = [1, 1]} : vector<16x32xf32> to vector<16x16xf32>
    %190 = vector.extract_strided_slice %166 {offsets = [0, 16], sizes = [16, 16], strides = [1, 1]} : vector<16x32xf32> to vector<16x16xf32>
    %191 = vector.extract_strided_slice %86 {offsets = [0, 0], sizes = [16, 16], strides = [1, 1]} : vector<16x32xf32> to vector<16x16xf32>
    %192 = vector.extract_strided_slice %146 {offsets = [0, 16], sizes = [16, 16], strides = [1, 1]} : vector<16x32xf32> to vector<16x16xf32>
    %193 = vector.extract_strided_slice %106 {offsets = [0, 0], sizes = [16, 16], strides = [1, 1]} : vector<16x32xf32> to vector<16x16xf32>
    %194 = vector.extract_strided_slice %126 {offsets = [0, 16], sizes = [16, 16], strides = [1, 1]} : vector<16x32xf32> to vector<16x16xf32>
    %195 = vector.extract_strided_slice %126 {offsets = [0, 0], sizes = [16, 16], strides = [1, 1]} : vector<16x32xf32> to vector<16x16xf32>
    %196 = vector.extract_strided_slice %106 {offsets = [0, 16], sizes = [16, 16], strides = [1, 1]} : vector<16x32xf32> to vector<16x16xf32>
    %197 = vector.extract_strided_slice %146 {offsets = [0, 0], sizes = [16, 16], strides = [1, 1]} : vector<16x32xf32> to vector<16x16xf32>
    %198 = vector.extract_strided_slice %86 {offsets = [0, 16], sizes = [16, 16], strides = [1, 1]} : vector<16x32xf32> to vector<16x16xf32>
    %199 = vector.extract_strided_slice %166 {offsets = [0, 0], sizes = [16, 16], strides = [1, 1]} : vector<16x32xf32> to vector<16x16xf32>
    %200 = vector.extract_strided_slice %66 {offsets = [0, 16], sizes = [16, 16], strides = [1, 1]} : vector<16x32xf32> to vector<16x16xf32>
    %201 = vector.extract_strided_slice %186 {offsets = [0, 0], sizes = [16, 16], strides = [1, 1]} : vector<16x32xf32> to vector<16x16xf32>
    %202 = vector.extract_strided_slice %46 {offsets = [0, 16], sizes = [16, 16], strides = [1, 1]} : vector<16x32xf32> to vector<16x16xf32>
    %203 = tpu.concatenate %187, %188, %189, %190, %191, %192, %193, %194, %195, %196, %197, %198, %199, %200, %201, %202 in 1 : vector<16x16xf32>, vector<16x16xf32>, vector<16x16xf32>, vector<16x16xf32>, vector<16x16xf32>, vector<16x16xf32>, vector<16x16xf32>, vector<16x16xf32>, vector<16x16xf32>, vector<16x16xf32>, vector<16x16xf32>, vector<16x16xf32>, vector<16x16xf32>, vector<16x16xf32>, vector<16x16xf32>, vector<16x16xf32> -> vector<16x256xf32>
    %204 = math.tanh %203 : vector<16x256xf32>
    %205 = vector.extract_strided_slice %204 {offsets = [0, 0], sizes = [8, 256], strides = [1, 1]} : vector<16x256xf32> to vector<8x256xf32>
    %206 = arith.truncf %205 : vector<8x256xf32> to vector<8x256xbf16>
    %cst_36 = arith.constant dense<0.000000e+00> : vector<8x256xf32>
    %207 = tpu.matmul %14, %206, %cst_36 {dimension_numbers = #tpu.dot_dimension_numbers<[1], [0], [0], [1], [0, 0, 1, 1], [], []>} : vector<8x8xbf16>, vector<8x256xbf16>, vector<8x256xf32> -> vector<8x256xf32>
    %208 = vector.extract_strided_slice %204 {offsets = [8, 0], sizes = [8, 256], strides = [1, 1]} : vector<16x256xf32> to vector<8x256xf32>
    %209 = arith.truncf %208 : vector<8x256xf32> to vector<8x256xbf16>
    %cst_37 = arith.constant dense<0.000000e+00> : vector<8x256xf32>
    %210 = tpu.matmul %14, %209, %cst_37 {dimension_numbers = #tpu.dot_dimension_numbers<[1], [0], [0], [1], [0, 0, 1, 1], [], []>} : vector<8x8xbf16>, vector<8x256xbf16>, vector<8x256xf32> -> vector<8x256xf32>
    %211 = tpu.concatenate %207, %210 in 0 : vector<8x256xf32>, vector<8x256xf32> -> vector<16x256xf32>
    %212 = vector.extract_strided_slice %211 {offsets = [0, 0], sizes = [8, 256], strides = [1, 1]} : vector<16x256xf32> to vector<8x256xf32>
    %213 = arith.truncf %212 : vector<8x256xf32> to vector<8x256xbf16>
    %cst_38 = arith.constant dense<0.000000e+00> : vector<8x256xf32>
    %214 = tpu.matmul %14, %213, %cst_38 {dimension_numbers = #tpu.dot_dimension_numbers<[1], [0], [0], [1], [0, 0, 1, 1], [], []>} : vector<8x8xbf16>, vector<8x256xbf16>, vector<8x256xf32> -> vector<8x256xf32>
    %215 = vector.extract_strided_slice %211 {offsets = [8, 0], sizes = [8, 256], strides = [1, 1]} : vector<16x256xf32> to vector<8x256xf32>
    %216 = arith.truncf %215 : vector<8x256xf32> to vector<8x256xbf16>
    %cst_39 = arith.constant dense<0.000000e+00> : vector<8x256xf32>
    %217 = tpu.matmul %14, %216, %cst_39 {dimension_numbers = #tpu.dot_dimension_numbers<[1], [0], [0], [1], [0, 0, 1, 1], [], []>} : vector<8x8xbf16>, vector<8x256xbf16>, vector<8x256xf32> -> vector<8x256xf32>
    %218 = tpu.concatenate %214, %217 in 0 : vector<8x256xf32>, vector<8x256xf32> -> vector<16x256xf32>
    %219 = arith.truncf %204 : vector<16x256xf32> to vector<16x256xbf16>
    %c0_40 = arith.constant 0 : index
    %c0_41 = arith.constant 0 : index
    %c0_42 = arith.constant 0 : index
    %220 = vector.load %arg6[%c0_40, %c0_41, %c0_42] : memref<3x256x64xbf16, #tpu.memory_space<vmem>>, vector<1x256x64xbf16>
    %221 = vector.shape_cast %220 : vector<1x256x64xbf16> to vector<256x64xbf16>
    %cst_43 = arith.constant dense<0.000000e+00> : vector<16x64xf32>
    %222 = tpu.matmul %219, %221, %cst_43 {dimension_numbers = #tpu.dot_dimension_numbers<[1], [0], [0], [1], [0, 0, 1, 1], [], []>} : vector<16x256xbf16>, vector<256x64xbf16>, vector<16x64xf32> -> vector<16x64xf32>
    %223 = arith.truncf %211 : vector<16x256xf32> to vector<16x256xbf16>
    %c1 = arith.constant 1 : index
    %c0_44 = arith.constant 0 : index
    %c0_45 = arith.constant 0 : index
    %224 = vector.load %arg6[%c1, %c0_44, %c0_45] : memref<3x256x64xbf16, #tpu.memory_space<vmem>>, vector<1x256x64xbf16>
    %225 = vector.shape_cast %224 : vector<1x256x64xbf16> to vector<256x64xbf16>
    %cst_46 = arith.constant dense<0.000000e+00> : vector<16x64xf32>
    %226 = tpu.matmul %223, %225, %cst_46 {dimension_numbers = #tpu.dot_dimension_numbers<[1], [0], [0], [1], [0, 0, 1, 1], [], []>} : vector<16x256xbf16>, vector<256x64xbf16>, vector<16x64xf32> -> vector<16x64xf32>
    %227 = arith.addf %222, %226 : vector<16x64xf32>
    %228 = arith.truncf %218 : vector<16x256xf32> to vector<16x256xbf16>
    %c2 = arith.constant 2 : index
    %c0_47 = arith.constant 0 : index
    %c0_48 = arith.constant 0 : index
    %229 = vector.load %arg6[%c2, %c0_47, %c0_48] : memref<3x256x64xbf16, #tpu.memory_space<vmem>>, vector<1x256x64xbf16>
    %230 = vector.shape_cast %229 : vector<1x256x64xbf16> to vector<256x64xbf16>
    %cst_49 = arith.constant dense<0.000000e+00> : vector<16x64xf32>
    %231 = tpu.matmul %228, %230, %cst_49 {dimension_numbers = #tpu.dot_dimension_numbers<[1], [0], [0], [1], [0, 0, 1, 1], [], []>} : vector<16x256xbf16>, vector<256x64xbf16>, vector<16x64xf32> -> vector<16x64xf32>
    %232 = arith.addf %227, %231 : vector<16x64xf32>
    %c0_50 = arith.constant 0 : index
    %c0_51 = arith.constant 0 : index
    %233 = vector.load %arg7[%c0_50, %c0_51] : memref<1x64xf32, #tpu.memory_space<vmem>>, vector<1x64xf32>
    %234 = vector.broadcast %233 : vector<1x64xf32> to vector<16x64xf32>
    %235 = arith.addf %232, %234 : vector<16x64xf32>
    %236 = vector.extract_strided_slice %235 {offsets = [0, 0], sizes = [16, 8], strides = [1, 1]} : vector<16x64xf32> to vector<16x8xf32>
    %237 = vector.extract_strided_slice %235 {offsets = [0, 16], sizes = [16, 8], strides = [1, 1]} : vector<16x64xf32> to vector<16x8xf32>
    %238 = vector.extract_strided_slice %235 {offsets = [0, 32], sizes = [16, 8], strides = [1, 1]} : vector<16x64xf32> to vector<16x8xf32>
    %239 = vector.extract_strided_slice %235 {offsets = [0, 48], sizes = [16, 8], strides = [1, 1]} : vector<16x64xf32> to vector<16x8xf32>
    %240 = tpu.concatenate %236, %237, %238, %239 in 1 : vector<16x8xf32>, vector<16x8xf32>, vector<16x8xf32>, vector<16x8xf32> -> vector<16x32xf32>
    %c0_52 = arith.constant 0 : index
    %c0_53 = arith.constant 0 : index
    %241 = vector.load %arg10[%c0_52, %c0_53] : memref<1x32xf32, #tpu.memory_space<vmem>>, vector<1x32xf32>
    %242 = vector.broadcast %241 : vector<1x32xf32> to vector<16x32xf32>
    %243 = arith.mulf %240, %242 : vector<16x32xf32>
    %c0_54 = arith.constant 0 : index
    %c0_55 = arith.constant 0 : index
    %244 = vector.load %arg11[%c0_54, %c0_55] : memref<1x32xf32, #tpu.memory_space<vmem>>, vector<1x32xf32>
    %245 = vector.broadcast %244 : vector<1x32xf32> to vector<16x32xf32>
    %246 = arith.addf %243, %245 : vector<16x32xf32>
    %247 = vector.extract_strided_slice %246 {offsets = [0, 0], sizes = [16, 8], strides = [1, 1]} : vector<16x32xf32> to vector<16x8xf32>
    %248 = vector.extract_strided_slice %246 {offsets = [0, 24], sizes = [16, 8], strides = [1, 1]} : vector<16x32xf32> to vector<16x8xf32>
    %249 = tpu.concatenate %247, %248 in 1 : vector<16x8xf32>, vector<16x8xf32> -> vector<16x16xf32>
    %250 = vector.extract_strided_slice %246 {offsets = [0, 8], sizes = [16, 8], strides = [1, 1]} : vector<16x32xf32> to vector<16x8xf32>
    %251 = vector.extract_strided_slice %246 {offsets = [0, 16], sizes = [16, 8], strides = [1, 1]} : vector<16x32xf32> to vector<16x8xf32>
    %252 = tpu.concatenate %250, %251 in 1 : vector<16x8xf32>, vector<16x8xf32> -> vector<16x16xf32>
    %253 = vector.extract_strided_slice %246 {offsets = [0, 16], sizes = [16, 8], strides = [1, 1]} : vector<16x32xf32> to vector<16x8xf32>
    %254 = vector.extract_strided_slice %246 {offsets = [0, 8], sizes = [16, 8], strides = [1, 1]} : vector<16x32xf32> to vector<16x8xf32>
    %255 = tpu.concatenate %253, %254 in 1 : vector<16x8xf32>, vector<16x8xf32> -> vector<16x16xf32>
    %256 = vector.extract_strided_slice %246 {offsets = [0, 24], sizes = [16, 8], strides = [1, 1]} : vector<16x32xf32> to vector<16x8xf32>
    %257 = vector.extract_strided_slice %246 {offsets = [0, 0], sizes = [16, 8], strides = [1, 1]} : vector<16x32xf32> to vector<16x8xf32>
    %258 = tpu.concatenate %256, %257 in 1 : vector<16x8xf32>, vector<16x8xf32> -> vector<16x16xf32>
    %259 = tpu.concatenate %249, %252, %255, %258 in 0 : vector<16x16xf32>, vector<16x16xf32>, vector<16x16xf32>, vector<16x16xf32> -> vector<64x16xf32>
    %260 = arith.truncf %259 : vector<64x16xf32> to vector<64x16xbf16>
    %c1_56 = arith.constant 1 : index
    %c0_57 = arith.constant 0 : index
    %c0_58 = arith.constant 0 : index
    %261 = vector.load %arg3[%c1_56, %c0_57, %c0_58] : memref<2x16x128xbf16, #tpu.memory_space<vmem>>, vector<1x16x128xbf16>
    %262 = vector.shape_cast %261 : vector<1x16x128xbf16> to vector<16x128xbf16>
    %c1_59 = arith.constant 1 : index
    %c0_60 = arith.constant 0 : index
    %c0_61 = arith.constant 0 : index
    %263 = vector.load %arg4[%c1_59, %c0_60, %c0_61] : memref<2x32x128xbf16, #tpu.memory_space<vmem>>, vector<1x32x128xbf16>
    %264 = vector.shape_cast %263 : vector<1x32x128xbf16> to vector<32x128xbf16>
    %c1_62 = arith.constant 1 : index
    %c0_63 = arith.constant 0 : index
    %c0_64 = arith.constant 0 : index
    %265 = vector.load %arg5[%c1_62, %c0_63, %c0_64] : memref<2x1x128xf32, #tpu.memory_space<vmem>>, vector<1x1x128xf32>
    %266 = vector.shape_cast %265 : vector<1x1x128xf32> to vector<1x128xf32>
    %cst_65 = arith.constant dense<0.000000e+00> : vector<64x128xf32>
    %267 = tpu.matmul %260, %262, %cst_65 {dimension_numbers = #tpu.dot_dimension_numbers<[1], [0], [0], [1], [0, 0, 1, 1], [], []>} : vector<64x16xbf16>, vector<16x128xbf16>, vector<64x128xf32> -> vector<64x128xf32>
    %268 = vector.broadcast %266 : vector<1x128xf32> to vector<64x128xf32>
    %269 = arith.addf %267, %268 : vector<64x128xf32>
    %cst_66 = arith.constant 0.000000e+00 : f32
    %270 = vector.broadcast %cst_66 : f32 to vector<16x32xf32>
    %cst_67 = arith.constant 0.000000e+00 : f32
    %271 = vector.broadcast %cst_67 : f32 to vector<16x32xf32>
    %272 = vector.extract_strided_slice %269 {offsets = [0, 0], sizes = [16, 128], strides = [1, 1]} : vector<64x128xf32> to vector<16x128xf32>
    %273 = arith.truncf %270 : vector<16x32xf32> to vector<16x32xbf16>
    %cst_68 = arith.constant dense<0.000000e+00> : vector<16x128xf32>
    %274 = tpu.matmul %273, %264, %cst_68 {dimension_numbers = #tpu.dot_dimension_numbers<[1], [0], [0], [1], [0, 0, 1, 1], [], []>} : vector<16x32xbf16>, vector<32x128xbf16>, vector<16x128xf32> -> vector<16x128xf32>
    %275 = arith.addf %272, %274 : vector<16x128xf32>
    %276 = vector.extract_strided_slice %275 {offsets = [0, 0], sizes = [16, 96], strides = [1, 1]} : vector<16x128xf32> to vector<16x96xf32>
    %277 = arith.negf %276 : vector<16x96xf32>
    %278 = math.exp %277 : vector<16x96xf32>
    %cst_69 = arith.constant 1.000000e+00 : f32
    %279 = vector.broadcast %cst_69 : f32 to vector<16x96xf32>
    %280 = arith.addf %279, %278 : vector<16x96xf32>
    %281 = arith.divf %279, %280 : vector<16x96xf32>
    %282 = vector.extract_strided_slice %275 {offsets = [0, 96], sizes = [16, 32], strides = [1, 1]} : vector<16x128xf32> to vector<16x32xf32>
    %283 = math.tanh %282 : vector<16x32xf32>
    %284 = vector.extract_strided_slice %281 {offsets = [0, 32], sizes = [16, 32], strides = [1, 1]} : vector<16x96xf32> to vector<16x32xf32>
    %285 = arith.mulf %284, %271 : vector<16x32xf32>
    %286 = vector.extract_strided_slice %281 {offsets = [0, 0], sizes = [16, 32], strides = [1, 1]} : vector<16x96xf32> to vector<16x32xf32>
    %287 = arith.mulf %286, %283 : vector<16x32xf32>
    %288 = arith.addf %285, %287 : vector<16x32xf32>
    %289 = vector.extract_strided_slice %281 {offsets = [0, 64], sizes = [16, 32], strides = [1, 1]} : vector<16x96xf32> to vector<16x32xf32>
    %290 = math.tanh %288 : vector<16x32xf32>
    %291 = arith.mulf %289, %290 : vector<16x32xf32>
    %292 = vector.extract_strided_slice %269 {offsets = [16, 0], sizes = [16, 128], strides = [1, 1]} : vector<64x128xf32> to vector<16x128xf32>
    %293 = arith.truncf %291 : vector<16x32xf32> to vector<16x32xbf16>
    %cst_70 = arith.constant dense<0.000000e+00> : vector<16x128xf32>
    %294 = tpu.matmul %293, %264, %cst_70 {dimension_numbers = #tpu.dot_dimension_numbers<[1], [0], [0], [1], [0, 0, 1, 1], [], []>} : vector<16x32xbf16>, vector<32x128xbf16>, vector<16x128xf32> -> vector<16x128xf32>
    %295 = arith.addf %292, %294 : vector<16x128xf32>
    %296 = vector.extract_strided_slice %295 {offsets = [0, 0], sizes = [16, 96], strides = [1, 1]} : vector<16x128xf32> to vector<16x96xf32>
    %297 = arith.negf %296 : vector<16x96xf32>
    %298 = math.exp %297 : vector<16x96xf32>
    %cst_71 = arith.constant 1.000000e+00 : f32
    %299 = vector.broadcast %cst_71 : f32 to vector<16x96xf32>
    %300 = arith.addf %299, %298 : vector<16x96xf32>
    %301 = arith.divf %299, %300 : vector<16x96xf32>
    %302 = vector.extract_strided_slice %295 {offsets = [0, 96], sizes = [16, 32], strides = [1, 1]} : vector<16x128xf32> to vector<16x32xf32>
    %303 = math.tanh %302 : vector<16x32xf32>
    %304 = vector.extract_strided_slice %301 {offsets = [0, 32], sizes = [16, 32], strides = [1, 1]} : vector<16x96xf32> to vector<16x32xf32>
    %305 = arith.mulf %304, %288 : vector<16x32xf32>
    %306 = vector.extract_strided_slice %301 {offsets = [0, 0], sizes = [16, 32], strides = [1, 1]} : vector<16x96xf32> to vector<16x32xf32>
    %307 = arith.mulf %306, %303 : vector<16x32xf32>
    %308 = arith.addf %305, %307 : vector<16x32xf32>
    %309 = vector.extract_strided_slice %301 {offsets = [0, 64], sizes = [16, 32], strides = [1, 1]} : vector<16x96xf32> to vector<16x32xf32>
    %310 = math.tanh %308 : vector<16x32xf32>
    %311 = arith.mulf %309, %310 : vector<16x32xf32>
    %312 = vector.extract_strided_slice %269 {offsets = [32, 0], sizes = [16, 128], strides = [1, 1]} : vector<64x128xf32> to vector<16x128xf32>
    %313 = arith.truncf %311 : vector<16x32xf32> to vector<16x32xbf16>
    %cst_72 = arith.constant dense<0.000000e+00> : vector<16x128xf32>
    %314 = tpu.matmul %313, %264, %cst_72 {dimension_numbers = #tpu.dot_dimension_numbers<[1], [0], [0], [1], [0, 0, 1, 1], [], []>} : vector<16x32xbf16>, vector<32x128xbf16>, vector<16x128xf32> -> vector<16x128xf32>
    %315 = arith.addf %312, %314 : vector<16x128xf32>
    %316 = vector.extract_strided_slice %315 {offsets = [0, 0], sizes = [16, 96], strides = [1, 1]} : vector<16x128xf32> to vector<16x96xf32>
    %317 = arith.negf %316 : vector<16x96xf32>
    %318 = math.exp %317 : vector<16x96xf32>
    %cst_73 = arith.constant 1.000000e+00 : f32
    %319 = vector.broadcast %cst_73 : f32 to vector<16x96xf32>
    %320 = arith.addf %319, %318 : vector<16x96xf32>
    %321 = arith.divf %319, %320 : vector<16x96xf32>
    %322 = vector.extract_strided_slice %315 {offsets = [0, 96], sizes = [16, 32], strides = [1, 1]} : vector<16x128xf32> to vector<16x32xf32>
    %323 = math.tanh %322 : vector<16x32xf32>
    %324 = vector.extract_strided_slice %321 {offsets = [0, 32], sizes = [16, 32], strides = [1, 1]} : vector<16x96xf32> to vector<16x32xf32>
    %325 = arith.mulf %324, %308 : vector<16x32xf32>
    %326 = vector.extract_strided_slice %321 {offsets = [0, 0], sizes = [16, 32], strides = [1, 1]} : vector<16x96xf32> to vector<16x32xf32>
    %327 = arith.mulf %326, %323 : vector<16x32xf32>
    %328 = arith.addf %325, %327 : vector<16x32xf32>
    %329 = vector.extract_strided_slice %321 {offsets = [0, 64], sizes = [16, 32], strides = [1, 1]} : vector<16x96xf32> to vector<16x32xf32>
    %330 = math.tanh %328 : vector<16x32xf32>
    %331 = arith.mulf %329, %330 : vector<16x32xf32>
    %332 = vector.extract_strided_slice %269 {offsets = [48, 0], sizes = [16, 128], strides = [1, 1]} : vector<64x128xf32> to vector<16x128xf32>
    %333 = arith.truncf %331 : vector<16x32xf32> to vector<16x32xbf16>
    %cst_74 = arith.constant dense<0.000000e+00> : vector<16x128xf32>
    %334 = tpu.matmul %333, %264, %cst_74 {dimension_numbers = #tpu.dot_dimension_numbers<[1], [0], [0], [1], [0, 0, 1, 1], [], []>} : vector<16x32xbf16>, vector<32x128xbf16>, vector<16x128xf32> -> vector<16x128xf32>
    %335 = arith.addf %332, %334 : vector<16x128xf32>
    %336 = vector.extract_strided_slice %335 {offsets = [0, 0], sizes = [16, 96], strides = [1, 1]} : vector<16x128xf32> to vector<16x96xf32>
    %337 = arith.negf %336 : vector<16x96xf32>
    %338 = math.exp %337 : vector<16x96xf32>
    %cst_75 = arith.constant 1.000000e+00 : f32
    %339 = vector.broadcast %cst_75 : f32 to vector<16x96xf32>
    %340 = arith.addf %339, %338 : vector<16x96xf32>
    %341 = arith.divf %339, %340 : vector<16x96xf32>
    %342 = vector.extract_strided_slice %335 {offsets = [0, 96], sizes = [16, 32], strides = [1, 1]} : vector<16x128xf32> to vector<16x32xf32>
    %343 = math.tanh %342 : vector<16x32xf32>
    %344 = vector.extract_strided_slice %341 {offsets = [0, 32], sizes = [16, 32], strides = [1, 1]} : vector<16x96xf32> to vector<16x32xf32>
    %345 = arith.mulf %344, %328 : vector<16x32xf32>
    %346 = vector.extract_strided_slice %341 {offsets = [0, 0], sizes = [16, 32], strides = [1, 1]} : vector<16x96xf32> to vector<16x32xf32>
    %347 = arith.mulf %346, %343 : vector<16x32xf32>
    %348 = arith.addf %345, %347 : vector<16x32xf32>
    %349 = vector.extract_strided_slice %341 {offsets = [0, 64], sizes = [16, 32], strides = [1, 1]} : vector<16x96xf32> to vector<16x32xf32>
    %350 = math.tanh %348 : vector<16x32xf32>
    %351 = arith.mulf %349, %350 : vector<16x32xf32>
    %352 = vector.extract_strided_slice %291 {offsets = [0, 0], sizes = [16, 16], strides = [1, 1]} : vector<16x32xf32> to vector<16x16xf32>
    %353 = vector.extract_strided_slice %351 {offsets = [0, 16], sizes = [16, 16], strides = [1, 1]} : vector<16x32xf32> to vector<16x16xf32>
    %354 = vector.extract_strided_slice %311 {offsets = [0, 0], sizes = [16, 16], strides = [1, 1]} : vector<16x32xf32> to vector<16x16xf32>
    %355 = vector.extract_strided_slice %331 {offsets = [0, 16], sizes = [16, 16], strides = [1, 1]} : vector<16x32xf32> to vector<16x16xf32>
    %356 = vector.extract_strided_slice %331 {offsets = [0, 0], sizes = [16, 16], strides = [1, 1]} : vector<16x32xf32> to vector<16x16xf32>
    %357 = vector.extract_strided_slice %311 {offsets = [0, 16], sizes = [16, 16], strides = [1, 1]} : vector<16x32xf32> to vector<16x16xf32>
    %358 = vector.extract_strided_slice %351 {offsets = [0, 0], sizes = [16, 16], strides = [1, 1]} : vector<16x32xf32> to vector<16x16xf32>
    %359 = vector.extract_strided_slice %291 {offsets = [0, 16], sizes = [16, 16], strides = [1, 1]} : vector<16x32xf32> to vector<16x16xf32>
    %360 = tpu.concatenate %352, %353, %354, %355, %356, %357, %358, %359 in 1 : vector<16x16xf32>, vector<16x16xf32>, vector<16x16xf32>, vector<16x16xf32>, vector<16x16xf32>, vector<16x16xf32>, vector<16x16xf32>, vector<16x16xf32> -> vector<16x128xf32>
    %361 = math.tanh %360 : vector<16x128xf32>
    %362 = vector.extract_strided_slice %361 {offsets = [0, 0], sizes = [8, 128], strides = [1, 1]} : vector<16x128xf32> to vector<8x128xf32>
    %363 = arith.truncf %362 : vector<8x128xf32> to vector<8x128xbf16>
    %cst_76 = arith.constant dense<0.000000e+00> : vector<8x128xf32>
    %364 = tpu.matmul %14, %363, %cst_76 {dimension_numbers = #tpu.dot_dimension_numbers<[1], [0], [0], [1], [0, 0, 1, 1], [], []>} : vector<8x8xbf16>, vector<8x128xbf16>, vector<8x128xf32> -> vector<8x128xf32>
    %365 = vector.extract_strided_slice %361 {offsets = [8, 0], sizes = [8, 128], strides = [1, 1]} : vector<16x128xf32> to vector<8x128xf32>
    %366 = arith.truncf %365 : vector<8x128xf32> to vector<8x128xbf16>
    %cst_77 = arith.constant dense<0.000000e+00> : vector<8x128xf32>
    %367 = tpu.matmul %14, %366, %cst_77 {dimension_numbers = #tpu.dot_dimension_numbers<[1], [0], [0], [1], [0, 0, 1, 1], [], []>} : vector<8x8xbf16>, vector<8x128xbf16>, vector<8x128xf32> -> vector<8x128xf32>
    %368 = tpu.concatenate %364, %367 in 0 : vector<8x128xf32>, vector<8x128xf32> -> vector<16x128xf32>
    %369 = vector.extract_strided_slice %368 {offsets = [0, 0], sizes = [8, 128], strides = [1, 1]} : vector<16x128xf32> to vector<8x128xf32>
    %370 = arith.truncf %369 : vector<8x128xf32> to vector<8x128xbf16>
    %cst_78 = arith.constant dense<0.000000e+00> : vector<8x128xf32>
    %371 = tpu.matmul %14, %370, %cst_78 {dimension_numbers = #tpu.dot_dimension_numbers<[1], [0], [0], [1], [0, 0, 1, 1], [], []>} : vector<8x8xbf16>, vector<8x128xbf16>, vector<8x128xf32> -> vector<8x128xf32>
    %372 = vector.extract_strided_slice %368 {offsets = [8, 0], sizes = [8, 128], strides = [1, 1]} : vector<16x128xf32> to vector<8x128xf32>
    %373 = arith.truncf %372 : vector<8x128xf32> to vector<8x128xbf16>
    %cst_79 = arith.constant dense<0.000000e+00> : vector<8x128xf32>
    %374 = tpu.matmul %14, %373, %cst_79 {dimension_numbers = #tpu.dot_dimension_numbers<[1], [0], [0], [1], [0, 0, 1, 1], [], []>} : vector<8x8xbf16>, vector<8x128xbf16>, vector<8x128xf32> -> vector<8x128xf32>
    %375 = tpu.concatenate %371, %374 in 0 : vector<8x128xf32>, vector<8x128xf32> -> vector<16x128xf32>
    %376 = arith.truncf %361 : vector<16x128xf32> to vector<16x128xbf16>
    %c0_80 = arith.constant 0 : index
    %c0_81 = arith.constant 0 : index
    %c0_82 = arith.constant 0 : index
    %377 = vector.load %arg8[%c0_80, %c0_81, %c0_82] : memref<3x128x32xbf16, #tpu.memory_space<vmem>>, vector<1x128x32xbf16>
    %378 = vector.shape_cast %377 : vector<1x128x32xbf16> to vector<128x32xbf16>
    %cst_83 = arith.constant dense<0.000000e+00> : vector<16x32xf32>
    %379 = tpu.matmul %376, %378, %cst_83 {dimension_numbers = #tpu.dot_dimension_numbers<[1], [0], [0], [1], [0, 0, 1, 1], [], []>} : vector<16x128xbf16>, vector<128x32xbf16>, vector<16x32xf32> -> vector<16x32xf32>
    %380 = arith.truncf %368 : vector<16x128xf32> to vector<16x128xbf16>
    %c1_84 = arith.constant 1 : index
    %c0_85 = arith.constant 0 : index
    %c0_86 = arith.constant 0 : index
    %381 = vector.load %arg8[%c1_84, %c0_85, %c0_86] : memref<3x128x32xbf16, #tpu.memory_space<vmem>>, vector<1x128x32xbf16>
    %382 = vector.shape_cast %381 : vector<1x128x32xbf16> to vector<128x32xbf16>
    %cst_87 = arith.constant dense<0.000000e+00> : vector<16x32xf32>
    %383 = tpu.matmul %380, %382, %cst_87 {dimension_numbers = #tpu.dot_dimension_numbers<[1], [0], [0], [1], [0, 0, 1, 1], [], []>} : vector<16x128xbf16>, vector<128x32xbf16>, vector<16x32xf32> -> vector<16x32xf32>
    %384 = arith.addf %379, %383 : vector<16x32xf32>
    %385 = arith.truncf %375 : vector<16x128xf32> to vector<16x128xbf16>
    %c2_88 = arith.constant 2 : index
    %c0_89 = arith.constant 0 : index
    %c0_90 = arith.constant 0 : index
    %386 = vector.load %arg8[%c2_88, %c0_89, %c0_90] : memref<3x128x32xbf16, #tpu.memory_space<vmem>>, vector<1x128x32xbf16>
    %387 = vector.shape_cast %386 : vector<1x128x32xbf16> to vector<128x32xbf16>
    %cst_91 = arith.constant dense<0.000000e+00> : vector<16x32xf32>
    %388 = tpu.matmul %385, %387, %cst_91 {dimension_numbers = #tpu.dot_dimension_numbers<[1], [0], [0], [1], [0, 0, 1, 1], [], []>} : vector<16x128xbf16>, vector<128x32xbf16>, vector<16x32xf32> -> vector<16x32xf32>
    %389 = arith.addf %384, %388 : vector<16x32xf32>
    %c0_92 = arith.constant 0 : index
    %c0_93 = arith.constant 0 : index
    %390 = vector.load %arg9[%c0_92, %c0_93] : memref<1x32xf32, #tpu.memory_space<vmem>>, vector<1x32xf32>
    %391 = vector.broadcast %390 : vector<1x32xf32> to vector<16x32xf32>
    %392 = arith.addf %389, %391 : vector<16x32xf32>
    %393 = vector.extract_strided_slice %235 {offsets = [0, 32], sizes = [16, 32], strides = [1, 1]} : vector<16x64xf32> to vector<16x32xf32>
    %394 = arith.addf %392, %393 : vector<16x32xf32>
    %395 = arith.truncf %394 : vector<16x32xf32> to vector<16x32xbf16>
    %c0_94 = arith.constant 0 : index
    %c0_95 = arith.constant 0 : index
    %396 = vector.load %arg12[%c0_94, %c0_95] : memref<32x64xbf16, #tpu.memory_space<vmem>>, vector<32x64xbf16>
    %cst_96 = arith.constant dense<0.000000e+00> : vector<16x64xf32>
    %397 = tpu.matmul %395, %396, %cst_96 {dimension_numbers = #tpu.dot_dimension_numbers<[1], [0], [0], [1], [0, 0, 1, 1], [], []>} : vector<16x32xbf16>, vector<32x64xbf16>, vector<16x64xf32> -> vector<16x64xf32>
    %c0_97 = arith.constant 0 : index
    %c0_98 = arith.constant 0 : index
    %398 = vector.load %arg13[%c0_97, %c0_98] : memref<1x64xf32, #tpu.memory_space<vmem>>, vector<1x64xf32>
    %399 = vector.broadcast %398 : vector<1x64xf32> to vector<16x64xf32>
    %400 = arith.addf %397, %399 : vector<16x64xf32>
    %401 = arith.truncf %400 : vector<16x64xf32> to vector<16x64xbf16>
    %c0_99 = arith.constant 0 : index
    %c0_100 = arith.constant 0 : index
    %402 = vector.load %arg14[%c0_99, %c0_100] : memref<64x32xbf16, #tpu.memory_space<vmem>>, vector<64x32xbf16>
    %cst_101 = arith.constant dense<0.000000e+00> : vector<16x32xf32>
    %403 = tpu.matmul %401, %402, %cst_101 {dimension_numbers = #tpu.dot_dimension_numbers<[1], [0], [0], [1], [0, 0, 1, 1], [], []>} : vector<16x64xbf16>, vector<64x32xbf16>, vector<16x32xf32> -> vector<16x32xf32>
    %c0_102 = arith.constant 0 : index
    %c0_103 = arith.constant 0 : index
    %404 = vector.load %arg15[%c0_102, %c0_103] : memref<1x32xf32, #tpu.memory_space<vmem>>, vector<1x32xf32>
    %405 = vector.broadcast %404 : vector<1x32xf32> to vector<16x32xf32>
    %406 = arith.addf %403, %405 : vector<16x32xf32>
    %407 = arith.truncf %406 : vector<16x32xf32> to vector<16x32xbf16>
    %c0_104 = arith.constant 0 : index
    %c0_105 = arith.constant 0 : index
    %408 = vector.load %arg16[%c0_104, %c0_105] : memref<32x8xbf16, #tpu.memory_space<vmem>>, vector<32x8xbf16>
    %cst_106 = arith.constant dense<0.000000e+00> : vector<16x8xf32>
    %409 = tpu.matmul %407, %408, %cst_106 {dimension_numbers = #tpu.dot_dimension_numbers<[1], [0], [0], [1], [0, 0, 1, 1], [], []>} : vector<16x32xbf16>, vector<32x8xbf16>, vector<16x8xf32> -> vector<16x8xf32>
    %c0_107 = arith.constant 0 : index
    %c0_108 = arith.constant 0 : index
    %410 = vector.load %arg17[%c0_107, %c0_108] : memref<1x1xf32, #tpu.memory_space<vmem>>, vector<1x1xf32>
    %411 = vector.broadcast %410 : vector<1x1xf32> to vector<16x8xf32>
    %412 = arith.addf %409, %411 : vector<16x8xf32>
    %c0_109 = arith.constant 0 : index
    %c0_110 = arith.constant 0 : index
    %413 = vector.load %arg27[%c0_109, %c0_110] : memref<16x8xf32, #tpu.memory_space<vmem>>, vector<16x8xf32>
    tpu.vector_store %arg27[%c0_109, %c0_110], %412 {strides = array<i32>} : memref<16x8xf32, #tpu.memory_space<vmem>>, vector<16x8xf32>,
    %c0_111 = arith.constant 0 : index
    %c0_112 = arith.constant 0 : index
    %414 = vector.load %arg18[%c0_111, %c0_112] : memref<8x128xf32, #tpu.memory_space<vmem>>, vector<8x128xf32>
    %415 = vector.extract_strided_slice %412 {offsets = [0, 0], sizes = [8, 8], strides = [1, 1]} : vector<16x8xf32> to vector<8x8xf32>
    %416 = vector.extract_strided_slice %415 {offsets = [0, 0], sizes = [8, 1], strides = [1, 1]} : vector<8x8xf32> to vector<8x1xf32>
    %417 = vector.broadcast %416 : vector<8x1xf32> to vector<8x128xf32>
    %418 = arith.mulf %417, %414 : vector<8x128xf32>
    %cst_113 = arith.constant dense<0.000000e+00> : vector<128xf32>
    %419 = vector.multi_reduction <add>, %418, %cst_113 [0] : vector<8x128xf32> to vector<128xf32>
    %420 = vector.shape_cast %419 : vector<128xf32> to vector<1x128xf32>
    %421 = vector.extract_strided_slice %415 {offsets = [0, 1], sizes = [8, 1], strides = [1, 1]} : vector<8x8xf32> to vector<8x1xf32>
    %422 = vector.broadcast %421 : vector<8x1xf32> to vector<8x128xf32>
    %423 = arith.mulf %422, %414 : vector<8x128xf32>
    %cst_114 = arith.constant dense<0.000000e+00> : vector<128xf32>
    %424 = vector.multi_reduction <add>, %423, %cst_114 [0] : vector<8x128xf32> to vector<128xf32>
    %425 = vector.shape_cast %424 : vector<128xf32> to vector<1x128xf32>
    %426 = vector.extract_strided_slice %415 {offsets = [0, 2], sizes = [8, 1], strides = [1, 1]} : vector<8x8xf32> to vector<8x1xf32>
    %427 = vector.broadcast %426 : vector<8x1xf32> to vector<8x128xf32>
    %428 = arith.mulf %427, %414 : vector<8x128xf32>
    %cst_115 = arith.constant dense<0.000000e+00> : vector<128xf32>
    %429 = vector.multi_reduction <add>, %428, %cst_115 [0] : vector<8x128xf32> to vector<128xf32>
    %430 = vector.shape_cast %429 : vector<128xf32> to vector<1x128xf32>
    %431 = vector.extract_strided_slice %415 {offsets = [0, 3], sizes = [8, 1], strides = [1, 1]} : vector<8x8xf32> to vector<8x1xf32>
    %432 = vector.broadcast %431 : vector<8x1xf32> to vector<8x128xf32>
    %433 = arith.mulf %432, %414 : vector<8x128xf32>
    %cst_116 = arith.constant dense<0.000000e+00> : vector<128xf32>
    %434 = vector.multi_reduction <add>, %433, %cst_116 [0] : vector<8x128xf32> to vector<128xf32>
    %435 = vector.shape_cast %434 : vector<128xf32> to vector<1x128xf32>
    %436 = vector.extract_strided_slice %415 {offsets = [0, 4], sizes = [8, 1], strides = [1, 1]} : vector<8x8xf32> to vector<8x1xf32>
    %437 = vector.broadcast %436 : vector<8x1xf32> to vector<8x128xf32>
    %438 = arith.mulf %437, %414 : vector<8x128xf32>
    %cst_117 = arith.constant dense<0.000000e+00> : vector<128xf32>
    %439 = vector.multi_reduction <add>, %438, %cst_117 [0] : vector<8x128xf32> to vector<128xf32>
    %440 = vector.shape_cast %439 : vector<128xf32> to vector<1x128xf32>
    %441 = vector.extract_strided_slice %415 {offsets = [0, 5], sizes = [8, 1], strides = [1, 1]} : vector<8x8xf32> to vector<8x1xf32>
    %442 = vector.broadcast %441 : vector<8x1xf32> to vector<8x128xf32>
    %443 = arith.mulf %442, %414 : vector<8x128xf32>
    %cst_118 = arith.constant dense<0.000000e+00> : vector<128xf32>
    %444 = vector.multi_reduction <add>, %443, %cst_118 [0] : vector<8x128xf32> to vector<128xf32>
    %445 = vector.shape_cast %444 : vector<128xf32> to vector<1x128xf32>
    %446 = vector.extract_strided_slice %415 {offsets = [0, 6], sizes = [8, 1], strides = [1, 1]} : vector<8x8xf32> to vector<8x1xf32>
    %447 = vector.broadcast %446 : vector<8x1xf32> to vector<8x128xf32>
    %448 = arith.mulf %447, %414 : vector<8x128xf32>
    %cst_119 = arith.constant dense<0.000000e+00> : vector<128xf32>
    %449 = vector.multi_reduction <add>, %448, %cst_119 [0] : vector<8x128xf32> to vector<128xf32>
    %450 = vector.shape_cast %449 : vector<128xf32> to vector<1x128xf32>
    %451 = vector.extract_strided_slice %415 {offsets = [0, 7], sizes = [8, 1], strides = [1, 1]} : vector<8x8xf32> to vector<8x1xf32>
    %452 = vector.broadcast %451 : vector<8x1xf32> to vector<8x128xf32>
    %453 = arith.mulf %452, %414 : vector<8x128xf32>
    %cst_120 = arith.constant dense<0.000000e+00> : vector<128xf32>
    %454 = vector.multi_reduction <add>, %453, %cst_120 [0] : vector<8x128xf32> to vector<128xf32>
    %455 = vector.shape_cast %454 : vector<128xf32> to vector<1x128xf32>
    %456 = vector.extract_strided_slice %412 {offsets = [8, 0], sizes = [8, 8], strides = [1, 1]} : vector<16x8xf32> to vector<8x8xf32>
    %457 = vector.extract_strided_slice %456 {offsets = [0, 0], sizes = [8, 1], strides = [1, 1]} : vector<8x8xf32> to vector<8x1xf32>
    %458 = vector.broadcast %457 : vector<8x1xf32> to vector<8x128xf32>
    %459 = arith.mulf %458, %414 : vector<8x128xf32>
    %cst_121 = arith.constant dense<0.000000e+00> : vector<128xf32>
    %460 = vector.multi_reduction <add>, %459, %cst_121 [0] : vector<8x128xf32> to vector<128xf32>
    %461 = vector.shape_cast %460 : vector<128xf32> to vector<1x128xf32>
    %462 = vector.extract_strided_slice %456 {offsets = [0, 1], sizes = [8, 1], strides = [1, 1]} : vector<8x8xf32> to vector<8x1xf32>
    %463 = vector.broadcast %462 : vector<8x1xf32> to vector<8x128xf32>
    %464 = arith.mulf %463, %414 : vector<8x128xf32>
    %cst_122 = arith.constant dense<0.000000e+00> : vector<128xf32>
    %465 = vector.multi_reduction <add>, %464, %cst_122 [0] : vector<8x128xf32> to vector<128xf32>
    %466 = vector.shape_cast %465 : vector<128xf32> to vector<1x128xf32>
    %467 = vector.extract_strided_slice %456 {offsets = [0, 2], sizes = [8, 1], strides = [1, 1]} : vector<8x8xf32> to vector<8x1xf32>
    %468 = vector.broadcast %467 : vector<8x1xf32> to vector<8x128xf32>
    %469 = arith.mulf %468, %414 : vector<8x128xf32>
    %cst_123 = arith.constant dense<0.000000e+00> : vector<128xf32>
    %470 = vector.multi_reduction <add>, %469, %cst_123 [0] : vector<8x128xf32> to vector<128xf32>
    %471 = vector.shape_cast %470 : vector<128xf32> to vector<1x128xf32>
    %472 = vector.extract_strided_slice %456 {offsets = [0, 3], sizes = [8, 1], strides = [1, 1]} : vector<8x8xf32> to vector<8x1xf32>
    %473 = vector.broadcast %472 : vector<8x1xf32> to vector<8x128xf32>
    %474 = arith.mulf %473, %414 : vector<8x128xf32>
    %cst_124 = arith.constant dense<0.000000e+00> : vector<128xf32>
    %475 = vector.multi_reduction <add>, %474, %cst_124 [0] : vector<8x128xf32> to vector<128xf32>
    %476 = vector.shape_cast %475 : vector<128xf32> to vector<1x128xf32>
    %477 = vector.extract_strided_slice %456 {offsets = [0, 4], sizes = [8, 1], strides = [1, 1]} : vector<8x8xf32> to vector<8x1xf32>
    %478 = vector.broadcast %477 : vector<8x1xf32> to vector<8x128xf32>
    %479 = arith.mulf %478, %414 : vector<8x128xf32>
    %cst_125 = arith.constant dense<0.000000e+00> : vector<128xf32>
    %480 = vector.multi_reduction <add>, %479, %cst_125 [0] : vector<8x128xf32> to vector<128xf32>
    %481 = vector.shape_cast %480 : vector<128xf32> to vector<1x128xf32>
    %482 = vector.extract_strided_slice %456 {offsets = [0, 5], sizes = [8, 1], strides = [1, 1]} : vector<8x8xf32> to vector<8x1xf32>
    %483 = vector.broadcast %482 : vector<8x1xf32> to vector<8x128xf32>
    %484 = arith.mulf %483, %414 : vector<8x128xf32>
    %cst_126 = arith.constant dense<0.000000e+00> : vector<128xf32>
    %485 = vector.multi_reduction <add>, %484, %cst_126 [0] : vector<8x128xf32> to vector<128xf32>
    %486 = vector.shape_cast %485 : vector<128xf32> to vector<1x128xf32>
    %487 = vector.extract_strided_slice %456 {offsets = [0, 6], sizes = [8, 1], strides = [1, 1]} : vector<8x8xf32> to vector<8x1xf32>
    %488 = vector.broadcast %487 : vector<8x1xf32> to vector<8x128xf32>
    %489 = arith.mulf %488, %414 : vector<8x128xf32>
    %cst_127 = arith.constant dense<0.000000e+00> : vector<128xf32>
    %490 = vector.multi_reduction <add>, %489, %cst_127 [0] : vector<8x128xf32> to vector<128xf32>
    %491 = vector.shape_cast %490 : vector<128xf32> to vector<1x128xf32>
    %492 = vector.extract_strided_slice %456 {offsets = [0, 7], sizes = [8, 1], strides = [1, 1]} : vector<8x8xf32> to vector<8x1xf32>
    %493 = vector.broadcast %492 : vector<8x1xf32> to vector<8x128xf32>
    %494 = arith.mulf %493, %414 : vector<8x128xf32>
    %cst_128 = arith.constant dense<0.000000e+00> : vector<128xf32>
    %495 = vector.multi_reduction <add>, %494, %cst_128 [0] : vector<8x128xf32> to vector<128xf32>
    %496 = vector.shape_cast %495 : vector<128xf32> to vector<1x128xf32>
    %497 = tpu.concatenate %420, %425, %430, %435, %440, %445, %450, %455, %461, %466, %471, %476, %481, %486, %491, %496 in 0 : vector<1x128xf32>, vector<1x128xf32>, vector<1x128xf32>, vector<1x128xf32>, vector<1x128xf32>, vector<1x128xf32>, vector<1x128xf32>, vector<1x128xf32>, vector<1x128xf32>, vector<1x128xf32>, vector<1x128xf32>, vector<1x128xf32>, vector<1x128xf32>, vector<1x128xf32>, vector<1x128xf32>, vector<1x128xf32> -> vector<16x128xf32>
    %c0_129 = arith.constant 0 : index
    %c0_130 = arith.constant 0 : index
    %498 = vector.load %arg24[%c0_129, %c0_130] : memref<16x8xf32, #tpu.memory_space<vmem>>, vector<16x8xf32>
    %499 = arith.truncf %498 : vector<16x8xf32> to vector<16x8xbf16>
    %c0_131 = arith.constant 0 : index
    %c0_132 = arith.constant 0 : index
    %500 = vector.load %arg19[%c0_131, %c0_132] : memref<8x128xbf16, #tpu.memory_space<vmem>>, vector<8x128xbf16>
    %cst_133 = arith.constant dense<0.000000e+00> : vector<16x128xf32>
    %501 = tpu.matmul %499, %500, %cst_133 {dimension_numbers = #tpu.dot_dimension_numbers<[1], [0], [0], [1], [0, 0, 1, 1], [], []>} : vector<16x8xbf16>, vector<8x128xbf16>, vector<16x128xf32> -> vector<16x128xf32>
    %502 = arith.addf %497, %501 : vector<16x128xf32>
    %c0_134 = arith.constant 0 : index
    %c0_135 = arith.constant 0 : index
    %503 = vector.load %arg25[%c0_134, %c0_135] : memref<16x8xf32, #tpu.memory_space<vmem>>, vector<16x8xf32>
    %504 = arith.truncf %503 : vector<16x8xf32> to vector<16x8xbf16>
    %c0_136 = arith.constant 0 : index
    %c0_137 = arith.constant 0 : index
    %505 = vector.load %arg20[%c0_136, %c0_137] : memref<8x128xbf16, #tpu.memory_space<vmem>>, vector<8x128xbf16>
    %cst_138 = arith.constant dense<0.000000e+00> : vector<16x128xf32>
    %506 = tpu.matmul %504, %505, %cst_138 {dimension_numbers = #tpu.dot_dimension_numbers<[1], [0], [0], [1], [0, 0, 1, 1], [], []>} : vector<16x8xbf16>, vector<8x128xbf16>, vector<16x128xf32> -> vector<16x128xf32>
    %507 = arith.addf %502, %506 : vector<16x128xf32>
    %c0_139 = arith.constant 0 : index
    %c0_140 = arith.constant 0 : index
    %508 = vector.load %arg21[%c0_139, %c0_140] : memref<1x128xf32, #tpu.memory_space<vmem>>, vector<1x128xf32>
    %509 = vector.broadcast %508 : vector<1x128xf32> to vector<16x128xf32>
    %510 = arith.addf %507, %509 : vector<16x128xf32>
    %511 = arith.truncf %510 : vector<16x128xf32> to vector<16x128xbf16>
    %c0_141 = arith.constant 0 : index
    %c0_142 = arith.constant 0 : index
    %512 = vector.load %arg22[%c0_141, %c0_142] : memref<128x8xbf16, #tpu.memory_space<vmem>>, vector<128x8xbf16>
    %cst_143 = arith.constant dense<0.000000e+00> : vector<16x8xf32>
    %513 = tpu.matmul %511, %512, %cst_143 {dimension_numbers = #tpu.dot_dimension_numbers<[1], [0], [0], [1], [0, 0, 1, 1], [], []>} : vector<16x128xbf16>, vector<128x8xbf16>, vector<16x8xf32> -> vector<16x8xf32>
    %c0_144 = arith.constant 0 : index
    %c0_145 = arith.constant 0 : index
    %514 = vector.load %arg23[%c0_144, %c0_145] : memref<1x8xf32, #tpu.memory_space<vmem>>, vector<1x8xf32>
    %515 = vector.broadcast %514 : vector<1x8xf32> to vector<16x8xf32>
    %516 = arith.addf %513, %515 : vector<16x8xf32>
    %c0_146 = arith.constant 0 : index
    %c0_147 = arith.constant 0 : index
    %517 = vector.load %arg26[%c0_146, %c0_147] : memref<16x8xf32, #tpu.memory_space<vmem>>, vector<16x8xf32>
    tpu.vector_store %arg26[%c0_146, %c0_147], %516 {strides = array<i32>} : memref<16x8xf32, #tpu.memory_space<vmem>>, vector<16x8xf32>,
    return
  }
}

</mosaic_0001>

<bundles_post_ra>
// kernel: mul.29
= control target key start
LH: loop header
LB: loop body
LE: loop exit
PB: predicated region body
PF: predicated region fallthrough
CT: control target
= control target key end

     0   :  { %s168_s22 = smov 104   ;;  %vm41_vm0 = vcmask 64512   ;;  %s169_s23 = smov 112   ;;  %vm47_vm1 = vcmask 1048512   ;;  %vm53_vm2 = vcmask 982912   ;;  %vm59_vm3 = vcmask 917312   ;;  %s219_s0 = inlined_call_operand.vmem [shape: f32[8,2,8], index: 0, kind: input, shape index: {}]   ;;  %s220_s1 = inlined_call_operand.vmem [shape: f32[128], index: 1, kind: output, shape index: {}]  }
   0x1   :  { %v145_v0 = vld [vmem:[%s219_s0 + $0xe] sm:$0x3]  ;;  %v146_v1 = vld [vmem:[%s219_s0 + $0xc] sm:$0x3]  ;;  %v147_v2 = vld [vmem:[%s219_s0 + $0xa] sm:$0x3] }
   0x2   :  { %8 = vst [vmem:[#allocation1 + $0x38] sm:$0x3] %v145_v0  ;;  %13 = vst [vmem:[#allocation1 + $0x30] sm:$0x3] %v146_v1  ;;  %v148_v3 = vld [vmem:[%s219_s0 + $0x8] sm:$0x3] }
   0x3   :  { %18 = vst [vmem:[#allocation1 + $0x28] sm:$0x3] %v147_v2  ;;  %23 = vst [vmem:[#allocation1 + $0x20] sm:$0x3] %v148_v3  ;;  %v149_v4 = vld [vmem:[%s219_s0 + $0x6] sm:$0x3] }
   0x4   :  { %v150_v5 = vld [vmem:[%s219_s0 + $0x4] sm:$0x3]  ;;  %28 = vst [vmem:[#allocation1 + $0x18] sm:$0x3] %v149_v4  ;;  %v151_v6 = vld [vmem:[%s219_s0 + $0x2] sm:$0x3] }
   0x5   :  { %33 = vst [vmem:[#allocation1 + $0x10] sm:$0x3] %v150_v5  ;;  %v38_v7 = vld [vmem:[%s219_s0] sm:$0x3]  ;;  %37 = vst [vmem:[#allocation1 + $0x8] sm:$0x3] %v151_v6 }
   0x6   :  { %39 = vst [vmem:[#allocation1] sm:$0x3] %v38_v7  ;;  %s167_s0 = smov 120   ;;  %s170_s24 = smov 96   ;;  %vm65_vm4 = vcmask 851712   ;;  %vm71_vm5 = vcmask 786112  }
   0x7   :  { %s171_s25 = smov 88   ;;  %s172_s26 = smov 80   ;;  %vm77_vm6 = vcmask 720512   ;;  %vm83_vm7 = vcmask 654912   ;;  %vm89_vm8 = vcmask 589312   ;;  %vm95_vm9 = vcmask 523712  }
   0x8   :  { %s173_s27 = smov 72   ;;  %s174_s28 = smov 64   ;;  %vm101_vm10 = vcmask 458112   ;;  %vm107_vm11 = vcmask 392512   ;;  %vm113_vm12 = vcmask 326912   ;;  %vm119_vm13 = vcmask 261312  }
   0x9   :  { %v44_v8 = vld [vmem:[#allocation1 + $0x39] sm:$0x1]   ;;  %v56_v9 = vld [vmem:[#allocation1 + $0x31] sm:$0x1]   ;;  %v50_v10 = vld [vmem:[#allocation1 + $0x38] sm:$0x1]  }
   0xa   :  { %45 = vrot.lane.b32.xlu0 %v44_v8, %s167_s0  ;;  %57 = vrot.lane.b32.xlu1 %v56_v9, %s168_s22  ;;  %v62_v11 = vld [vmem:[#allocation1 + $0x30] sm:$0x1]   ;;  %v68_v13 = vld [vmem:[#allocation1 + $0x29] sm:$0x1]   ;;  %v74_v14 = vld [vmem:[#allocation1 + $0x28] sm:$0x1]  }
   0xb   :  { %v80_v15 = vld [vmem:[#allocation1 + $0x21] sm:$0x1]   ;;  %v86_v16 = vld [vmem:[#allocation1 + $0x20] sm:$0x1]   ;;  %v92_v17 = vld [vmem:[#allocation1 + $0x19] sm:$0x1]  }
   0xc   :  { %v98_v18 = vld [vmem:[#allocation1 + $0x18] sm:$0x1]   ;;  %s175_s29 = smov 56   ;;  %s176_s30 = smov 48   ;;  %v104_v19 = vld [vmem:[#allocation1 + $0x11] sm:$0x1]  }
   0xd   :  { %v40_v12 = vld [vmem:[#allocation1] sm:$0x1]   ;;  %v110_v20 = vld [vmem:[#allocation1 + $0x10] sm:$0x1]   ;;  %s177_s2 = smov 40   ;;  %s178_s3 = smov 32  }
   0xe   :  { %51 = vrot.lane.b32.xlu0 %v50_v10, %s169_s23  ;;  %63 = vrot.lane.b32.xlu1 %v62_v11, %s170_s24  ;;  %42 = vst.msk [vmem:[#allocation0] sm:$0x1] %vm41_vm0, %v40_v12   ;;  %v116_v21 = vld [vmem:[#allocation1 + $0x9] sm:$0x1]   ;;  %v122_v22 = vld [vmem:[#allocation1 + $0x8] sm:$0x1]  }
   0xf   :  { %s179_s4 = smov 24   ;;  %s180_s5 = smov 16   ;;  %v128_v23 = vld [vmem:[#allocation1 + $0x1] sm:$0x1]   ;;  %vm125_vm14 = vcmask 195712   ;;  %vm131_vm15 = vcmask 130112  }
  0x10   :  { %s181_s6 = smov 8  }
  0x12   :  { %69 = vrot.lane.b32.xlu0 %v68_v13, %s171_s25  ;;  %75 = vrot.lane.b32.xlu1 %v74_v14, %s172_s26 }
  0x16   :  { %81 = vrot.lane.b32.xlu0 %v80_v15, %s173_s27  ;;  %87 = vrot.lane.b32.xlu1 %v86_v16, %s174_s28 }
  0x1a   :  { %93 = vrot.lane.b32.xlu0 %v92_v17, %s175_s29  ;;  %99 = vrot.lane.b32.xlu1 %v98_v18, %s176_s30 }
  0x1e   :  { %105 = vrot.lane.b32.xlu0 %v104_v19, %s177_s2  ;;  %111 = vrot.lane.b32.xlu1 %v110_v20, %s178_s3 }
  0x22   :  { %117 = vrot.lane.b32.xlu0 %v116_v21, %s179_s4  ;;  %123 = vrot.lane.b32.xlu1 %v122_v22, %s180_s5 }
  0x26   :  { %129 = vrot.lane.b32.xlu0 %v128_v23, %s181_s6 }
  0x7c   :  { %v46_v24 = vpop.permute.xlu0 %45   ;;  %v58_v25 = vpop.permute.xlu1 %57  }
  0x7d   :  { %48 = vst.msk [vmem:[#allocation0] sm:$0x1] %vm47_vm1, %v46_v24  }
  0x80   :  { %v52_v26 = vpop.permute.xlu0 %51   ;;  %v64_v27 = vpop.permute.xlu1 %63  }
  0x81   :  { %54 = vst.msk [vmem:[#allocation0] sm:$0x1] %vm53_vm2, %v52_v26  }
  0x82   :  { %60 = vst.msk [vmem:[#allocation0] sm:$0x1] %vm59_vm3, %v58_v25  }
  0x83   :  { %66 = vst.msk [vmem:[#allocation0] sm:$0x1] %vm65_vm4, %v64_v27  }
  0x84   :  { %v70_v28 = vpop.permute.xlu0 %69   ;;  %v76_v29 = vpop.permute.xlu1 %75  }
  0x85   :  { %72 = vst.msk [vmem:[#allocation0] sm:$0x1] %vm71_vm5, %v70_v28  }
  0x86   :  { %78 = vst.msk [vmem:[#allocation0] sm:$0x1] %vm77_vm6, %v76_v29  }
  0x88   :  { %v82_v30 = vpop.permute.xlu0 %81   ;;  %v88_v31 = vpop.permute.xlu1 %87  }
  0x89   :  { %84 = vst.msk [vmem:[#allocation0] sm:$0x1] %vm83_vm7, %v82_v30  }
  0x8a   :  { %90 = vst.msk [vmem:[#allocation0] sm:$0x1] %vm89_vm8, %v88_v31  }
  0x8c   :  { %v94_v32 = vpop.permute.xlu0 %93   ;;  %v100_v33 = vpop.permute.xlu1 %99  }
  0x8d   :  { %96 = vst.msk [vmem:[#allocation0] sm:$0x1] %vm95_vm9, %v94_v32  }
  0x8e   :  { %102 = vst.msk [vmem:[#allocation0] sm:$0x1] %vm101_vm10, %v100_v33  }
  0x90   :  { %v106_v34 = vpop.permute.xlu0 %105   ;;  %v112_v35 = vpop.permute.xlu1 %111  }
  0x91   :  { %108 = vst.msk [vmem:[#allocation0] sm:$0x1] %vm107_vm11, %v106_v34  }
  0x92   :  { %114 = vst.msk [vmem:[#allocation0] sm:$0x1] %vm113_vm12, %v112_v35  }
  0x94   :  { %v118_v36 = vpop.permute.xlu0 %117   ;;  %v124_v37 = vpop.permute.xlu1 %123  }
  0x95   :  { %120 = vst.msk [vmem:[#allocation0] sm:$0x1] %vm119_vm13, %v118_v36  }
  0x96   :  { %126 = vst.msk [vmem:[#allocation0] sm:$0x1] %vm125_vm14, %v124_v37  }
  0x98   :  { %v130_v38 = vpop.permute.xlu0 %129  }
  0x99   :  { %132 = vst.msk [vmem:[#allocation0] sm:$0x1] %vm131_vm15, %v130_v38  }
  0xa0   :  { %v136_v39 = vld [vmem:[#allocation0] sm:$0x1] }
  0xa1   :  { %138 = vst [vmem:[%s220_s1] sm:$0x1] %v136_v39 }

// kernel: gcrint_forward.1
= control target key start
LH: loop header
LB: loop body
LE: loop exit
PB: predicated region body
PF: predicated region fallthrough
CT: control target
= control target key end

     0   :  { %s6220_s0 = inlined_call_operand.vmem [shape: bf16[128,16], index: 0, kind: input, shape index: {}]   ;;  %s6221_s1 = inlined_call_operand.vmem [shape: f32[8,4], index: 1, kind: input, shape index: {}]   ;;  %s6222_s2 = inlined_call_operand.vmem [shape: f32[4,8], index: 2, kind: input, shape index: {}]   ;;  %s6223_s3 = inlined_call_operand.vmem [shape: bf16[2,16,128], index: 3, kind: input, shape index: {}]   ;;  %s6224_s4 = inlined_call_operand.vmem [shape: bf16[2,32,128], index: 4, kind: input, shape index: {}]   ;;  %s6225_s5 = inlined_call_operand.vmem [shape: f32[2,1,128], index: 5, kind: input, shape index: {}]   ;;  %s6226_s6 = inlined_call_operand.vmem [shape: bf16[3,256,64], index: 6, kind: input, shape index: {}]   ;;  %s6227_s7 = inlined_call_operand.vmem [shape: f32[1,64], index: 7, kind: input, shape index: {}]   ;;  %s6228_s8 = inlined_call_operand.vmem [shape: bf16[3,128,32], index: 8, kind: input, shape index: {}]   ;;  %s6229_s9 = inlined_call_operand.vmem [shape: f32[1,32], index: 9, kind: input, shape index: {}]   ;;  %s6230_s10 = inlined_call_operand.vmem [shape: f32[1,32], index: 10, kind: input, shape index: {}]   ;;  %s6231_s11 = inlined_call_operand.vmem [shape: f32[1,32], index: 11, kind: input, shape index: {}]   ;;  %s6232_s12 = inlined_call_operand.vmem [shape: bf16[32,64], index: 12, kind: input, shape index: {}]   ;;  %s6233_s13 = inlined_call_operand.vmem [shape: f32[1,64], index: 13, kind: input, shape index: {}]   ;;  %s6234_s14 = inlined_call_operand.vmem [shape: bf16[64,32], index: 14, kind: input, shape index: {}]   ;;  %s6235_s15 = inlined_call_operand.vmem [shape: f32[1,32], index: 15, kind: input, shape index: {}]   ;;  %s6236_s16 = inlined_call_operand.vmem [shape: bf16[32,8], index: 16, kind: input, shape index: {}]   ;;  %s6237_s17 = inlined_call_operand.<no memory space> [shape: f32[1,1], index: 17, kind: input, shape index: {}]   ;;  %s6238_s18 = inlined_call_operand.vmem [shape: f32[8,128], index: 18, kind: input, shape index: {}]   ;;  %s6239_s19 = inlined_call_operand.vmem [shape: bf16[8,128], index: 19, kind: input, shape index: {}]   ;;  %s6240_s20 = inlined_call_operand.vmem [shape: bf16[8,128], index: 20, kind: input, shape index: {}]   ;;  %s6241_s21 = inlined_call_operand.vmem [shape: f32[1,128], index: 21, kind: input, shape index: {}]   ;;  %s6242_s22 = inlined_call_operand.vmem [shape: bf16[128,8], index: 22, kind: input, shape index: {}]   ;;  %s6243_s23 = inlined_call_operand.vmem [shape: f32[1,8], index: 23, kind: input, shape index: {}]   ;;  %s6244_s24 = inlined_call_operand.vmem [shape: f32[16,8], index: 24, kind: input, shape index: {}]   ;;  %s6245_s25 = inlined_call_operand.vmem [shape: f32[16,8], index: 25, kind: input, shape index: {}]   ;;  %s6246_s26 = inlined_call_operand.hbm [shape: f32[16,8], index: 26, kind: output, shape index: {0}]   ;;  %s6247_s27 = inlined_call_operand.vmem [shape: f32[16,8], index: 27, kind: output, shape index: {1}]  }
   0x1   :  { %6256 = sst [smem:[#allocation6_spill]] %s6220_s0  ;;  %v33_v0 = vstv %s6237_s17 }
   0x2   :  { %6257 = sst [smem:[#allocation7_spill]] %s6221_s1  ;;  %34 = vst [vmem:[#allocation2] sm:$0x1] %v33_v0 }
   0x3   :  { %6258 = sst [smem:[#allocation8_spill]] %s6222_s2 }
   0x4   :  { %6259 = sst [smem:[#allocation9_spill]] %s6223_s3 }
   0x5   :  { %6260 = sst [smem:[#allocation10_spill]] %s6224_s4 }
   0x6   :  { %6261 = sst [smem:[#allocation11_spill]] %s6225_s5 }
   0x7   :  { %6262 = sst [smem:[#allocation12_spill]] %s6226_s6 }
   0x8   :  { %6263 = sst [smem:[#allocation13_spill]] %s6227_s7 }
   0x9   :  { %6264 = sst [smem:[#allocation14_spill]] %s6228_s8 }
   0xa   :  { %6265 = sst [smem:[#allocation15_spill]] %s6229_s9 }
   0xb   :  { %6266 = sst [smem:[#allocation16_spill]] %s6230_s10 }
   0xc   :  { %6267 = sst [smem:[#allocation17_spill]] %s6231_s11 }
   0xd   :  { %s6268_s9 = sld [smem:[#allocation8_spill]]  ;;  %vm95_vm0 = vcmask 1043456   ;;  %s6269_s0 = sld [smem:[#allocation7_spill]]  ;;  %v4982_v3 = vmov 0.0   ;;  %vm4983_vm1 = vmmov 0   ;;  %vm91_vm2 = vcmask 31744  }
   0xe   :  { %4315 = vmatprep.subr.mxu0 %v4982_v3  ;;  %4317 = vmatprep.mubr.msk.f32.mxu0 %vm4983_vm1, %v4982_v3  ;;  %s6270_s29 = sld [smem:[#allocation9_spill]]  ;;  %s6271_s11 = sld [smem:[#allocation6_spill]]  ;;  %vm266_vm3 = vcmask 130048   ;;  %v4984_v9 = vmov 0  }
   0xf   :  { %s6272_s8 = sld [smem:[#allocation10_spill]]  ;;  %4629 = vset.pattern.permute.xlu0 %v4984_v9  ;;  %4630 = vset.pattern.permute.xlu1 %v4984_v9 }
  0x13   :  { %v90_v1 = vld [vmem:[%s6268_s9] sm:$0xf] }
  0x14   :  { %v89_v2 = vld [vmem:[%s6269_s0] sm:$0xff]  ;;  %4316 = vmatpush3.msk.msra.mxu0 %vm95_vm0, %v90_v1  ;;  %v4648_v6 = vld [vmem:[%s6271_s11 + $0x8] sm:$0xff]  }
  0x15   :  { %v4646_v4 = vld [vmem:[%s6270_s29] sm:$0xff]   ;;  %4318 = vmatmul.mubr.msk.f32.vlgmr.msra.gmra.mrb[0].mxu0 %vm91_vm2, %v89_v2  ;;  %v5173_v8 = vld [vmem:[%s6272_s8 + $0x8] sm:$0xff]  }
  0x16   :  { %v4647_v5 = vld [vmem:[%s6271_s11] sm:$0xff]   ;;  %4320 = vmatprep.subr.bf16.mxu0 %v4646_v4  ;;  %4588 = vmatprep.subr.bf16.mxu1 %v4646_v4 }
  0x17   :  { %4321 = vmatpush3.bf16.msra.mxu0 %v4646_v4  ;;  %4322 = vmatprep.mubr.msk.bf16.mxu0 %vm266_vm3, %v4647_v5  ;;  %v5167_v7 = vld [vmem:[%s6272_s8] sm:$0xff]  }
  0x18   :  { %4338 = vmatprep.subr.bf16.mxu0 %v4982_v3  ;;  %4589 = vmatpush3.bf16.msra.mxu1 %v4646_v4 }
  0x19   :  { %4386 = vmatprep.subr.bf16.mxu1 %v4982_v3 }
  0x1a   :  { %4323 = vmatmul.mubr.msk.bf16.vlgmr.msra.gmra.mrb[4].mxu0 %vm266_vm3, %v4648_v6 }
  0x1b   :  { %4339 = vmatpush3.bf16.msra.mxu0 %v5167_v7  ;;  %4342 = vmatprep.mubr.msk.bf16.mxu0 %vm4983_vm1, %v4982_v3 }
  0x1c   :  { %4340 = vmatprep.subr.bf16.mxu0 %v4982_v3 }
  0x1f   :  { %4341 = vmatpush3.bf16.msra.mxu0 %v5173_v8 }
  0x20   :  { %4346 = vmatprep.subr.bf16.mxu0 %v4982_v3 }
  0x22   :  { %4343 = vmatmul.mubr.bf16.vlgmr.msra.gmra.mrb[8].mxu0 %v4984_v9 }
  0x23   :  { %4347 = vmatpush3.bf16.msra.mxu0 %v5167_v7  ;;  %4350 = vmatprep.mubr.msk.bf16.mxu0 %vm4983_vm1, %v4982_v3 }
  0x24   :  { %4348 = vmatprep.subr.bf16.mxu0 %v4982_v3 }
  0x27   :  { %4349 = vmatpush3.bf16.msra.mxu0 %v5173_v8 }
  0x28   :  { %4354 = vmatprep.subr.bf16.mxu0 %v4982_v3 }
  0x29   :  { %35 = vsyncpa [#allocation4], 0  ;;  %s6273_s0 = sld [smem:[#allocation11_spill]]  ;;  %s4985_s10 = smov 32   ;;  %vm400_vm4 = vcmask 261120   ;;  %vm170_vm5 = vcmask 64512  }
  0x2a   :  { %s4986_s17 = smov 64   ;;  %vm1273_vm6 = vcmask 392192   ;;  %vm1276_vm7 = vcmask 523264   ;;  %vm1279_vm8 = vcmask 654336   ;;  %vm1282_vm9 = vcmask 785408   ;;  %s6274_s5 = sld [smem:[#allocation12_spill]] }
  0x2b   :  { %vm1285_vm10 = vcmask 916480   ;;  %s6275_s4 = sld [smem:[#allocation13_spill]]  ;;  %s4988_s30 = smov 120   ;;  %vm2055_vm11 = vcmask 195584   ;;  %vm3587_vm12 = vcmask 1040384   ;;  %vm3589_vm13 = vcmask 1041408  }
  0x2c   :  { %s4989_s9 = smov 112   ;;  %s4990_s28 = smov 104   ;;  %vm3591_vm14 = vcmask 1042432   ;;  %vm3594_vm15 = vcmask 1044480   ;;  %vm3598_vm2 = vcmask 1046528  }
  0x2d   :  { %s6276_s3 = sld [smem:[#allocation16_spill]]  ;;  %s6277_s7 = sld [smem:[#allocation17_spill]] }
  0x2f   :  { %v5201_v16 = vld [vmem:[%s6273_s0] ss:$0 sm:$0xff] }
  0xe8   :  { %v5192_v10 = vpop.f32.mrb[0].mxu0 }
  0xe9   :  { %v4319_v11 = vpop.f32.mrb[1].mxu0 }
  0xed   :  { %v5194_v12 = vpop.f32.mrb[4].mxu0 }
  0xee   :  { %v325_v13 = vpop.f32.mrb[5].mxu0  ;;  %v334_v53 = vadd.f32 %v5194_v12, %v5201_v16 }
  0xef   :  { %v5196_v14 = vpop.f32.mrb[6].mxu0  ;;  %v326_v17 = vadd.f32 %v5201_v16, %v325_v13 }
  0xf0   :  { %v328_v15 = vpop.f32.mrb[7].mxu0  ;;  %v337_v55 = vadd.f32 %v5196_v14, %v5201_v16 }
  0xf1   :  { %v329_v19 = vadd.f32 %v5201_v16, %v328_v15 }
  0xf5   :  { %v438_v18 = vpop.f32.mrb[8].mxu0 }
  0xf6   :  { %v445_v20 = vadd.f32 %v438_v18, %v326_v17  ;;  %v4344_v21 = vpop.f32.mrb[9].mxu0 }
  0xf7   :  { %v441_v22 = vpop.f32.mrb[10].mxu0 }
  0xf8   :  { %4748 = vtanh.f32 %v445_v20  ;;  %v446_v23 = vadd.f32 %v441_v22, %v329_v19  ;;  %v4345_v24 = vpop.f32.mrb[11].mxu0  ;;  %v3879_v27 = vmul.f32 -1.442695, %v445_v20 }
  0xf9   :  { %v4652_v24 = vld [vmem:[%s6271_s11 + $0x18] sm:$0xff]  }
  0xfa   :  { %4750 = vtanh.f32 %v446_v23  ;;  %v3880_v28 = vmul.f32 -1.442695, %v446_v23  ;;  %v4651_v23 = vld [vmem:[%s6271_s11 + $0x10] sm:$0xff]  }
  0xfb   :  { %4752 = vpow2.f32 %v3879_v27  ;;  %4326 = vmatprep.mubr.msk.bf16.mxu1 %vm266_vm3, %v4651_v23 }
  0xfc   :  { %4754 = vpow2.f32 %v3880_v28  ;;  %4327 = vmatmul.mubr.msk.bf16.vlgmr.msra.gmra.mrb[0].mxu1 %vm266_vm3, %v4652_v24 }
  0xfd   :  { %4387 = vmatpush3.bf16.msra.mxu1 %v5167_v7 }
  0xfe   :  { %4388 = vmatprep.subr.bf16.mxu1 %v4982_v3 }
 0x101   :  { %4389 = vmatpush3.bf16.msra.mxu1 %v5173_v8 }
 0x102   :  { %v4749_v25 = vpop.eup %4748 }
 0x103   :  { %465 = vrot.lane.b32.xlu0 %v4749_v25, %s4985_s10 }
 0x104   :  { %v4751_v26 = vpop.eup %4750 }
 0x105   :  { %v4753_v29 = vpop.eup %4752 }
 0x106   :  { %v453_v30 = vadd.f32 1.0, %v4753_v29  ;;  %v4755_v31 = vpop.eup %4754 }
 0x107   :  { %467 = vrot.lane.b32.xlu0 %v4751_v26, %s4985_s10  ;;  %v454_v32 = vadd.f32 1.0, %v4755_v31 }
 0x108   :  { %4756 = vrcp.f32 %v453_v30 }
 0x109   :  { %4758 = vrcp.f32 %v454_v32 }
 0x112   :  { %v4757_v33 = vpop.eup %4756 }
 0x113   :  { %v4759_v36 = vpop.eup %4758  ;;  %v461_v39 = vmul.f32 0.0, %v4757_v33 }
 0x114   :  { %v462_v42 = vmul.f32 0.0, %v4759_v36 }
 0x175   :  { %v466_v34 = vpop.permute.xlu0 %465 }
 0x176   :  { %v471_v35 = vmul.f32 %v4757_v33, %v466_v34 }
 0x178   :  { %475 = vrot.lane.b32.xlu1 %v471_v35, %s4985_s10 }
 0x179   :  { %v468_v37 = vpop.permute.xlu0 %467 }
 0x17a   :  { %v472_v38 = vmul.f32 %v4759_v36, %v468_v37 }
 0x17c   :  { %477 = vrot.lane.b32.xlu1 %v472_v38, %s4985_s10 }
 0x1cf   :  { %v5259_v32 = vpop.f32.mrb[0].mxu1 }
 0x1ea   :  { %v476_v40 = vpop.permute.xlu1 %475 }
 0x1eb   :  { %v481_v41 = vadd.f32 %v476_v40, %v461_v39 }
 0x1ed   :  { %4760 = vtanh.f32 %v481_v41 }
 0x1ee   :  { %v478_v43 = vpop.permute.xlu1 %477 }
 0x1ef   :  { %v482_v44 = vadd.f32 %v478_v43, %v462_v42 }
 0x1f1   :  { %4762 = vtanh.f32 %v482_v44 }
 0x1f7   :  { %v4761_v45 = vpop.eup %4760 }
 0x1f8   :  { %487 = vrot.lane.b32.xlu0 %v4761_v45, %s4985_s10 }
 0x1fb   :  { %v4763_v46 = vpop.eup %4762 }
 0x1fc   :  { %489 = vrot.lane.b32.xlu1 %v4763_v46, %s4985_s10 }
 0x26a   :  { %v488_v47 = vpop.permute.xlu0 %487 }
 0x26b   :  { %v5211_v49 = vmul.f32 %v4757_v33, %v488_v47  ;;  %v341_v33 = vpop.f32.mrb[1].mxu1 }
 0x26c   :  { %v5261_v34 = vpop.f32.mrb[2].mxu1  ;;  %v342_v37 = vadd.f32 %v5201_v16, %v341_v33 }
 0x26d   :  { %v344_v35 = vpop.f32.mrb[3].mxu1 }
 0x26e   :  { %v490_v48 = vpop.permute.xlu1 %489  ;;  %v345_v39 = vadd.f32 %v5201_v16, %v344_v35 }
 0x26f   :  { %v5213_v50 = vmul.f32 %v4759_v36, %v490_v48 }
 0x271   :  { %v495_v51 = vpack.c.bf16 %v5213_v50, %v5211_v49 }
 0x273   :  { %497 = vrot.lane.b32.xlu0 %v495_v51, %s4986_s17 }
 0x2e5   :  { %v498_v52 = vpop.permute.xlu0 %497 }
 0x2e6   :  { %4351 = vmatmul.mubr.msk.bf16.vlgmr.msra.gmra.mrb[12].mxu0 %vm400_vm4, %v498_v52 }
 0x2e7   :  { %4355 = vmatpush3.bf16.msra.mxu0 %v5167_v7  ;;  %4358 = vmatprep.mubr.msk.bf16.mxu0 %vm4983_vm1, %v4982_v3 }
 0x2e8   :  { %4356 = vmatprep.subr.bf16.mxu0 %v4982_v3 }
 0x2eb   :  { %4357 = vmatpush3.bf16.msra.mxu0 %v5173_v8 }
 0x2ec   :  { %4362 = vmatprep.subr.bf16.mxu0 %v4982_v3 }
 0x3b9   :  { %v536_v54 = vpop.f32.mrb[12].mxu0 }
 0x3ba   :  { %v543_v56 = vadd.f32 %v536_v54, %v334_v53  ;;  %v4352_v57 = vpop.f32.mrb[13].mxu0 }
 0x3bb   :  { %v539_v58 = vpop.f32.mrb[14].mxu0 }
 0x3bc   :  { %4764 = vtanh.f32 %v543_v56  ;;  %v544_v59 = vadd.f32 %v539_v58, %v337_v55  ;;  %v4353_v60 = vpop.f32.mrb[15].mxu0  ;;  %v3882_v63 = vmul.f32 -1.442695, %v543_v56 }
 0x3be   :  { %4766 = vtanh.f32 %v544_v59  ;;  %v3883_v0 = vmul.f32 -1.442695, %v544_v59 }
 0x3bf   :  { %4768 = vpow2.f32 %v3882_v63 }
 0x3c0   :  { %4770 = vpow2.f32 %v3883_v0 }
 0x3c6   :  { %v4765_v61 = vpop.eup %4764 }
 0x3c7   :  { %563 = vrot.lane.b32.xlu1 %v4765_v61, %s4985_s10 }
 0x3c8   :  { %v4767_v62 = vpop.eup %4766 }
 0x3c9   :  { %565 = vrot.lane.b32.xlu0 %v4767_v62, %s4985_s10  ;;  %v4769_v1 = vpop.eup %4768 }
 0x3ca   :  { %v4771_v2 = vpop.eup %4770  ;;  %v551_v4 = vadd.f32 1.0, %v4769_v1 }
 0x3cb   :  { %v552_v5 = vadd.f32 1.0, %v4771_v2 }
 0x3cc   :  { %4772 = vrcp.f32 %v551_v4 }
 0x3cd   :  { %4774 = vrcp.f32 %v552_v5 }
 0x3d6   :  { %v4773_v6 = vpop.eup %4772 }
 0x3d7   :  { %v4775_v13 = vpop.eup %4774  ;;  %v559_v17 = vmul.f32 %v4773_v6, %v481_v41 }
 0x3d8   :  { %v560_v20 = vmul.f32 %v4775_v13, %v482_v44 }
 0x439   :  { %v564_v11 = vpop.permute.xlu1 %563 }
 0x43a   :  { %v569_v12 = vmul.f32 %v4773_v6, %v564_v11 }
 0x43b   :  { %v566_v14 = vpop.permute.xlu0 %565 }
 0x43c   :  { %573 = vrot.lane.b32.xlu1 %v569_v12, %s4985_s10  ;;  %v570_v15 = vmul.f32 %v4775_v13, %v566_v14 }
 0x43e   :  { %575 = vrot.lane.b32.xlu0 %v570_v15, %s4985_s10 }
 0x4ae   :  { %v574_v18 = vpop.permute.xlu1 %573 }
 0x4af   :  { %v5233_v19 = vadd.f32 %v574_v18, %v559_v17  ;;  %v350_v17 = vadd.f32 %v5259_v32, %v5201_v16 }
 0x4b0   :  { %v576_v21 = vpop.permute.xlu0 %575 }
 0x4b1   :  { %4776 = vtanh.f32 %v5233_v19  ;;  %v5236_v22 = vadd.f32 %v576_v21, %v560_v20 }
 0x4b3   :  { %4778 = vtanh.f32 %v5236_v22 }
 0x4bb   :  { %v4777_v25 = vpop.eup %4776 }
 0x4bc   :  { %585 = vrot.lane.b32.xlu1 %v4777_v25, %s4985_s10 }
 0x4bd   :  { %v4779_v26 = vpop.eup %4778 }
 0x4be   :  { %587 = vrot.lane.b32.xlu0 %v4779_v26, %s4985_s10 }
 0x52e   :  { %v586_v27 = vpop.permute.xlu1 %585 }
 0x52f   :  { %v5252_v29 = vmul.f32 %v4773_v6, %v586_v27 }
 0x530   :  { %v588_v28 = vpop.permute.xlu0 %587 }
 0x531   :  { %v5254_v30 = vmul.f32 %v4775_v13, %v588_v28 }
 0x533   :  { %v593_v31 = vpack.c.bf16 %v5254_v30, %v5252_v29 }
 0x535   :  { %595 = vrot.lane.b32.xlu1 %v593_v31, %s4986_s17 }
 0x5a7   :  { %v596_v36 = vpop.permute.xlu1 %595 }
 0x5a8   :  { %4359 = vmatmul.mubr.msk.bf16.vlgmr.msra.gmra.mrb[16].mxu0 %vm400_vm4, %v596_v36 }
 0x5a9   :  { %4363 = vmatpush3.bf16.msra.mxu0 %v5167_v7  ;;  %4366 = vmatprep.mubr.msk.bf16.mxu0 %vm4983_vm1, %v4982_v3 }
 0x5aa   :  { %4364 = vmatprep.subr.bf16.mxu0 %v4982_v3 }
 0x5ad   :  { %4365 = vmatpush3.bf16.msra.mxu0 %v5173_v8 }
 0x5ae   :  { %4370 = vmatprep.subr.bf16.mxu0 %v4982_v3 }
 0x67b   :  { %v634_v38 = vpop.f32.mrb[16].mxu0 }
 0x67c   :  { %v641_v40 = vadd.f32 %v634_v38, %v342_v37  ;;  %v4360_v41 = vpop.f32.mrb[17].mxu0 }
 0x67d   :  { %v637_v42 = vpop.f32.mrb[18].mxu0 }
 0x67e   :  { %4780 = vtanh.f32 %v641_v40  ;;  %v642_v43 = vadd.f32 %v637_v42, %v345_v39  ;;  %v4361_v44 = vpop.f32.mrb[19].mxu0  ;;  %v3885_v47 = vmul.f32 -1.442695, %v641_v40 }
 0x680   :  { %4782 = vtanh.f32 %v642_v43  ;;  %v3886_v48 = vmul.f32 -1.442695, %v642_v43 }
 0x681   :  { %4784 = vpow2.f32 %v3885_v47  ;;  %v4653_v47 = vld [vmem:[%s6271_s11 + $0x20] sm:$0xff]  }
 0x682   :  { %4786 = vpow2.f32 %v3886_v48  ;;  %v4654_v48 = vld [vmem:[%s6271_s11 + $0x28] sm:$0xff]   ;;  %4330 = vmatprep.mubr.msk.bf16.mxu1 %vm266_vm3, %v4653_v47 }
 0x683   :  { %4331 = vmatmul.mubr.msk.bf16.gmra.mrb[4].mxu1 %vm266_vm3, %v4654_v48 }
 0x688   :  { %v4781_v45 = vpop.eup %4780 }
 0x689   :  { %661 = vrot.lane.b32.xlu0 %v4781_v45, %s4985_s10 }
 0x68a   :  { %v4783_v46 = vpop.eup %4782 }
 0x68b   :  { %663 = vrot.lane.b32.xlu1 %v4783_v46, %s4985_s10  ;;  %v4785_v51 = vpop.eup %4784 }
 0x68c   :  { %v4787_v52 = vpop.eup %4786  ;;  %v649_v53 = vadd.f32 1.0, %v4785_v51 }
 0x68d   :  { %v650_v54 = vadd.f32 1.0, %v4787_v52 }
 0x68e   :  { %4788 = vrcp.f32 %v649_v53 }
 0x68f   :  { %4790 = vrcp.f32 %v650_v54 }
 0x698   :  { %v4789_v55 = vpop.eup %4788 }
 0x699   :  { %v4791_v58 = vpop.eup %4790  ;;  %v657_v61 = vmul.f32 %v4789_v55, %v5233_v19  ;;  %v353_v19 = vadd.f32 %v5261_v34, %v5201_v16 }
 0x69a   :  { %v658_v0 = vmul.f32 %v4791_v58, %v5236_v22 }
 0x6fb   :  { %v662_v56 = vpop.permute.xlu0 %661 }
 0x6fc   :  { %v667_v57 = vmul.f32 %v4789_v55, %v662_v56 }
 0x6fd   :  { %v664_v59 = vpop.permute.xlu1 %663 }
 0x6fe   :  { %671 = vrot.lane.b32.xlu0 %v667_v57, %s4985_s10  ;;  %v668_v60 = vmul.f32 %v4791_v58, %v664_v59 }
 0x700   :  { %673 = vrot.lane.b32.xlu1 %v668_v60, %s4985_s10 }
 0x770   :  { %v672_v62 = vpop.permute.xlu0 %671 }
 0x771   :  { %v677_v63 = vadd.f32 %v672_v62, %v657_v61 }
 0x772   :  { %v674_v1 = vpop.permute.xlu1 %673 }
 0x773   :  { %4792 = vtanh.f32 %v677_v63  ;;  %v678_v2 = vadd.f32 %v674_v1, %v658_v0 }
 0x775   :  { %4794 = vtanh.f32 %v678_v2 }
 0x77d   :  { %v4793_v4 = vpop.eup %4792 }
 0x77e   :  { %683 = vrot.lane.b32.xlu0 %v4793_v4, %s4985_s10 }
 0x77f   :  { %v4795_v5 = vpop.eup %4794 }
 0x780   :  { %685 = vrot.lane.b32.xlu1 %v4795_v5, %s4985_s10 }
 0x7f0   :  { %v684_v6 = vpop.permute.xlu0 %683 }
 0x7f1   :  { %v5280_v12 = vmul.f32 %v4789_v55, %v684_v6 }
 0x7f2   :  { %v686_v11 = vpop.permute.xlu1 %685 }
 0x7f3   :  { %v5282_v13 = vmul.f32 %v4791_v58, %v686_v11  ;;  %v5322_v58 = vpop.f32.mrb[4].mxu1 }
 0x7f4   :  { %v357_v59 = vpop.f32.mrb[5].mxu1 }
 0x7f5   :  { %v691_v14 = vpack.c.bf16 %v5282_v13, %v5280_v12  ;;  %v5324_v60 = vpop.f32.mrb[6].mxu1 }
 0x7f6   :  { %v360_v61 = vpop.f32.mrb[7].mxu1  ;;  %v369_v47 = vadd.f32 %v5324_v60, %v5201_v16 }
 0x7f7   :  { %693 = vrot.lane.b32.xlu0 %v691_v14, %s4986_s17  ;;  %v361_v1 = vadd.f32 %v5201_v16, %v360_v61 }
 0x869   :  { %v694_v15 = vpop.permute.xlu0 %693 }
 0x86a   :  { %4367 = vmatmul.mubr.msk.bf16.vlgmr.msra.gmra.mrb[20].mxu0 %vm400_vm4, %v694_v15 }
 0x86b   :  { %4371 = vmatpush3.bf16.msra.mxu0 %v5167_v7  ;;  %4374 = vmatprep.mubr.msk.bf16.mxu0 %vm4983_vm1, %v4982_v3 }
 0x86c   :  { %4372 = vmatprep.subr.bf16.mxu0 %v4982_v3 }
 0x86f   :  { %4373 = vmatpush3.bf16.msra.mxu0 %v5173_v8 }
 0x870   :  { %4378 = vmatprep.subr.bf16.mxu0 %v4982_v3 }
 0x93d   :  { %v732_v18 = vpop.f32.mrb[20].mxu0 }
 0x93e   :  { %v739_v20 = vadd.f32 %v732_v18, %v350_v17  ;;  %v4368_v21 = vpop.f32.mrb[21].mxu0 }
 0x93f   :  { %v735_v22 = vpop.f32.mrb[22].mxu0 }
 0x940   :  { %4796 = vtanh.f32 %v739_v20  ;;  %v740_v23 = vadd.f32 %v735_v22, %v353_v19  ;;  %v4369_v24 = vpop.f32.mrb[23].mxu0  ;;  %v3888_v27 = vmul.f32 -1.442695, %v739_v20 }
 0x942   :  { %4798 = vtanh.f32 %v740_v23  ;;  %v3889_v28 = vmul.f32 -1.442695, %v740_v23 }
 0x943   :  { %4800 = vpow2.f32 %v3888_v27 }
 0x944   :  { %4802 = vpow2.f32 %v3889_v28 }
 0x94a   :  { %v4797_v25 = vpop.eup %4796 }
 0x94b   :  { %759 = vrot.lane.b32.xlu1 %v4797_v25, %s4985_s10 }
 0x94c   :  { %v4799_v26 = vpop.eup %4798 }
 0x94d   :  { %761 = vrot.lane.b32.xlu0 %v4799_v26, %s4985_s10  ;;  %v4801_v31 = vpop.eup %4800 }
 0x94e   :  { %v4803_v32 = vpop.eup %4802  ;;  %v747_v33 = vadd.f32 1.0, %v4801_v31 }
 0x94f   :  { %v748_v34 = vadd.f32 1.0, %v4803_v32 }
 0x950   :  { %4804 = vrcp.f32 %v747_v33 }
 0x951   :  { %4806 = vrcp.f32 %v748_v34 }
 0x95a   :  { %v4805_v35 = vpop.eup %4804 }
 0x95b   :  { %v4807_v38 = vpop.eup %4806  ;;  %v755_v41 = vmul.f32 %v4805_v35, %v677_v63  ;;  %v358_v63 = vadd.f32 %v5201_v16, %v357_v59 }
 0x95c   :  { %v756_v44 = vmul.f32 %v4807_v38, %v678_v2 }
 0x9bd   :  { %v760_v36 = vpop.permute.xlu1 %759 }
 0x9be   :  { %v765_v37 = vmul.f32 %v4805_v35, %v760_v36 }
 0x9bf   :  { %v762_v39 = vpop.permute.xlu0 %761 }
 0x9c0   :  { %769 = vrot.lane.b32.xlu1 %v765_v37, %s4985_s10  ;;  %v766_v40 = vmul.f32 %v4807_v38, %v762_v39 }
 0x9c2   :  { %771 = vrot.lane.b32.xlu0 %v766_v40, %s4985_s10 }
 0xa32   :  { %v770_v42 = vpop.permute.xlu1 %769 }
 0xa33   :  { %v5302_v43 = vadd.f32 %v770_v42, %v755_v41 }
 0xa34   :  { %v772_v45 = vpop.permute.xlu0 %771 }
 0xa35   :  { %4808 = vtanh.f32 %v5302_v43  ;;  %v776_v46 = vadd.f32 %v772_v45, %v756_v44  ;;  %v4957_v44 = vld [vmem:[%s6272_s8 + $0x8] sm:$0xff]   ;;  %v366_v45 = vadd.f32 %v5322_v58, %v5201_v16 }
 0xa37   :  { %4810 = vtanh.f32 %v776_v46 }
 0xa3f   :  { %v4809_v51 = vpop.eup %4808 }
 0xa40   :  { %781 = vrot.lane.b32.xlu1 %v4809_v51, %s4985_s10 }
 0xa41   :  { %v4811_v52 = vpop.eup %4810 }
 0xa42   :  { %783 = vrot.lane.b32.xlu0 %v4811_v52, %s4985_s10 }
 0xab2   :  { %v782_v53 = vpop.permute.xlu1 %781 }
 0xab3   :  { %v5315_v55 = vmul.f32 %v4805_v35, %v782_v53 }
 0xab4   :  { %v784_v54 = vpop.permute.xlu0 %783 }
 0xab5   :  { %v5317_v56 = vmul.f32 %v4807_v38, %v784_v54 }
 0xab7   :  { %v789_v57 = vpack.c.bf16 %v5317_v56, %v5315_v55 }
 0xab9   :  { %791 = vrot.lane.b32.xlu1 %v789_v57, %s4986_s17 }
 0xb2b   :  { %v792_v62 = vpop.permute.xlu1 %791 }
 0xb2c   :  { %4375 = vmatmul.mubr.msk.bf16.vlgmr.msra.gmra.mrb[24].mxu0 %vm400_vm4, %v792_v62 }
 0xb2d   :  { %4379 = vmatpush3.bf16.msra.mxu0 %v5167_v7  ;;  %4382 = vmatprep.mubr.msk.bf16.mxu0 %vm4983_vm1, %v4982_v3 }
 0xb2e   :  { %4380 = vmatprep.subr.bf16.mxu0 %v4982_v3 }
 0xb31   :  { %4381 = vmatpush3.bf16.msra.mxu0 %v5173_v8 }
 0xb32   :  { %4394 = vmatprep.subr.bf16.mxu0 %v4982_v3 }
 0xbff   :  { %v830_v0 = vpop.f32.mrb[24].mxu0 }
 0xc00   :  { %v837_v2 = vadd.f32 %v830_v0, %v358_v63  ;;  %v4376_v4 = vpop.f32.mrb[25].mxu0 }
 0xc01   :  { %v833_v5 = vpop.f32.mrb[26].mxu0 }
 0xc02   :  { %4812 = vtanh.f32 %v837_v2  ;;  %v838_v6 = vadd.f32 %v833_v5, %v361_v1  ;;  %v4377_v7 = vpop.f32.mrb[27].mxu0  ;;  %v3891_v8 = vmul.f32 -1.442695, %v837_v2 }
 0xc04   :  { %4814 = vtanh.f32 %v838_v6  ;;  %v3892_v15 = vmul.f32 -1.442695, %v838_v6 }
 0xc05   :  { %4816 = vpow2.f32 %v3891_v8 }
 0xc06   :  { %4818 = vpow2.f32 %v3892_v15 }
 0xc0c   :  { %v4813_v11 = vpop.eup %4812 }
 0xc0d   :  { %857 = vrot.lane.b32.xlu0 %v4813_v11, %s4985_s10 }
 0xc0e   :  { %v4815_v14 = vpop.eup %4814 }
 0xc0f   :  { %859 = vrot.lane.b32.xlu1 %v4815_v14, %s4985_s10  ;;  %v4817_v17 = vpop.eup %4816 }
 0xc10   :  { %v4819_v18 = vpop.eup %4818  ;;  %v845_v19 = vadd.f32 1.0, %v4817_v17 }
 0xc11   :  { %v846_v20 = vadd.f32 1.0, %v4819_v18 }
 0xc12   :  { %4820 = vrcp.f32 %v845_v19  ;;  %v4655_v19 = vld [vmem:[%s6271_s11 + $0x30] sm:$0xff]  }
 0xc13   :  { %4822 = vrcp.f32 %v846_v20  ;;  %v4656_v20 = vld [vmem:[%s6271_s11 + $0x38] sm:$0xff]   ;;  %4334 = vmatprep.mubr.msk.bf16.mxu1 %vm266_vm3, %v4655_v19  ;;  %s6254_s11 = smov 96  }
 0xc14   :  { %4335 = vmatmul.mubr.msk.bf16.gmra.mrb[8].mxu1 %vm266_vm3, %v4656_v20 }
 0xc15   :  { %4390 = vmatprep.mubr.msk.bf16.mxu1 %vm4983_vm1, %v4982_v3 }
 0xc1c   :  { %v4821_v21 = vpop.eup %4820 }
 0xc1d   :  { %v4823_v24 = vpop.eup %4822  ;;  %v853_v27 = vmul.f32 %v4821_v21, %v5302_v43  ;;  %v4956_v43 = vld [vmem:[%s6272_s8] sm:$0xff]  }
 0xc1e   :  { %v854_v32 = vmul.f32 %v4823_v24, %v776_v46 }
 0xc7f   :  { %v858_v22 = vpop.permute.xlu0 %857 }
 0xc80   :  { %v863_v23 = vmul.f32 %v4821_v21, %v858_v22 }
 0xc81   :  { %v860_v25 = vpop.permute.xlu1 %859 }
 0xc82   :  { %867 = vrot.lane.b32.xlu0 %v863_v23, %s4985_s10  ;;  %v864_v26 = vmul.f32 %v4823_v24, %v860_v25 }
 0xc84   :  { %869 = vrot.lane.b32.xlu1 %v864_v26, %s4985_s10 }
 0xcf4   :  { %v868_v28 = vpop.permute.xlu0 %867 }
 0xcf5   :  { %v873_v31 = vadd.f32 %v868_v28, %v853_v27  ;;  %v4336_v28 = vpop.f32.mrb[8].mxu1 }
 0xcf6   :  { %v870_v33 = vpop.permute.xlu1 %869  ;;  %v382_v19 = vadd.f32 %v4336_v28, %v5201_v16 }
 0xcf7   :  { %4824 = vtanh.f32 %v873_v31  ;;  %v874_v34 = vadd.f32 %v870_v33, %v854_v32 }
 0xcf9   :  { %4826 = vtanh.f32 %v874_v34 }
 0xd01   :  { %v4825_v35 = vpop.eup %4824 }
 0xd02   :  { %879 = vrot.lane.b32.xlu0 %v4825_v35, %s4985_s10 }
 0xd03   :  { %v4827_v36 = vpop.eup %4826 }
 0xd04   :  { %881 = vrot.lane.b32.xlu1 %v4827_v36, %s4985_s10 }
 0xd74   :  { %v880_v37 = vpop.permute.xlu0 %879 }
 0xd75   :  { %v5342_v39 = vmul.f32 %v4821_v21, %v880_v37 }
 0xd76   :  { %v882_v38 = vpop.permute.xlu1 %881 }
 0xd77   :  { %v5344_v40 = vmul.f32 %v4823_v24, %v882_v38 }
 0xd79   :  { %v887_v41 = vpack.c.bf16 %v5344_v40, %v5342_v39 }
 0xd7b   :  { %889 = vrot.lane.b32.xlu0 %v887_v41, %s4986_s17 }
 0xded   :  { %v890_v42 = vpop.permute.xlu0 %889 }
 0xdee   :  { %4383 = vmatmul.mubr.msk.bf16.vlgmr.msra.gmra.mrb[28].mxu0 %vm400_vm4, %v890_v42 }
 0xdef   :  { %4395 = vmatpush3.bf16.msra.mxu0 %v4956_v43  ;;  %4398 = vmatprep.mubr.msk.bf16.mxu0 %vm4983_vm1, %v4982_v3 }
 0xdf0   :  { %4396 = vmatprep.subr.bf16.mxu0 %v4982_v3 }
 0xdf3   :  { %4397 = vmatpush3.bf16.msra.mxu0 %v4957_v44 }
 0xec1   :  { %v928_v46 = vpop.f32.mrb[28].mxu0 }
 0xec2   :  { %v935_v48 = vadd.f32 %v928_v46, %v366_v45  ;;  %v4384_v51 = vpop.f32.mrb[29].mxu0 }
 0xec3   :  { %v931_v52 = vpop.f32.mrb[30].mxu0 }
 0xec4   :  { %4828 = vtanh.f32 %v935_v48  ;;  %v936_v53 = vadd.f32 %v931_v52, %v369_v47  ;;  %v4385_v54 = vpop.f32.mrb[31].mxu0  ;;  %v3894_v61 = vmul.f32 -1.442695, %v935_v48 }
 0xec6   :  { %4830 = vtanh.f32 %v936_v53  ;;  %v3895_v62 = vmul.f32 -1.442695, %v936_v53 }
 0xec7   :  { %4832 = vpow2.f32 %v3894_v61 }
 0xec8   :  { %4834 = vpow2.f32 %v3895_v62 }
 0xece   :  { %v4829_v57 = vpop.eup %4828 }
 0xecf   :  { %955 = vrot.lane.b32.xlu1 %v4829_v57, %s4985_s10 }
 0xed0   :  { %v4831_v59 = vpop.eup %4830 }
 0xed1   :  { %957 = vrot.lane.b32.xlu0 %v4831_v59, %s4985_s10  ;;  %v4833_v58 = vpop.eup %4832 }
 0xed2   :  { %v4835_v63 = vpop.eup %4834  ;;  %v943_v60 = vadd.f32 1.0, %v4833_v58 }
 0xed3   :  { %v944_v0 = vadd.f32 1.0, %v4835_v63 }
 0xed4   :  { %4836 = vrcp.f32 %v943_v60 }
 0xed5   :  { %4838 = vrcp.f32 %v944_v0 }
 0xede   :  { %v4837_v1 = vpop.eup %4836 }
 0xedf   :  { %v4839_v5 = vpop.eup %4838  ;;  %v951_v11 = vmul.f32 %v4837_v1, %v873_v31  ;;  %v373_v31 = vpop.f32.mrb[9].mxu1 }
 0xee0   :  { %v952_v15 = vmul.f32 %v4839_v5, %v874_v34  ;;  %v4337_v32 = vpop.f32.mrb[10].mxu1  ;;  %v374_v35 = vadd.f32 %v5201_v16, %v373_v31 }
 0xee1   :  { %v376_v33 = vpop.f32.mrb[11].mxu1 }
 0xee2   :  { %v377_v37 = vadd.f32 %v5201_v16, %v376_v33 }
 0xf41   :  { %v956_v2 = vpop.permute.xlu1 %955 }
 0xf42   :  { %v961_v4 = vmul.f32 %v4837_v1, %v956_v2 }
 0xf43   :  { %v958_v6 = vpop.permute.xlu0 %957 }
 0xf44   :  { %965 = vrot.lane.b32.xlu1 %v961_v4, %s4985_s10  ;;  %v962_v7 = vmul.f32 %v4839_v5, %v958_v6 }
 0xf46   :  { %967 = vrot.lane.b32.xlu0 %v962_v7, %s4985_s10 }
 0xfb6   :  { %v966_v14 = vpop.permute.xlu1 %965 }
 0xfb7   :  { %v971_v8 = vadd.f32 %v966_v14, %v951_v11 }
 0xfb8   :  { %v968_v17 = vpop.permute.xlu0 %967 }
 0xfb9   :  { %4840 = vtanh.f32 %v971_v8  ;;  %v972_v18 = vadd.f32 %v968_v17, %v952_v15 }
 0xfbb   :  { %4842 = vtanh.f32 %v972_v18 }
 0xfc3   :  { %v4841_v21 = vpop.eup %4840 }
 0xfc4   :  { %977 = vrot.lane.b32.xlu1 %v4841_v21, %s4985_s10  ;;  %v385_v21 = vadd.f32 %v4337_v32, %v5201_v16 }
 0xfc5   :  { %v4843_v22 = vpop.eup %4842 }
 0xfc6   :  { %979 = vrot.lane.b32.xlu0 %v4843_v22, %s4985_s10 }
0x1036   :  { %v978_v23 = vpop.permute.xlu1 %977 }
0x1037   :  { %v5379_v25 = vmul.f32 %v4837_v1, %v978_v23 }
0x1038   :  { %v980_v24 = vpop.permute.xlu0 %979 }
0x1039   :  { %v5381_v26 = vmul.f32 %v4839_v5, %v980_v24 }
0x103b   :  { %v985_v27 = vpack.c.bf16 %v5381_v26, %v5379_v25 }
0x103d   :  { %987 = vrot.lane.b32.xlu1 %v985_v27, %s4986_s17 }
0x10af   :  { %v988_v34 = vpop.permute.xlu1 %987 }
0x10b0   :  { %4391 = vmatmul.mubr.msk.bf16.vlgmr.msra.gmra.mrb[12].mxu1 %vm400_vm4, %v988_v34 }
0x10b1   :  { %1349 = vmatprep.mubr.bf16.mxu1 %v4984_v9 }
0x1183   :  { %v1026_v36 = vpop.f32.mrb[12].mxu1 }
0x1184   :  { %v1033_v38 = vadd.f32 %v1026_v36, %v374_v35  ;;  %v4392_v41 = vpop.f32.mrb[13].mxu1 }
0x1185   :  { %v1029_v42 = vpop.f32.mrb[14].mxu1 }
0x1186   :  { %4844 = vtanh.f32 %v1033_v38  ;;  %v1034_v43 = vadd.f32 %v1029_v42, %v377_v37  ;;  %v4393_v44 = vpop.f32.mrb[15].mxu1  ;;  %v3897_v47 = vmul.f32 -1.442695, %v1033_v38 }
0x1188   :  { %4846 = vtanh.f32 %v1034_v43  ;;  %v3898_v48 = vmul.f32 -1.442695, %v1034_v43 }
0x1189   :  { %4848 = vpow2.f32 %v3897_v47 }
0x118a   :  { %4850 = vpow2.f32 %v3898_v48 }
0x1190   :  { %v4845_v45 = vpop.eup %4844 }
0x1191   :  { %1053 = vrot.lane.b32.xlu0 %v4845_v45, %s4985_s10 }
0x1192   :  { %v4847_v46 = vpop.eup %4846 }
0x1193   :  { %1055 = vrot.lane.b32.xlu1 %v4847_v46, %s4985_s10  ;;  %v4849_v51 = vpop.eup %4848 }
0x1194   :  { %v4851_v52 = vpop.eup %4850  ;;  %v1041_v53 = vadd.f32 1.0, %v4849_v51 }
0x1195   :  { %v1042_v54 = vadd.f32 1.0, %v4851_v52 }
0x1196   :  { %4852 = vrcp.f32 %v1041_v53 }
0x1197   :  { %4854 = vrcp.f32 %v1042_v54 }
0x11a0   :  { %v4853_v57 = vpop.eup %4852 }
0x11a1   :  { %v4855_v62 = vpop.eup %4854  ;;  %v1049_v60 = vmul.f32 %v4853_v57, %v971_v8 }
0x11a2   :  { %v1050_v2 = vmul.f32 %v4855_v62, %v972_v18 }
0x1203   :  { %v1054_v59 = vpop.permute.xlu0 %1053 }
0x1204   :  { %v1059_v61 = vmul.f32 %v4853_v57, %v1054_v59 }
0x1205   :  { %v1056_v58 = vpop.permute.xlu1 %1055 }
0x1206   :  { %1063 = vrot.lane.b32.xlu0 %v1059_v61, %s4985_s10  ;;  %v1060_v63 = vmul.f32 %v4855_v62, %v1056_v58 }
0x1208   :  { %1065 = vrot.lane.b32.xlu1 %v1060_v63, %s4985_s10 }
0x1278   :  { %v1064_v0 = vpop.permute.xlu0 %1063 }
0x1279   :  { %v1069_v1 = vadd.f32 %v1064_v0, %v1049_v60 }
0x127a   :  { %v1066_v4 = vpop.permute.xlu1 %1065 }
0x127b   :  { %4856 = vtanh.f32 %v1069_v1  ;;  %v1070_v5 = vadd.f32 %v1066_v4, %v1050_v2 }
0x127d   :  { %4858 = vtanh.f32 %v1070_v5 }
0x1285   :  { %v4857_v6 = vpop.eup %4856 }
0x1286   :  { %1075 = vrot.lane.b32.xlu0 %v4857_v6, %s4985_s10 }
0x1287   :  { %v4859_v7 = vpop.eup %4858 }
0x1288   :  { %1077 = vrot.lane.b32.xlu1 %v4859_v7, %s4985_s10 }
0x12f8   :  { %v1076_v11 = vpop.permute.xlu0 %1075 }
0x12f9   :  { %v5396_v15 = vmul.f32 %v4853_v57, %v1076_v11 }
0x12fa   :  { %v1078_v14 = vpop.permute.xlu1 %1077 }
0x12fb   :  { %v5398_v17 = vmul.f32 %v4855_v62, %v1078_v14 }
0x12fd   :  { %v1083_v8 = vpack.c.bf16 %v5398_v17, %v5396_v15 }
0x12ff   :  { %1085 = vrot.lane.b32.xlu0 %v1083_v8, %s4986_s17 }
0x1371   :  { %v1086_v18 = vpop.permute.xlu0 %1085 }
0x1372   :  { %4399 = vmatmul.mubr.msk.bf16.vlgmr.msra.gmra.mrb[32].mxu0 %vm400_vm4, %v1086_v18 }
0x1373   :  { %1398 = vmatprep.mubr.bf16.mxu0 %v4984_v9 }
0x1445   :  { %v1124_v20 = vpop.f32.mrb[32].mxu0 }
0x1446   :  { %v1131_v22 = vadd.f32 %v1124_v20, %v382_v19  ;;  %v4400_v23 = vpop.f32.mrb[33].mxu0 }
0x1447   :  { %v1127_v24 = vpop.f32.mrb[34].mxu0 }
0x1448   :  { %4860 = vtanh.f32 %v1131_v22  ;;  %v1132_v27 = vadd.f32 %v1127_v24, %v385_v21  ;;  %v4401_v31 = vpop.f32.mrb[35].mxu0  ;;  %v3900_v35 = vmul.f32 -1.442695, %v1131_v22 }
0x144a   :  { %4862 = vtanh.f32 %v1132_v27  ;;  %v3901_v36 = vmul.f32 -1.442695, %v1132_v27 }
0x144b   :  { %4864 = vpow2.f32 %v3900_v35 }
0x144c   :  { %4866 = vpow2.f32 %v3901_v36 }
0x1452   :  { %v4861_v33 = vpop.eup %4860 }
0x1453   :  { %1151 = vrot.lane.b32.xlu1 %v4861_v33, %s4985_s10 }
0x1454   :  { %v4863_v34 = vpop.eup %4862 }
0x1455   :  { %1153 = vrot.lane.b32.xlu0 %v4863_v34, %s4985_s10  ;;  %v4865_v28 = vpop.eup %4864 }
0x1456   :  { %v4867_v37 = vpop.eup %4866  ;;  %v1139_v16 = vadd.f32 1.0, %v4865_v28 }
0x1457   :  { %v1140_v32 = vadd.f32 1.0, %v4867_v37 }
0x1458   :  { %4868 = vrcp.f32 %v1139_v16 }
0x1459   :  { %4870 = vrcp.f32 %v1140_v32 }
0x1462   :  { %v4869_v38 = vpop.eup %4868 }
0x1463   :  { %v4871_v43 = vpop.eup %4870  ;;  %v1147_v46 = vmul.f32 %v4869_v38, %v1069_v1 }
0x1464   :  { %v1148_v51 = vmul.f32 %v4871_v43, %v1070_v5 }
0x14c5   :  { %v1152_v41 = vpop.permute.xlu1 %1151 }
0x14c6   :  { %v1157_v42 = vmul.f32 %v4869_v38, %v1152_v41 }
0x14c7   :  { %v1154_v44 = vpop.permute.xlu0 %1153 }
0x14c8   :  { %1161 = vrot.lane.b32.xlu1 %v1157_v42, %s4985_s10  ;;  %v1158_v45 = vmul.f32 %v4871_v43, %v1154_v44 }
0x14ca   :  { %1163 = vrot.lane.b32.xlu0 %v1158_v45, %s4985_s10 }
0x153a   :  { %v1162_v47 = vpop.permute.xlu1 %1161 }
0x153b   :  { %v1167_v48 = vadd.f32 %v1162_v47, %v1147_v46 }
0x153c   :  { %v1164_v52 = vpop.permute.xlu0 %1163 }
0x153d   :  { %4872 = vtanh.f32 %v1167_v48  ;;  %v1168_v53 = vadd.f32 %v1164_v52, %v1148_v51 }
0x153f   :  { %4874 = vtanh.f32 %v1168_v53 }
0x1547   :  { %v4873_v54 = vpop.eup %4872 }
0x1548   :  { %1173 = vrot.lane.b32.xlu1 %v4873_v54, %s4985_s10 }
0x1549   :  { %v4875_v57 = vpop.eup %4874 }
0x154a   :  { %1175 = vrot.lane.b32.xlu0 %v4875_v57, %s4985_s10 }
0x154c   :  { %1183 = vrot.lane.b32.xlu1 %v5211_v49, %s4986_s17 }
0x154e   :  { %1185 = vrot.lane.b32.xlu0 %v5213_v50, %s4986_s17 }
0x1550   :  { %1229 = vrot.lane.b32.xlu1 %v5342_v39, %s4986_s17 }
0x1552   :  { %1231 = vrot.lane.b32.xlu0 %v5344_v40, %s4986_s17 }
0x1554   :  { %1235 = vrot.lane.b32.xlu1 %v5315_v55, %s4986_s17 }
0x1556   :  { %1237 = vrot.lane.b32.xlu0 %v5317_v56, %s4986_s17 }
0x1558   :  { %1199 = vrot.lane.b32.xlu1 %v5252_v29, %s6254_s11 }
0x155a   :  { %1201 = vrot.lane.b32.xlu0 %v5254_v30, %s6254_s11 }
0x155c   :  { %1243 = vrot.lane.b32.xlu1 %v5379_v25, %s6254_s11 }
0x155e   :  { %1245 = vrot.lane.b32.xlu0 %v5381_v26, %s6254_s11 }
0x1560   :  { %1207 = vrot.lane.b32.xlu1 %v5396_v15, %s6254_s11 }
0x1562   :  { %1209 = vrot.lane.b32.xlu0 %v5398_v17, %s6254_s11 }
0x1564   :  { %1251 = vrot.lane.b32.xlu1 %v5280_v12, %s6254_s11 }
0x1566   :  { %1253 = vrot.lane.b32.xlu0 %v5282_v13, %s6254_s11  ;;  %s4991_s11 = smov 8  }
0x1568   :  { %1215 = vrot.lane.b32.xlu1 %v5315_v55, %s4985_s10  ;;  %v169_v55 = vmax.f32 %v5192_v10, 0.0 }
0x156a   :  { %1217 = vrot.lane.b32.xlu0 %v5317_v56, %s4985_s10  ;;  %v171_v56 = vsel %vm170_vm5, %v169_v55, -inf }
0x156c   :  { %1223 = vrot.lane.b32.xlu1 %v5342_v39, %s4985_s10  ;;  %v172_v39 = vrot.slane %v171_v56, 4 }
0x156e   :  { %1225 = vrot.lane.b32.xlu0 %v5344_v40, %s4985_s10  ;;  %v173_v40 = vmax.f32 %v171_v56, %v172_v39 }
0x1570   :  { %v174_v63 = vrot.slane %v173_v40, 2 }
0x1572   :  { %v175_v60 = vmax.f32 %v173_v40, %v174_v63 }
0x1574   :  { %v176_v1 = vrot.slane %v175_v60, 1 }
0x1576   :  { %v177_v4 = vmax.f32 %v175_v60, %v176_v1 }
0x1578   :  { %v178_v7 = vsub.f32 %v169_v55, %v177_v4 }
0x157a   :  { %v179_v11 = vmul.f32 1.442695, %v178_v7 }
0x157c   :  { %4876 = vpow2.f32 %v179_v11 }
0x1586   :  { %v5459_v19 = vpop.eup %4876 }
0x1587   :  { %v181_v21 = vsel %vm170_vm5, %v5459_v19, 0.0 }
0x1588   :  { %v182_v23 = vrot.slane %v181_v21, 4 }
0x158a   :  { %v183_v27 = vadd.f32 %v182_v23, %v181_v21 }
0x158c   :  { %v184_v33 = vrot.slane %v183_v27, 2 }
0x158e   :  { %v185_v36 = vadd.f32 %v184_v33, %v183_v27  ;;  %v4657_v33 = vld [vmem:[%s6274_s5 + $0xc0] sm:$0xff]  }
0x1590   :  { %v186_v37 = vrot.slane %v185_v36, 1 }
0x1592   :  { %v187_v44 = vadd.f32 %v186_v37, %v185_v36 }
0x1594   :  { %4878 = vrcp.f32 %v187_v44 }
0x159e   :  { %v4879_v4 = vpop.eup %4878 }
0x15ba   :  { %v1174_v59 = vpop.permute.xlu1 %1173 }
0x15bb   :  { %v1179_v61 = vmul.f32 %v4869_v38, %v1174_v59 }
0x15bc   :  { %v1176_v62 = vpop.permute.xlu0 %1175 }
0x15bd   :  { %1191 = vrot.lane.b32.xlu1 %v1179_v61, %s4986_s17  ;;  %v1180_v58 = vmul.f32 %v4871_v43, %v1176_v62 }
0x15be   :  { %v1184_v0 = vpop.permute.xlu1 %1183 }
0x15bf   :  { %1193 = vrot.lane.b32.xlu0 %v1180_v58, %s4986_s17 }
0x15c0   :  { %v1186_v2 = vpop.permute.xlu0 %1185 }
0x15c1   :  { %1257 = vrot.lane.b32.xlu1 %v1179_v61, %s4985_s10 }
0x15c2   :  { %v1230_v5 = vpop.permute.xlu1 %1229 }
0x15c3   :  { %1259 = vrot.lane.b32.xlu0 %v1180_v58, %s4985_s10 }
0x15c4   :  { %v1232_v6 = vpop.permute.xlu0 %1231 }
0x15c5   :  { %1263 = vrot.lane.b32.xlu1 %v5211_v49, %s4985_s10 }
0x15c6   :  { %v1236_v49 = vpop.permute.xlu1 %1235 }
0x15c7   :  { %1265 = vrot.lane.b32.xlu0 %v5213_v50, %s4985_s10  ;;  %v1288_v16 = vsel %vm266_vm3, %v1230_v5, %v1236_v49 }
0x15c8   :  { %v1238_v14 = vpop.permute.xlu0 %1237 }
0x15c9   :  { %v1289_v45 = vsel %vm266_vm3, %v1232_v6, %v1238_v14 }
0x15ca   :  { %v1200_v50 = vpop.permute.xlu1 %1199 }
0x15cc   :  { %v1202_v10 = vpop.permute.xlu0 %1201 }
0x15ce   :  { %v1244_v8 = vpop.permute.xlu1 %1243 }
0x15cf   :  { %v1290_v38 = vsel %vm400_vm4, %v1288_v16, %v1244_v8 }
0x15d0   :  { %v1246_v18 = vpop.permute.xlu0 %1245 }
0x15d1   :  { %v1291_v47 = vsel %vm400_vm4, %v1289_v45, %v1246_v18  ;;  %v4659_v45 = vld [vmem:[%s6274_s5 + $0x40] sm:$0xff]  }
0x15d2   :  { %v1208_v20 = vpop.permute.xlu1 %1207 }
0x15d4   :  { %v1210_v22 = vpop.permute.xlu0 %1209 }
0x15d6   :  { %v1252_v24 = vpop.permute.xlu1 %1251 }
0x15d7   :  { %v1292_v42 = vsel %vm1273_vm6, %v1290_v38, %v1252_v24 }
0x15d8   :  { %v1254_v31 = vpop.permute.xlu0 %1253  ;;  %v1294_v52 = vsel %vm1276_vm7, %v1292_v42, %v5396_v15  ;;  %v4658_v42 = vld [vmem:[%s6274_s5 + $0x80] sm:$0xff]  }
0x15d9   :  { %v1293_v53 = vsel %vm1273_vm6, %v1291_v47, %v1254_v31  ;;  %v4660_v47 = vld [vmem:[%s6274_s5] sm:$0xff]  }
0x15da   :  { %v1216_v34 = vpop.permute.xlu1 %1215  ;;  %v1295_v15 = vsel %vm1276_vm7, %v1293_v53, %v5398_v17  ;;  %v4664_v53 = vld [vmem:[%s6274_s5 + $0x8] sm:$0xff]  }
0x15dc   :  { %v1218_v35 = vpop.permute.xlu0 %1217 }
0x15de   :  { %v1224_v28 = vpop.permute.xlu1 %1223 }
0x15e0   :  { %v1226_v32 = vpop.permute.xlu0 %1225 }
0x162f   :  { %v1192_v41 = vpop.permute.xlu1 %1191 }
0x1630   :  { %v1269_v43 = vsel %vm266_vm3, %v1184_v0, %v1192_v41 }
0x1631   :  { %v1271_v46 = vsel %vm400_vm4, %v1269_v43, %v1200_v50  ;;  %v1194_v51 = vpop.permute.xlu0 %1193 }
0x1632   :  { %v1274_v48 = vsel %vm1273_vm6, %v1271_v46, %v1208_v20  ;;  %v1270_v57 = vsel %vm266_vm3, %v1186_v2, %v1194_v51  ;;  %v4661_v46 = vld [vmem:[%s6274_s5 + $0xc8] sm:$0xff]  }
0x1633   :  { %v1277_v54 = vsel %vm1276_vm7, %v1274_v48, %v5280_v12  ;;  %v1258_v59 = vpop.permute.xlu1 %1257  ;;  %v1272_v62 = vsel %vm400_vm4, %v1270_v57, %v1202_v10  ;;  %v1296_v12 = vsel %vm1279_vm8, %v1294_v52, %v5252_v29  ;;  %v4662_v48 = vld [vmem:[%s6274_s5 + $0x88] sm:$0xff]   ;;  %v4665_v52 = vld [vmem:[%s6274_s5 + $0xd0] sm:$0xff]  }
0x1634   :  { %v1280_v61 = vsel %vm1279_vm8, %v1277_v54, %v5379_v25  ;;  %v1275_v58 = vsel %vm1273_vm6, %v1272_v62, %v1210_v22  ;;  %v1298_v63 = vsel %vm1282_vm9, %v1296_v12, %v1258_v59  ;;  %v4663_v51 = vld [vmem:[%s6274_s5 + $0x48] sm:$0xff]   ;;  %v4666_v54 = vld [vmem:[%s6274_s5 + $0x90] sm:$0xff]   ;;  %v4669_v59 = vld [vmem:[%s6274_s5 + $0xd8] sm:$0xff]  }
0x1635   :  { %v1283_v55 = vsel %vm1282_vm9, %v1280_v61, %v1216_v34  ;;  %v1278_v56 = vsel %vm1276_vm7, %v1275_v58, %v5282_v13  ;;  %v1260_v39 = vpop.permute.xlu0 %1259  ;;  %v1297_v13 = vsel %vm1279_vm8, %v1295_v15, %v5254_v30  ;;  %v189_v30 = vmul.f32 %v4879_v4, %v5459_v19  ;;  %v4667_v57 = vld [vmem:[%s6274_s5 + $0x50] sm:$0xff]   ;;  %v4670_v62 = vld [vmem:[%s6274_s5 + $0x98] sm:$0xff]   ;;  %v4675_v12 = vld [vmem:[%s6274_s5 + $0x60] sm:$0xff]  }
0x1636   :  { %v1286_v40 = vsel %vm1285_vm10, %v1283_v55, %v1224_v28  ;;  %v1281_v25 = vsel %vm1279_vm8, %v1278_v56, %v5381_v26  ;;  %v1299_v1 = vsel %vm1282_vm9, %v1297_v13, %v1260_v39  ;;  %v4668_v61 = vld [vmem:[%s6274_s5 + $0x10] sm:$0xff]   ;;  %v4671_v58 = vld [vmem:[%s6274_s5 + $0x58] sm:$0xff]   ;;  %v4673_v55 = vld [vmem:[%s6274_s5 + $0xe0] sm:$0xff]  }
0x1637   :  { %v1264_v60 = vpop.permute.xlu1 %1263  ;;  %4880 = vtanh.f32 %v1286_v40  ;;  %v1284_v17 = vsel %vm1282_vm9, %v1281_v25, %v1218_v35  ;;  %v5512_v21 = vpack.c.bf16 %v189_v30, %v189_v30  ;;  %v4672_v15 = vld [vmem:[%s6274_s5 + $0x18] sm:$0xff]   ;;  %v4674_v56 = vld [vmem:[%s6274_s5 + $0xa0] sm:$0xff]   ;;  %v4677_v39 = vld [vmem:[%s6274_s5 + $0xe8] sm:$0xff]  }
0x1638   :  { %v1300_v0 = vsel %vm1285_vm10, %v1298_v63, %v1264_v60  ;;  %v1287_v29 = vsel %vm1285_vm10, %v1284_v17, %v1226_v32  ;;  %v4676_v40 = vld [vmem:[%s6274_s5 + $0x20] sm:$0xff]   ;;  %v4678_v25 = vld [vmem:[%s6274_s5 + $0xa8] sm:$0xff]   ;;  %v4681_v60 = vld [vmem:[%s6274_s5 + $0xf0] sm:$0xff]  }
0x1639   :  { %4882 = vtanh.f32 %v1300_v0  ;;  %v1266_v2 = vpop.permute.xlu0 %1265  ;;  %v4679_v63 = vld [vmem:[%s6274_s5 + $0x68] sm:$0xff]   ;;  %v4682_v17 = vld [vmem:[%s6274_s5 + $0xb0] sm:$0xff]   ;;  %v4689_v4 = vld [vmem:[%s6274_s5 + $0x140] sm:$0xff]  }
0x163a   :  { %4884 = vtanh.f32 %v1287_v29  ;;  %v1301_v26 = vsel %vm1285_vm10, %v1299_v1, %v1266_v2  ;;  %v4680_v0 = vld [vmem:[%s6274_s5 + $0x28] sm:$0xff]   ;;  %v4683_v13 = vld [vmem:[%s6274_s5 + $0x70] sm:$0xff]   ;;  %v4685_v29 = vld [vmem:[%s6274_s5 + $0xf8] sm:$0xff]  }
0x163b   :  { %4886 = vtanh.f32 %v1301_v26  ;;  %v4684_v1 = vld [vmem:[%s6274_s5 + $0x30] sm:$0xff]   ;;  %v4686_v2 = vld [vmem:[%s6274_s5 + $0xb8] sm:$0xff]   ;;  %v4691_v30 = vld [vmem:[%s6274_s5 + $0x148] sm:$0xff]  }
0x163c   :  { %v4687_v26 = vld [vmem:[%s6274_s5 + $0x78] sm:$0xff]  }
0x1641   :  { %v5499_v5 = vpop.eup %4880 }
0x1642   :  { %v1306_v6 = vpack.c.bf16 %v5499_v5, %v5499_v5 }
0x1643   :  { %v4883_v7 = vpop.eup %4882 }
0x1644   :  { %v5503_v49 = vpop.eup %4884  ;;  %v1307_v11 = vpack.c.bf16 %v4883_v7, %v4883_v7  ;;  %v1312_v8 = vsel %vm95_vm0, %v1306_v6, 0  ;;  %v4688_v6 = vld [vmem:[%s6274_s5 + $0x38] sm:$0xff]  }
0x1645   :  { %v1358_v14 = vpack.c.bf16 %v5503_v49, %v5503_v49  ;;  %v1505_v50 = vpack.c.bf16 %v5503_v49, %v5499_v5  ;;  %v4887_v10 = vpop.eup %4886  ;;  %v4697_v5 = vld [vmem:[%s6274_s5 + $0x160] sm:$0xff]  }
0x1646   :  { %3902 = vmatprep.subr.msk.bf16.mxu1 %vm95_vm0, %v1307_v11  ;;  %v1359_v18 = vpack.c.bf16 %v4887_v10, %v4887_v10  ;;  %v1506_v20 = vpack.c.bf16 %v4887_v10, %v4883_v7  ;;  %v4690_v7 = vld [vmem:[%s6274_s5 + $0x100] sm:$0xff]   ;;  %v4692_v11 = vld [vmem:[%s6274_s5 + $0x108] sm:$0xff]   ;;  %v4694_v10 = vld [vmem:[%s6274_s5 + $0x110] sm:$0xff]  }
0x1647   :  { %1318 = vmatpush1.bf16.msra.mxu1 %v1312_v8  ;;  %v1361_v19 = vsel %vm95_vm0, %v1358_v14, 0  ;;  %v4693_v14 = vld [vmem:[%s6274_s5 + $0x150] sm:$0xff]   ;;  %v4695_v8 = vld [vmem:[%s6274_s5 + $0x158] sm:$0xff]   ;;  %v4698_v49 = vld [vmem:[%s6274_s5 + $0x120] sm:$0xff]  }
0x1648   :  { %3904 = vmatprep.subr.msk.bf16.mxu0 %vm95_vm0, %v1359_v18  ;;  %v4696_v18 = vld [vmem:[%s6274_s5 + $0x118] sm:$0xff]  }
0x1649   :  { %1367 = vmatpush1.bf16.msra.mxu0 %v1361_v19  ;;  %v4701_v19 = vld [vmem:[%s6274_s5 + $0x170] sm:$0xff]  }
0x164a   :  { %3903 = vmatmul.mubr.msk.bf16.vlgmr.msra.gmra.mrb[16].mxu1 %vm170_vm5, %v5512_v21 }
0x164b   :  { %1447 = vmatprep.mubr.bf16.mxu1 %v4984_v9 }
0x164c   :  { %3905 = vmatmul.mubr.msk.bf16.vlgmr.msra.gmra.mrb[36].mxu0 %vm170_vm5, %v5512_v21 }
0x164d   :  { %1496 = vmatprep.mubr.bf16.mxu0 %v4984_v9 }
0x171d   :  { %v5522_v22 = vpop.f32.mrb[16].mxu1 }
0x171e   :  { %v1407_v23 = vpack.c.bf16 %v5522_v22, %v5522_v22  ;;  %v1353_v24 = vpop.f32.mrb[17].mxu1 }
0x171f   :  { %v1408_v27 = vpack.c.bf16 %v1353_v24, %v1353_v24  ;;  %v1355_v31 = vpop.f32.mrb[18].mxu1  ;;  %v5529_v34 = vpop.f32.mrb[36].mxu0 }
0x1720   :  { %v1356_v35 = vpop.f32.mrb[19].mxu1  ;;  %v1410_v36 = vsel %vm95_vm0, %v1407_v23, 0  ;;  %v1456_v28 = vpack.c.bf16 %v5529_v34, %v5529_v34  ;;  %v1539_v37 = vpack.c.bf16 %v5529_v34, %v5522_v22  ;;  %v1402_v16 = vpop.f32.mrb[37].mxu0  ;;  %v4702_v22 = vld [vmem:[%s6274_s5 + $0x130] sm:$0xff]   ;;  %v4703_v23 = vld [vmem:[%s6274_s5 + $0x178] sm:$0xff]  }
0x1721   :  { %3906 = vmatprep.subr.msk.bf16.mxu1 %vm95_vm0, %v1408_v27  ;;  %v1457_v32 = vpack.c.bf16 %v1402_v16, %v1402_v16  ;;  %v1540_v38 = vpack.c.bf16 %v1402_v16, %v1353_v24  ;;  %v1404_v41 = vpop.f32.mrb[38].mxu0  ;;  %v4704_v24 = vld [vmem:[%s6274_s5 + $0x138] sm:$0xff]  }
0x1722   :  { %1416 = vmatpush1.bf16.msra.mxu1 %v1410_v36  ;;  %v1405_v43 = vpop.f32.mrb[39].mxu0  ;;  %v1459_v44 = vsel %vm95_vm0, %v1456_v28, 0 }
0x1723   :  { %4173 = vmatprep.subr.bf16.mxu1 %v4657_v33  ;;  %3908 = vmatprep.subr.msk.bf16.mxu0 %vm95_vm0, %v1457_v32 }
0x1724   :  { %1465 = vmatpush1.bf16.msra.mxu0 %v1459_v44 }
0x1725   :  { %3907 = vmatmul.mubr.msk.bf16.vlgmr.msra.gmra.mrb[20].mxu1 %vm170_vm5, %v5512_v21  ;;  %4195 = vmatprep.subr.bf16.mxu0 %v4659_v45 }
0x1726   :  { %4174 = vmatpush3.bf16.msra.mxu1 %v4658_v42  ;;  %1702 = vmatprep.mubr.bf16.mxu1 %v1540_v38 }
0x1727   :  { %4175 = vmatprep.subr.bf16.mxu1 %v4661_v46  ;;  %3909 = vmatmul.mubr.msk.bf16.vlgmr.msra.gmra.mrb[40].mxu0 %vm170_vm5, %v5512_v21 }
0x1728   :  { %4196 = vmatpush3.bf16.msra.mxu0 %v4660_v47  ;;  %1839 = vmatprep.mubr.bf16.mxu0 %v1506_v20  ;;  %v4700_v20 = vld [vmem:[%s6274_s5 + $0x128] sm:$0xff]  }
0x1729   :  { %4197 = vmatprep.subr.bf16.mxu0 %v4663_v51 }
0x172a   :  { %4176 = vmatpush3.bf16.msra.mxu1 %v4662_v48 }
0x172b   :  { %4177 = vmatprep.subr.bf16.mxu1 %v4665_v52 }
0x172c   :  { %4198 = vmatpush3.bf16.msra.mxu0 %v4664_v53 }
0x172d   :  { %4199 = vmatprep.subr.bf16.mxu0 %v4667_v57 }
0x172e   :  { %4178 = vmatpush3.bf16.msra.mxu1 %v4666_v54 }
0x172f   :  { %4179 = vmatprep.subr.bf16.mxu1 %v4669_v59 }
0x1730   :  { %4200 = vmatpush3.bf16.msra.mxu0 %v4668_v61 }
0x1731   :  { %4201 = vmatprep.subr.bf16.mxu0 %v4671_v58 }
0x1732   :  { %4180 = vmatpush3.bf16.msra.mxu1 %v4670_v62 }
0x1733   :  { %4181 = vmatprep.subr.bf16.mxu1 %v4673_v55  ;;  %v4022_v55 = vld [vmem:[%s6275_s4] ss:$0 sm:$0xff] }
0x1734   :  { %4202 = vmatpush3.bf16.msra.mxu0 %v4672_v15 }
0x1735   :  { %4203 = vmatprep.subr.bf16.mxu0 %v4675_v12 }
0x1736   :  { %4182 = vmatpush3.bf16.msra.mxu1 %v4674_v56 }
0x1737   :  { %4183 = vmatprep.subr.bf16.mxu1 %v4677_v39 }
0x1738   :  { %4204 = vmatpush3.bf16.msra.mxu0 %v4676_v40 }
0x1739   :  { %4205 = vmatprep.subr.bf16.mxu0 %v4679_v63 }
0x173a   :  { %4184 = vmatpush3.bf16.msra.mxu1 %v4678_v25 }
0x173b   :  { %4185 = vmatprep.subr.bf16.mxu1 %v4681_v60 }
0x173c   :  { %4206 = vmatpush3.bf16.msra.mxu0 %v4680_v0 }
0x173d   :  { %4207 = vmatprep.subr.bf16.mxu0 %v4683_v13  ;;  %v4705_v13 = vld [vmem:[%s6270_s29 + $0x8] sm:$0xff]  }
0x173e   :  { %4186 = vmatpush3.bf16.msra.mxu1 %v4682_v17 }
0x173f   :  { %4187 = vmatprep.subr.bf16.mxu1 %v4685_v29 }
0x1740   :  { %4208 = vmatpush3.bf16.msra.mxu0 %v4684_v1  ;;  %v4023_v1 = vld [vmem:[%s6276_s3] ss:$0 sm:$0xff] }
0x1741   :  { %4209 = vmatprep.subr.bf16.mxu0 %v4687_v26 }
0x1742   :  { %4188 = vmatpush3.bf16.msra.mxu1 %v4686_v2 }
0x1743   :  { %4217 = vmatprep.subr.bf16.mxu1 %v4689_v4 }
0x1744   :  { %4210 = vmatpush3.bf16.msra.mxu0 %v4688_v6 }
0x1745   :  { %1703 = vmatmul.mubr.bf16.vlgmr.msra.gmra.mrb[24].mxu1 %v1539_v37  ;;  %4402 = vmatprep.subr.bf16.mxu0 %v4705_v13 }
0x1746   :  { %4218 = vmatpush3.bf16.msra.mxu1 %v4690_v7 }
0x1747   :  { %4219 = vmatprep.subr.bf16.mxu1 %v4691_v30  ;;  %1840 = vmatmul.mubr.bf16.vlgmr.msra.gmra.mrb[44].mxu0 %v1505_v50  ;;  %v4699_v50 = vld [vmem:[%s6274_s5 + $0x168] sm:$0xff]  }
0x1748   :  { %4403 = vmatpush3.bf16.msra.mxu0 %v4705_v13 }
0x1749   :  { %4412 = vmatprep.subr.bf16.mxu0 %v4982_v3 }
0x174a   :  { %4220 = vmatpush3.bf16.msra.mxu1 %v4692_v11 }
0x174b   :  { %4221 = vmatprep.subr.bf16.mxu1 %v4693_v14  ;;  %v4024_v14 = vld [vmem:[%s6277_s7] ss:$0 sm:$0xff] }
0x174e   :  { %4222 = vmatpush3.bf16.msra.mxu1 %v4694_v10 }
0x174f   :  { %4223 = vmatprep.subr.bf16.mxu1 %v4695_v8 }
0x1752   :  { %4224 = vmatpush3.bf16.msra.mxu1 %v4696_v18  ;;  %v5731_v18 = vld [vmem:[%s6272_s8 + $0x10] sm:$0xff]  }
0x1753   :  { %4225 = vmatprep.subr.bf16.mxu1 %v4697_v5 }
0x1756   :  { %4226 = vmatpush3.bf16.msra.mxu1 %v4698_v49 }
0x1757   :  { %4227 = vmatprep.subr.bf16.mxu1 %v4699_v50 }
0x175a   :  { %4228 = vmatpush3.bf16.msra.mxu1 %v4700_v20  ;;  %v5740_v20 = vld [vmem:[%s6272_s8 + $0x18] sm:$0xff]   ;;  %s6280_s8 = sld [smem:[#allocation15_spill]] }
0x175b   :  { %4229 = vmatprep.subr.bf16.mxu1 %v4701_v19 }
0x175e   :  { %4230 = vmatpush3.bf16.msra.mxu1 %v4702_v22 }
0x175f   :  { %4231 = vmatprep.subr.bf16.mxu1 %v4703_v23 }
0x1762   :  { %4232 = vmatpush3.bf16.msra.mxu1 %v4704_v24 }
0x1763   :  { %4428 = vmatprep.subr.bf16.mxu1 %v4982_v3 }
0x17f8   :  { %v1449_v27 = vpop.f32.mrb[20].mxu1 }
0x17f9   :  { %v1451_v31 = vpop.f32.mrb[21].mxu1 }
0x17fa   :  { %v1453_v33 = vpop.f32.mrb[22].mxu1  ;;  %v1498_v34 = vpop.f32.mrb[40].mxu0 }
0x17fb   :  { %v1454_v35 = vpop.f32.mrb[23].mxu1  ;;  %v1848_v36 = vpack.c.bf16 %v1498_v34, %v1449_v27  ;;  %v1500_v28 = vpop.f32.mrb[41].mxu0 }
0x17fc   :  { %v1849_v37 = vpack.c.bf16 %v1500_v28, %v1451_v31  ;;  %v1502_v16 = vpop.f32.mrb[42].mxu0 }
0x17fd   :  { %v1503_v32 = vpop.f32.mrb[43].mxu0 }
0x17fe   :  { %2011 = vmatprep.mubr.bf16.mxu1 %v1849_v37 }
0x17ff   :  { %2012 = vmatmul.mubr.bf16.vlgmr.msra.gmra.mrb[28].mxu1 %v1848_v36 }
0x1800   :  { %4432 = vmatprep.mubr.msk.bf16.mxu1 %vm4983_vm1, %v4982_v3  ;;  %4429 = vmatpush3.bf16.msra.mxu1 %v5731_v18 }
0x1801   :  { %4430 = vmatprep.subr.bf16.mxu1 %v4982_v3 }
0x1804   :  { %4431 = vmatpush3.bf16.msra.mxu1 %v5740_v20 }
0x1805   :  { %4444 = vmatprep.subr.bf16.mxu1 %v4982_v3 }
0x1818   :  { %v4189_v38 = vpop.f32.mrb[24].mxu1 }
0x1819   :  { %v4190_v41 = vpop.f32.mrb[25].mxu1 }
0x181a   :  { %v4191_v42 = vadd.f32 %v4190_v41, %v4189_v38  ;;  %v4192_v43 = vpop.f32.mrb[26].mxu1  ;;  %v4211_v44 = vpop.f32.mrb[44].mxu0 }
0x181b   :  { %v4193_v45 = vpop.f32.mrb[27].mxu1  ;;  %v4212_v47 = vpop.f32.mrb[45].mxu0 }
0x181c   :  { %v4194_v46 = vadd.f32 %v4193_v45, %v4192_v43  ;;  %v4213_v48 = vadd.f32 %v4212_v47, %v4211_v44  ;;  %v4214_v51 = vpop.f32.mrb[46].mxu0 }
0x181d   :  { %v4215_v52 = vpop.f32.mrb[47].mxu0 }
0x181e   :  { %v1842_v53 = vadd.f32 %v4213_v48, %v4191_v42  ;;  %v4216_v54 = vadd.f32 %v4215_v52, %v4214_v51  ;;  %v4032_v48 = vld [vmem:[%s6273_s0 + $0x1] ss:$0 sm:$0xff]  ;;  %s6278_s0 = smov 96  }
0x1820   :  { %v1845_v57 = vadd.f32 %v4216_v54, %v4194_v46 }
0x18d2   :  { %v4233_v59 = vpop.f32.mrb[28].mxu1 }
0x18d3   :  { %v4234_v61 = vpop.f32.mrb[29].mxu1 }
0x18d4   :  { %v4235_v62 = vadd.f32 %v4234_v61, %v4233_v59  ;;  %v4236_v58 = vpop.f32.mrb[30].mxu1 }
0x18d5   :  { %v4237_v15 = vpop.f32.mrb[31].mxu1 }
0x18d6   :  { %v2020_v56 = vadd.f32 %v4235_v62, %v1842_v53  ;;  %v4238_v12 = vadd.f32 %v4237_v15, %v4236_v58 }
0x18d8   :  { %v5696_v39 = vadd.f32 %v4022_v55, %v2020_v56  ;;  %v2021_v40 = vadd.f32 %v4238_v12, %v1845_v57 }
0x18da   :  { %v5698_v25 = vadd.f32 %v4022_v55, %v2021_v40  ;;  %2033 = vrot.lane.b32.xlu1 %v5696_v39, %s4988_s30 }
0x18dc   :  { %2035 = vrot.lane.b32.xlu0 %v5698_v25, %s4988_s30 }
0x18de   :  { %2039 = vrot.lane.b32.xlu1 %v5696_v39, %s4989_s9 }
0x18e0   :  { %2041 = vrot.lane.b32.xlu0 %v5698_v25, %s4989_s9 }
0x18e2   :  { %2045 = vrot.lane.b32.xlu1 %v5696_v39, %s4990_s28 }
0x18e4   :  { %2047 = vrot.lane.b32.xlu0 %v5698_v25, %s4990_s28 }
0x194c   :  { %v2034_v63 = vpop.permute.xlu1 %2033 }
0x194d   :  { %v2051_v29 = vsel %vm170_vm5, %v5696_v39, %v2034_v63 }
0x194e   :  { %v2036_v60 = vpop.permute.xlu0 %2035 }
0x194f   :  { %v2052_v4 = vsel %vm170_vm5, %v5698_v25, %v2036_v60 }
0x1950   :  { %v2040_v0 = vpop.permute.xlu1 %2039 }
0x1951   :  { %v2053_v2 = vsel %vm266_vm3, %v2051_v29, %v2040_v0 }
0x1952   :  { %v2042_v17 = vpop.permute.xlu0 %2041 }
0x1953   :  { %v2054_v7 = vsel %vm266_vm3, %v2052_v4, %v2042_v17 }
0x1954   :  { %v2046_v26 = vpop.permute.xlu1 %2045 }
0x1955   :  { %v2056_v6 = vsel %vm2055_vm11, %v2053_v2, %v2046_v26 }
0x1956   :  { %v2065_v30 = vmul.f32 %v4023_v1, %v2056_v6  ;;  %v2048_v11 = vpop.permute.xlu0 %2047 }
0x1957   :  { %v2057_v10 = vsel %vm2055_vm11, %v2054_v7, %v2048_v11 }
0x1958   :  { %v2066_v8 = vmul.f32 %v4023_v1, %v2057_v10  ;;  %v2074_v5 = vadd.f32 %v4024_v14, %v2065_v30 }
0x195a   :  { %v2075_v49 = vadd.f32 %v4024_v14, %v2066_v8 }
0x195c   :  { %v4614_v50 = vpack.i.bf16 %v2075_v49, %v2074_v5 }
0x195e   :  { %4615 = vrot.lane.b32.xlu0 %v4614_v50, %s4988_s30  ;;  %4610 = vrot.lane.b32.xlu1 %v4614_v50, %s4989_s9  ;;  %s6279_s9 = sld [smem:[#allocation14_spill]] }
0x1962   :  { %4625 = vrot.lane.b32.xlu0 %v4614_v50, %s4991_s11  ;;  %4620 = vrot.lane.b32.xlu1 %v4614_v50, %s4990_s28  ;;  %s4999_s28 = smov [#allocation3]  }
0x19d0   :  { %v4616_v19 = vpop.permute.xlu0 %4615  ;;  %v4611_v22 = vpop.permute.xlu1 %4610 }
0x19d1   :  { %v4618_v23 = vunpack.i.h.bf16 %v4616_v19  ;;  %v4617_v24 = vunpack.i.l.bf16 %v4616_v19  ;;  %v4613_v27 = vunpack.i.h.bf16 %v4611_v22  ;;  %v4612_v31 = vunpack.i.l.bf16 %v4611_v22 }
0x19d3   :  { %v2085_v33 = vsel %vm170_vm5, %v2075_v49, %v4613_v27  ;;  %v2093_v34 = vsel %vm170_vm5, %v4613_v27, %v2075_v49  ;;  %v2084_v35 = vsel %vm170_vm5, %v2074_v5, %v4612_v31  ;;  %v2092_v36 = vsel %vm170_vm5, %v4612_v31, %v2074_v5 }
0x19d4   :  { %v2108_v28 = vpack.c.bf16 %v2085_v33, %v2084_v35  ;;  %v4626_v37 = vpop.permute.xlu0 %4625  ;;  %v4621_v16 = vpop.permute.xlu1 %4620  ;;  %v2109_v32 = vpack.c.bf16 %v4618_v23, %v4617_v24  ;;  %v2110_v38 = vpack.c.bf16 %v2093_v34, %v2092_v36 }
0x19d5   :  { %v4628_v41 = vunpack.i.h.bf16 %v4626_v37  ;;  %v4627_v42 = vunpack.i.l.bf16 %v4626_v37  ;;  %v4623_v43 = vunpack.i.h.bf16 %v4621_v16  ;;  %v4622_v44 = vunpack.i.l.bf16 %v4621_v16 }
0x19d6   :  { %4404 = vmatprep.mubr.msk.bf16.mxu0 %vm266_vm3, %v2108_v28 }
0x19d7   :  { %4405 = vmatmul.mubr.msk.bf16.vlgmr.msra.gmra.mrb[48].mxu0 %vm266_vm3, %v2109_v32  ;;  %v2107_v45 = vsel %vm170_vm5, %v4623_v43, %v4628_v41  ;;  %v2106_v46 = vsel %vm170_vm5, %v4622_v44, %v4627_v42 }
0x19d8   :  { %4408 = vmatprep.mubr.msk.bf16.mxu0 %vm266_vm3, %v2110_v38  ;;  %4413 = vmatpush3.bf16.msra.mxu0 %v5731_v18  ;;  %v2111_v47 = vpack.c.bf16 %v2107_v45, %v2106_v46 }
0x19d9   :  { %4414 = vmatprep.subr.bf16.mxu0 %v4982_v3 }
0x19dc   :  { %4415 = vmatpush3.bf16.msra.mxu0 %v5740_v20 }
0x19dd   :  { %4420 = vmatprep.subr.bf16.mxu0 %v4982_v3 }
0x19df   :  { %4409 = vmatmul.mubr.msk.bf16.gmra.mrb[52].mxu0 %vm266_vm3, %v2111_v47 }
0x19e0   :  { %4416 = vmatprep.mubr.msk.bf16.mxu0 %vm4983_vm1, %v4982_v3 }
0x19e7   :  { %4417 = vmatmul.mubr.bf16.vlgmr.msra.gmra.mrb[56].mxu0 %v4984_v9 }
0x19e8   :  { %4421 = vmatpush3.bf16.msra.mxu0 %v5731_v18  ;;  %4424 = vmatprep.mubr.msk.bf16.mxu0 %vm4983_vm1, %v4982_v3 }
0x19e9   :  { %4422 = vmatprep.subr.bf16.mxu0 %v4982_v3 }
0x19ec   :  { %4423 = vmatpush3.bf16.msra.mxu0 %v5740_v20 }
0x19ed   :  { %4436 = vmatprep.subr.bf16.mxu0 %v4982_v3 }
0x1aaa   :  { %v4406_v51 = vpop.f32.mrb[48].mxu0 }
0x1aab   :  { %v5772_v52 = vadd.f32 %v4406_v51, %v4032_v48  ;;  %v2180_v53 = vpop.f32.mrb[49].mxu0 }
0x1aac   :  { %v4407_v54 = vpop.f32.mrb[50].mxu0  ;;  %v2181_v63 = vadd.f32 %v4032_v48, %v2180_v53 }
0x1aad   :  { %v5774_v57 = vadd.f32 %v4407_v54, %v4032_v48  ;;  %v2183_v59 = vpop.f32.mrb[51].mxu0 }
0x1aae   :  { %v2184_v0 = vadd.f32 %v4032_v48, %v2183_v59 }
0x1ab2   :  { %v4410_v61 = vpop.f32.mrb[52].mxu0 }
0x1ab3   :  { %v5776_v62 = vadd.f32 %v4410_v61, %v4032_v48  ;;  %v2196_v58 = vpop.f32.mrb[53].mxu0 }
0x1ab4   :  { %v5778_v55 = vadd.f32 %v4032_v48, %v2196_v58  ;;  %v4411_v15 = vpop.f32.mrb[54].mxu0 }
0x1ab5   :  { %v5780_v56 = vadd.f32 %v4411_v15, %v4032_v48  ;;  %v2199_v12 = vpop.f32.mrb[55].mxu0 }
0x1ab6   :  { %v5782_v40 = vadd.f32 %v4032_v48, %v2199_v12 }
0x1aba   :  { %v2257_v60 = vpop.f32.mrb[56].mxu0 }
0x1abb   :  { %v2264_v17 = vadd.f32 %v2257_v60, %v2181_v63  ;;  %v4418_v13 = vpop.f32.mrb[57].mxu0 }
0x1abc   :  { %v2260_v29 = vpop.f32.mrb[58].mxu0 }
0x1abd   :  { %4888 = vtanh.f32 %v2264_v17  ;;  %v2265_v1 = vadd.f32 %v2260_v29, %v2184_v0  ;;  %v4419_v2 = vpop.f32.mrb[59].mxu0  ;;  %v4040_v6 = vmul.f32 -1.442695, %v2264_v17 }
0x1abf   :  { %4890 = vtanh.f32 %v2265_v1  ;;  %v4041_v7 = vmul.f32 -1.442695, %v2265_v1 }
0x1ac0   :  { %4892 = vpow2.f32 %v4040_v6 }
0x1ac1   :  { %4894 = vpow2.f32 %v4041_v7 }
0x1ac7   :  { %v4889_v26 = vpop.eup %4888 }
0x1ac8   :  { %2284 = vrot.lane.b32.xlu1 %v4889_v26, %s4985_s10 }
0x1ac9   :  { %v4891_v4 = vpop.eup %4890 }
0x1aca   :  { %2286 = vrot.lane.b32.xlu0 %v4891_v4, %s4985_s10  ;;  %v4893_v30 = vpop.eup %4892 }
0x1acb   :  { %v4895_v11 = vpop.eup %4894  ;;  %v2272_v14 = vadd.f32 1.0, %v4893_v30 }
0x1acc   :  { %v2273_v10 = vadd.f32 1.0, %v4895_v11 }
0x1acd   :  { %4896 = vrcp.f32 %v2272_v14 }
0x1ace   :  { %4898 = vrcp.f32 %v2273_v10 }
0x1ad7   :  { %v4897_v8 = vpop.eup %4896 }
0x1ad8   :  { %v4899_v50 = vpop.eup %4898  ;;  %v2280_v23 = vmul.f32 0.0, %v4897_v8 }
0x1ad9   :  { %v2281_v31 = vmul.f32 0.0, %v4899_v50 }
0x1b3a   :  { %v2285_v5 = vpop.permute.xlu1 %2284 }
0x1b3b   :  { %v2290_v49 = vmul.f32 %v4897_v8, %v2285_v5 }
0x1b3c   :  { %v2287_v19 = vpop.permute.xlu0 %2286 }
0x1b3d   :  { %2294 = vrot.lane.b32.xlu1 %v2290_v49, %s4985_s10  ;;  %v2291_v22 = vmul.f32 %v4899_v50, %v2287_v19 }
0x1b3f   :  { %2296 = vrot.lane.b32.xlu0 %v2291_v22, %s4985_s10 }
0x1baf   :  { %v2295_v24 = vpop.permute.xlu1 %2294 }
0x1bb0   :  { %v2300_v27 = vadd.f32 %v2295_v24, %v2280_v23 }
0x1bb1   :  { %v2297_v33 = vpop.permute.xlu0 %2296 }
0x1bb2   :  { %4900 = vtanh.f32 %v2300_v27  ;;  %v2301_v34 = vadd.f32 %v2297_v33, %v2281_v31 }
0x1bb4   :  { %4902 = vtanh.f32 %v2301_v34 }
0x1bbc   :  { %v4901_v35 = vpop.eup %4900 }
0x1bbd   :  { %2306 = vrot.lane.b32.xlu1 %v4901_v35, %s4985_s10 }
0x1bbe   :  { %v4903_v36 = vpop.eup %4902 }
0x1bbf   :  { %2308 = vrot.lane.b32.xlu0 %v4903_v36, %s4985_s10 }
0x1c2f   :  { %v2307_v28 = vpop.permute.xlu1 %2306 }
0x1c30   :  { %v5790_v16 = vmul.f32 %v4897_v8, %v2307_v28 }
0x1c31   :  { %v2309_v37 = vpop.permute.xlu0 %2308 }
0x1c32   :  { %v5792_v32 = vmul.f32 %v4899_v50, %v2309_v37 }
0x1c34   :  { %v2314_v38 = vpack.c.bf16 %v5792_v32, %v5790_v16 }
0x1c36   :  { %2316 = vrot.lane.b32.xlu1 %v2314_v38, %s4986_s17 }
0x1ca8   :  { %v2317_v41 = vpop.permute.xlu1 %2316 }
0x1ca9   :  { %4425 = vmatmul.mubr.msk.bf16.vlgmr.msra.gmra.mrb[60].mxu0 %vm400_vm4, %v2317_v41 }
0x1caa   :  { %4437 = vmatpush3.bf16.msra.mxu0 %v5731_v18  ;;  %4440 = vmatprep.mubr.msk.bf16.mxu0 %vm4983_vm1, %v4982_v3 }
0x1cab   :  { %4438 = vmatprep.subr.bf16.mxu0 %v4982_v3 }
0x1cae   :  { %4439 = vmatpush3.bf16.msra.mxu0 %v5740_v20 }
0x1caf   :  { %4450 = vmatprep.subr.bf16.mxu0 %v4982_v3 }
0x1d7c   :  { %v2355_v42 = vpop.f32.mrb[60].mxu0 }
0x1d7d   :  { %v2362_v43 = vadd.f32 %v2355_v42, %v5772_v52  ;;  %v4426_v44 = vpop.f32.mrb[61].mxu0 }
0x1d7e   :  { %v2358_v45 = vpop.f32.mrb[62].mxu0 }
0x1d7f   :  { %4904 = vtanh.f32 %v2362_v43  ;;  %v2363_v46 = vadd.f32 %v2358_v45, %v5774_v57  ;;  %v4427_v47 = vpop.f32.mrb[63].mxu0  ;;  %v4043_v51 = vmul.f32 -1.442695, %v2362_v43 }
0x1d81   :  { %4906 = vtanh.f32 %v2363_v46  ;;  %v4044_v20 = vmul.f32 -1.442695, %v2363_v46 }
0x1d82   :  { %4908 = vpow2.f32 %v4043_v51 }
0x1d83   :  { %4910 = vpow2.f32 %v4044_v20 }
0x1d89   :  { %v4905_v18 = vpop.eup %4904 }
0x1d8a   :  { %2382 = vrot.lane.b32.xlu0 %v4905_v18, %s4985_s10 }
0x1d8b   :  { %v4907_v48 = vpop.eup %4906 }
0x1d8c   :  { %2384 = vrot.lane.b32.xlu1 %v4907_v48, %s4985_s10  ;;  %v4909_v53 = vpop.eup %4908 }
0x1d8d   :  { %v4911_v54 = vpop.eup %4910  ;;  %v2370_v52 = vadd.f32 1.0, %v4909_v53 }
0x1d8e   :  { %v2371_v59 = vadd.f32 1.0, %v4911_v54 }
0x1d8f   :  { %4912 = vrcp.f32 %v2370_v52 }
0x1d90   :  { %4914 = vrcp.f32 %v2371_v59 }
0x1d99   :  { %v4913_v61 = vpop.eup %4912 }
0x1d9a   :  { %v4915_v15 = vpop.eup %4914  ;;  %v2378_v60 = vmul.f32 %v4913_v61, %v2300_v27 }
0x1d9b   :  { %v2379_v13 = vmul.f32 %v4915_v15, %v2301_v34 }
0x1dfc   :  { %v2383_v57 = vpop.permute.xlu0 %2382 }
0x1dfd   :  { %v2388_v58 = vmul.f32 %v4913_v61, %v2383_v57 }
0x1dfe   :  { %v2385_v12 = vpop.permute.xlu1 %2384 }
0x1dff   :  { %2392 = vrot.lane.b32.xlu0 %v2388_v58, %s4985_s10  ;;  %v2389_v63 = vmul.f32 %v4915_v15, %v2385_v12 }
0x1e01   :  { %2394 = vrot.lane.b32.xlu1 %v2389_v63, %s4985_s10 }
0x1e71   :  { %v2393_v0 = vpop.permute.xlu0 %2392 }
0x1e72   :  { %v2398_v17 = vadd.f32 %v2393_v0, %v2378_v60 }
0x1e73   :  { %v2395_v29 = vpop.permute.xlu1 %2394 }
0x1e74   :  { %4916 = vtanh.f32 %v2398_v17  ;;  %v2399_v1 = vadd.f32 %v2395_v29, %v2379_v13 }
0x1e76   :  { %4918 = vtanh.f32 %v2399_v1 }
0x1e7e   :  { %v4917_v2 = vpop.eup %4916 }
0x1e7f   :  { %2404 = vrot.lane.b32.xlu0 %v4917_v2, %s4985_s10 }
0x1e80   :  { %v4919_v26 = vpop.eup %4918 }
0x1e81   :  { %2406 = vrot.lane.b32.xlu1 %v4919_v26, %s4985_s10 }
0x1ef1   :  { %v2405_v4 = vpop.permute.xlu0 %2404 }
0x1ef2   :  { %v5812_v7 = vmul.f32 %v4913_v61, %v2405_v4 }
0x1ef3   :  { %v2407_v6 = vpop.permute.xlu1 %2406 }
0x1ef4   :  { %v5814_v30 = vmul.f32 %v4915_v15, %v2407_v6 }
0x1ef6   :  { %v2412_v11 = vpack.c.bf16 %v5814_v30, %v5812_v7 }
0x1ef8   :  { %2414 = vrot.lane.b32.xlu0 %v2412_v11, %s4986_s17 }
0x1f6a   :  { %v2415_v14 = vpop.permute.xlu0 %2414 }
0x1f6b   :  { %4433 = vmatmul.mubr.msk.bf16.vlgmr.msra.gmra.mrb[32].mxu1 %vm400_vm4, %v2415_v14 }
0x1f6c   :  { %4446 = vmatprep.mubr.msk.bf16.mxu1 %vm4983_vm1, %v4982_v3 }
0x203e   :  { %v2453_v10 = vpop.f32.mrb[32].mxu1 }
0x203f   :  { %v2460_v8 = vadd.f32 %v2453_v10, %v5778_v55  ;;  %v4434_v5 = vpop.f32.mrb[33].mxu1 }
0x2040   :  { %v2456_v49 = vpop.f32.mrb[34].mxu1 }
0x2041   :  { %4920 = vtanh.f32 %v2460_v8  ;;  %v2461_v50 = vadd.f32 %v2456_v49, %v5782_v40  ;;  %v4435_v19 = vpop.f32.mrb[35].mxu1  ;;  %v4046_v24 = vmul.f32 -1.442695, %v2460_v8 }
0x2043   :  { %4922 = vtanh.f32 %v2461_v50  ;;  %v4047_v27 = vmul.f32 -1.442695, %v2461_v50 }
0x2044   :  { %4924 = vpow2.f32 %v4046_v24 }
0x2045   :  { %4926 = vpow2.f32 %v4047_v27 }
0x204b   :  { %v4921_v22 = vpop.eup %4920 }
0x204c   :  { %2480 = vrot.lane.b32.xlu1 %v4921_v22, %s4985_s10 }
0x204d   :  { %v4923_v23 = vpop.eup %4922 }
0x204e   :  { %2482 = vrot.lane.b32.xlu0 %v4923_v23, %s4985_s10  ;;  %v4925_v31 = vpop.eup %4924 }
0x204f   :  { %v4927_v33 = vpop.eup %4926  ;;  %v2468_v55 = vadd.f32 1.0, %v4925_v31 }
0x2050   :  { %v2469_v34 = vadd.f32 1.0, %v4927_v33 }
0x2051   :  { %4928 = vrcp.f32 %v2468_v55 }
0x2052   :  { %4930 = vrcp.f32 %v2469_v34 }
0x205b   :  { %v4929_v35 = vpop.eup %4928 }
0x205c   :  { %v4931_v28 = vpop.eup %4930  ;;  %v2476_v41 = vmul.f32 %v4929_v35, %v2398_v17 }
0x205d   :  { %v2477_v44 = vmul.f32 %v4931_v28, %v2399_v1 }
0x20be   :  { %v2481_v40 = vpop.permute.xlu1 %2480 }
0x20bf   :  { %v2486_v36 = vmul.f32 %v4929_v35, %v2481_v40 }
0x20c0   :  { %v2483_v37 = vpop.permute.xlu0 %2482 }
0x20c1   :  { %2490 = vrot.lane.b32.xlu1 %v2486_v36, %s4985_s10  ;;  %v2487_v38 = vmul.f32 %v4931_v28, %v2483_v37 }
0x20c3   :  { %2492 = vrot.lane.b32.xlu0 %v2487_v38, %s4985_s10 }
0x2133   :  { %v2491_v42 = vpop.permute.xlu1 %2490 }
0x2134   :  { %v2496_v43 = vadd.f32 %v2491_v42, %v2476_v41 }
0x2135   :  { %v2493_v45 = vpop.permute.xlu0 %2492 }
0x2136   :  { %4932 = vtanh.f32 %v2496_v43  ;;  %v2497_v46 = vadd.f32 %v2493_v45, %v2477_v44 }
0x2138   :  { %4934 = vtanh.f32 %v2497_v46 }
0x2140   :  { %v4933_v47 = vpop.eup %4932 }
0x2141   :  { %2502 = vrot.lane.b32.xlu1 %v4933_v47, %s4985_s10 }
0x2142   :  { %v4935_v18 = vpop.eup %4934 }
0x2143   :  { %2504 = vrot.lane.b32.xlu0 %v4935_v18, %s4985_s10 }
0x21b3   :  { %v2503_v48 = vpop.permute.xlu1 %2502 }
0x21b4   :  { %v5830_v20 = vmul.f32 %v4929_v35, %v2503_v48 }
0x21b5   :  { %v2505_v51 = vpop.permute.xlu0 %2504 }
0x21b6   :  { %v5832_v53 = vmul.f32 %v4931_v28, %v2505_v51 }
0x21b8   :  { %v2510_v54 = vpack.c.bf16 %v5832_v53, %v5830_v20 }
0x21ba   :  { %2512 = vrot.lane.b32.xlu1 %v2510_v54, %s4986_s17 }
0x222c   :  { %v2513_v52 = vpop.permute.xlu1 %2512 }
0x222d   :  { %4441 = vmatmul.mubr.msk.bf16.vlgmr.msra.gmra.mrb[64].mxu0 %vm400_vm4, %v2513_v52 }
0x222e   :  { %4452 = vmatprep.mubr.msk.bf16.mxu0 %vm4983_vm1, %v4982_v3 }
0x2300   :  { %v2551_v59 = vpop.f32.mrb[64].mxu0 }
0x2301   :  { %v2558_v61 = vadd.f32 %v2551_v59, %v5776_v62  ;;  %v4442_v57 = vpop.f32.mrb[65].mxu0 }
0x2302   :  { %v2554_v58 = vpop.f32.mrb[66].mxu0 }
0x2303   :  { %4936 = vtanh.f32 %v2558_v61  ;;  %v2559_v15 = vadd.f32 %v2554_v58, %v5780_v56  ;;  %v4443_v12 = vpop.f32.mrb[67].mxu0  ;;  %v4049_v0 = vmul.f32 -1.442695, %v2558_v61 }
0x2305   :  { %4938 = vtanh.f32 %v2559_v15  ;;  %v4050_v17 = vmul.f32 -1.442695, %v2559_v15 }
0x2306   :  { %4940 = vpow2.f32 %v4049_v0 }
0x2307   :  { %4942 = vpow2.f32 %v4050_v17 }
0x230d   :  { %v4937_v63 = vpop.eup %4936 }
0x230e   :  { %2578 = vrot.lane.b32.xlu0 %v4937_v63, %s4985_s10 }
0x230f   :  { %v4939_v60 = vpop.eup %4938 }
0x2310   :  { %2580 = vrot.lane.b32.xlu1 %v4939_v60, %s4985_s10  ;;  %v4941_v13 = vpop.eup %4940 }
0x2311   :  { %v4943_v29 = vpop.eup %4942  ;;  %v2566_v62 = vadd.f32 1.0, %v4941_v13 }
0x2312   :  { %v2567_v1 = vadd.f32 1.0, %v4943_v29 }
0x2313   :  { %4944 = vrcp.f32 %v2566_v62 }
0x2314   :  { %4946 = vrcp.f32 %v2567_v1 }
0x231d   :  { %v4945_v2 = vpop.eup %4944 }
0x231e   :  { %v4947_v4 = vpop.eup %4946  ;;  %v2574_v14 = vmul.f32 %v4945_v2, %v2496_v43 }
0x231f   :  { %v2575_v5 = vmul.f32 %v4947_v4, %v2497_v46 }
0x2380   :  { %v2579_v56 = vpop.permute.xlu0 %2578 }
0x2381   :  { %v2584_v26 = vmul.f32 %v4945_v2, %v2579_v56 }
0x2382   :  { %v2581_v6 = vpop.permute.xlu1 %2580 }
0x2383   :  { %2588 = vrot.lane.b32.xlu0 %v2584_v26, %s4985_s10  ;;  %v2585_v11 = vmul.f32 %v4947_v4, %v2581_v6  ;;  %v4709_v6 = vld [vmem:[%s6279_s9] sm:$0xff]  }
0x2385   :  { %2590 = vrot.lane.b32.xlu1 %v2585_v11, %s4985_s10  ;;  %v4710_v11 = vld [vmem:[%s6279_s9 + $0x48] sm:$0xff]  }
0x23f5   :  { %v2589_v10 = vpop.permute.xlu0 %2588 }
0x23f6   :  { %v2594_v8 = vadd.f32 %v2589_v10, %v2574_v14  ;;  %v4711_v14 = vld [vmem:[%s6279_s9 + $0x8] sm:$0xff]   ;;  %v4712_v10 = vld [vmem:[%s6279_s9 + $0x50] sm:$0xff]  }
0x23f7   :  { %v2591_v49 = vpop.permute.xlu1 %2590 }
0x23f8   :  { %4948 = vtanh.f32 %v2594_v8  ;;  %v2595_v50 = vadd.f32 %v2591_v49, %v2575_v5  ;;  %v4714_v8 = vld [vmem:[%s6279_s9 + $0x58] sm:$0xff]   ;;  %v4716_v49 = vld [vmem:[%s6279_s9 + $0x60] sm:$0xff]  }
0x23f9   :  { %v4715_v5 = vld [vmem:[%s6279_s9 + $0x18] sm:$0xff]  }
0x23fa   :  { %4950 = vtanh.f32 %v2595_v50  ;;  %v4717_v50 = vld [vmem:[%s6279_s9 + $0x20] sm:$0xff]  }
0x2402   :  { %v4949_v19 = vpop.eup %4948 }
0x2403   :  { %2600 = vrot.lane.b32.xlu0 %v4949_v19, %s4985_s10  ;;  %v4718_v19 = vld [vmem:[%s6279_s9 + $0x68] sm:$0xff]  }
0x2404   :  { %v4951_v22 = vpop.eup %4950 }
0x2405   :  { %2602 = vrot.lane.b32.xlu1 %v4951_v22, %s4985_s10  ;;  %v4719_v22 = vld [vmem:[%s6279_s9 + $0x28] sm:$0xff]  }
0x2407   :  { %2610 = vrot.lane.b32.xlu0 %v5790_v16, %s4986_s17 }
0x2409   :  { %2612 = vrot.lane.b32.xlu1 %v5792_v32, %s4986_s17 }
0x240b   :  { %2626 = vrot.lane.b32.xlu0 %v5812_v7, %s6278_s0 }
0x240d   :  { %2628 = vrot.lane.b32.xlu1 %v5814_v30, %s6278_s0 }
0x240f   :  { %2634 = vrot.lane.b32.xlu0 %v5830_v20, %s6278_s0 }
0x2411   :  { %2636 = vrot.lane.b32.xlu1 %v5832_v53, %s6278_s0 }
0x2475   :  { %v2601_v23 = vpop.permute.xlu0 %2600 }
0x2476   :  { %v2606_v24 = vmul.f32 %v4945_v2, %v2601_v23  ;;  %v4708_v2 = vld [vmem:[%s6279_s9 + $0x40] sm:$0xff]   ;;  %v4720_v23 = vld [vmem:[%s6279_s9 + $0x70] sm:$0xff]  }
0x2477   :  { %v2603_v27 = vpop.permute.xlu1 %2602 }
0x2478   :  { %2618 = vrot.lane.b32.xlu0 %v2606_v24, %s4986_s17  ;;  %v2607_v31 = vmul.f32 %v4947_v4, %v2603_v27  ;;  %v4722_v27 = vld [vmem:[%s6279_s9 + $0x78] sm:$0xff]  }
0x2479   :  { %v2611_v33 = vpop.permute.xlu0 %2610 }
0x247a   :  { %2620 = vrot.lane.b32.xlu1 %v2607_v31, %s4986_s17 }
0x247b   :  { %v2613_v55 = vpop.permute.xlu1 %2612 }
0x247c   :  { %2640 = vrot.lane.b32.xlu0 %v2606_v24, %s4985_s10  ;;  %v4721_v24 = vld [vmem:[%s6279_s9 + $0x30] sm:$0xff]  }
0x247d   :  { %v2627_v34 = vpop.permute.xlu0 %2626 }
0x247e   :  { %2642 = vrot.lane.b32.xlu1 %v2607_v31, %s4985_s10  ;;  %v4723_v31 = vld [vmem:[%s6279_s9 + $0x38] sm:$0xff]  }
0x247f   :  { %v2629_v35 = vpop.permute.xlu1 %2628 }
0x2480   :  { %2646 = vrot.lane.b32.xlu0 %v5790_v16, %s4985_s10 }
0x2481   :  { %v2635_v40 = vpop.permute.xlu0 %2634 }
0x2482   :  { %2648 = vrot.lane.b32.xlu1 %v5792_v32, %s4985_s10 }
0x2483   :  { %v2637_v36 = vpop.permute.xlu1 %2636 }
0x2484   :  { %3175 = vrot.lane.b32.xlu0 %v5696_v39, %s6278_s0 }
0x2486   :  { %3177 = vrot.lane.b32.xlu1 %v5698_v25, %s6278_s0 }
0x24ea   :  { %v2619_v28 = vpop.permute.xlu0 %2618 }
0x24eb   :  { %v2652_v37 = vsel %vm266_vm3, %v2611_v33, %v2619_v28  ;;  %v4724_v33 = vld [vmem:[%s6279_s9 + $0x80] sm:$0xff]   ;;  %v4730_v28 = vld [vmem:[%s6279_s9 + $0xb0] sm:$0xff]  }
0x24ec   :  { %v2654_v16 = vsel %vm400_vm4, %v2652_v37, %v2627_v34  ;;  %v2621_v32 = vpop.permute.xlu1 %2620  ;;  %v4726_v34 = vld [vmem:[%s6279_s9 + $0x90] sm:$0xff]   ;;  %v4731_v37 = vld [vmem:[%s6279_s9 + $0xb8] sm:$0xff]  }
0x24ed   :  { %v2656_v38 = vsel %vm1273_vm6, %v2654_v16, %v2635_v40  ;;  %v2653_v41 = vsel %vm266_vm3, %v2613_v55, %v2621_v32  ;;  %v4725_v55 = vld [vmem:[%s6279_s9 + $0x88] sm:$0xff]   ;;  %v4728_v40 = vld [vmem:[%s6279_s9 + $0xa0] sm:$0xff]  }
0x24ee   :  { %v2658_v39 = vsel %vm1276_vm7, %v2656_v38, %v5830_v20  ;;  %v2641_v25 = vpop.permute.xlu0 %2640  ;;  %v2655_v42 = vsel %vm400_vm4, %v2653_v41, %v2629_v35  ;;  %v4727_v35 = vld [vmem:[%s6279_s9 + $0x98] sm:$0xff]  }
0x24ef   :  { %v2660_v43 = vsel %vm1279_vm8, %v2658_v39, %v5812_v7  ;;  %v2657_v44 = vsel %vm1273_vm6, %v2655_v42, %v2637_v36  ;;  %v4729_v36 = vld [vmem:[%s6279_s9 + $0xa8] sm:$0xff]  }
0x24f0   :  { %v2659_v45 = vsel %vm1276_vm7, %v2657_v44, %v5832_v53  ;;  %v2643_v46 = vpop.permute.xlu1 %2642  ;;  %v2662_v47 = vsel %vm1282_vm9, %v2660_v43, %v2641_v25 }
0x24f1   :  { %v2661_v18 = vsel %vm1279_vm8, %v2659_v45, %v5814_v30 }
0x24f2   :  { %v2647_v48 = vpop.permute.xlu0 %2646  ;;  %v2663_v20 = vsel %vm1282_vm9, %v2661_v18, %v2643_v46 }
0x24f3   :  { %v2664_v51 = vsel %vm1285_vm10, %v2662_v47, %v2647_v48 }
0x24f4   :  { %4952 = vtanh.f32 %v2664_v51  ;;  %v2649_v54 = vpop.permute.xlu1 %2648 }
0x24f5   :  { %v2665_v7 = vsel %vm1285_vm10, %v2663_v20, %v2649_v54 }
0x24f6   :  { %4954 = vtanh.f32 %v2665_v7 }
0x24fe   :  { %v5890_v52 = vpop.eup %4952 }
0x24ff   :  { %v2668_v53 = vpack.c.bf16 %v5890_v52, %v5890_v52 }
0x2500   :  { %v5894_v59 = vpop.eup %4954 }
0x2501   :  { %v2670_v61 = vsel %vm95_vm0, %v2668_v53, 0  ;;  %v2712_v30 = vpack.c.bf16 %v5894_v59, %v5894_v59  ;;  %v2844_v57 = vpack.c.bf16 %v5894_v59, %v5890_v52  ;;  %v4732_v53 = vld [vmem:[%s6232_s12] sm:$0xff]   ;;  %v4733_v59 = vld [vmem:[%s6232_s12 + $0x8] sm:$0xff]  }
0x2502   :  { %4445 = vmatpush3.bf16.msra.mxu1 %v2670_v61 }
0x2503   :  { %4456 = vmatprep.subr.bf16.mxu1 %v4982_v3  ;;  %v2714_v58 = vsel %vm95_vm0, %v2712_v30, 0  ;;  %v4111_v30 = vld [vmem:[%s6280_s8] ss:$0 sm:$0xff] }
0x2504   :  { %4451 = vmatpush3.bf16.msra.mxu0 %v2714_v58 }
0x2505   :  { %4447 = vmatmul.mubr.msk.bf16.vlgmr.msra.gmra.mrb[36].mxu1 %vm170_vm5, %v5512_v21  ;;  %4462 = vmatprep.subr.bf16.mxu0 %v4982_v3 }
0x2506   :  { %4458 = vmatprep.mubr.msk.bf16.mxu1 %vm4983_vm1, %v4982_v3 }
0x2507   :  { %4453 = vmatmul.mubr.msk.bf16.vlgmr.msra.gmra.mrb[68].mxu0 %vm170_vm5, %v5512_v21 }
0x2508   :  { %4464 = vmatprep.mubr.msk.bf16.mxu0 %vm4983_vm1, %v4982_v3 }
0x25d8   :  { %v5912_v15 = vpop.f32.mrb[36].mxu1 }
0x25d9   :  { %v2756_v12 = vpack.c.bf16 %v5912_v15, %v5912_v15  ;;  %v4448_v63 = vpop.f32.mrb[37].mxu1 }
0x25da   :  { %v2709_v60 = vpop.f32.mrb[38].mxu1  ;;  %v5916_v0 = vpop.f32.mrb[68].mxu0 }
0x25db   :  { %v4449_v17 = vpop.f32.mrb[39].mxu1  ;;  %v2758_v13 = vsel %vm95_vm0, %v2756_v12, 0  ;;  %v2800_v29 = vpack.c.bf16 %v5916_v0, %v5916_v0  ;;  %v2861_v62 = vpack.c.bf16 %v5916_v0, %v5912_v15  ;;  %v4454_v1 = vpop.f32.mrb[69].mxu0 }
0x25dc   :  { %4457 = vmatpush3.bf16.msra.mxu1 %v2758_v13  ;;  %v2753_v56 = vpop.f32.mrb[70].mxu0  ;;  %v3176_v17 = vpop.permute.xlu0 %3175  ;;  %v4734_v1 = vld [vmem:[%s6234_s14] sm:$0xff]  }
0x25dd   :  { %4468 = vmatprep.subr.bf16.mxu1 %v4982_v3  ;;  %v4455_v26 = vpop.f32.mrb[71].mxu0  ;;  %v2802_v4 = vsel %vm95_vm0, %v2800_v29, 0  ;;  %v3178_v13 = vpop.permute.xlu1 %3177  ;;  %v4735_v56 = vld [vmem:[%s6234_s14 + $0x8] sm:$0xff]  }
0x25de   :  { %4463 = vmatpush3.bf16.msra.mxu0 %v2802_v4  ;;  %v4736_v26 = vld [vmem:[%s6234_s14 + $0x10] sm:$0xff]   ;;  %v4737_v4 = vld [vmem:[%s6234_s14 + $0x18] sm:$0xff]  }
0x25df   :  { %4459 = vmatmul.mubr.msk.bf16.vlgmr.msra.gmra.mrb[40].mxu1 %vm170_vm5, %v5512_v21  ;;  %4488 = vmatprep.subr.bf16.mxu0 %v4982_v3 }
0x25e0   :  { %4469 = vmatpush3.bf16.msra.mxu1 %v4708_v2  ;;  %4484 = vmatprep.mubr.msk.bf16.mxu1 %vm4983_vm1, %v4982_v3 }
0x25e1   :  { %4470 = vmatprep.subr.bf16.mxu1 %v4982_v3  ;;  %4465 = vmatmul.mubr.msk.bf16.vlgmr.msra.gmra.mrb[72].mxu0 %vm170_vm5, %v5512_v21  ;;  %v4713_v21 = vld [vmem:[%s6279_s9 + $0x10] sm:$0xff]  }
0x25e2   :  { %4489 = vmatpush3.bf16.msra.mxu0 %v4709_v6  ;;  %4504 = vmatprep.mubr.msk.bf16.mxu0 %vm4983_vm1, %v4982_v3  ;;  %v4112_v6 = vld [vmem:[%s6233_s13] ss:$0 sm:$0xff] }
0x25e3   :  { %4490 = vmatprep.subr.bf16.mxu0 %v4982_v3 }
0x25e4   :  { %4471 = vmatpush3.bf16.msra.mxu1 %v4710_v11 }
0x25e5   :  { %4472 = vmatprep.subr.bf16.mxu1 %v4982_v3 }
0x25e6   :  { %4491 = vmatpush3.bf16.msra.mxu0 %v4711_v14 }
0x25e7   :  { %4492 = vmatprep.subr.bf16.mxu0 %v4982_v3 }
0x25e8   :  { %4473 = vmatpush3.bf16.msra.mxu1 %v4712_v10 }
0x25e9   :  { %4474 = vmatprep.subr.bf16.mxu1 %v4982_v3 }
0x25ea   :  { %4493 = vmatpush3.bf16.msra.mxu0 %v4713_v21 }
0x25eb   :  { %4494 = vmatprep.subr.bf16.mxu0 %v4982_v3 }
0x25ec   :  { %4475 = vmatpush3.bf16.msra.mxu1 %v4714_v8 }
0x25ed   :  { %4476 = vmatprep.subr.bf16.mxu1 %v4982_v3 }
0x25ee   :  { %4495 = vmatpush3.bf16.msra.mxu0 %v4715_v5 }
0x25ef   :  { %4496 = vmatprep.subr.bf16.mxu0 %v4982_v3 }
0x25f0   :  { %4477 = vmatpush3.bf16.msra.mxu1 %v4716_v49 }
0x25f1   :  { %4478 = vmatprep.subr.bf16.mxu1 %v4982_v3 }
0x25f2   :  { %4497 = vmatpush3.bf16.msra.mxu0 %v4717_v50  ;;  %v4738_v50 = vld [vmem:[%s6236_s16] sm:$0xff]  }
0x25f3   :  { %4498 = vmatprep.subr.bf16.mxu0 %v4982_v3 }
0x25f4   :  { %4479 = vmatpush3.bf16.msra.mxu1 %v4718_v19  ;;  %v4739_v19 = vld [vmem:[%s6236_s16 + $0x8] sm:$0xff]  }
0x25f5   :  { %4480 = vmatprep.subr.bf16.mxu1 %v4982_v3 }
0x25f6   :  { %4499 = vmatpush3.bf16.msra.mxu0 %v4719_v22  ;;  %v4122_v22 = vld [vmem:[#allocation2] ss:$0 sm:$0xff] }
0x25f7   :  { %4500 = vmatprep.subr.bf16.mxu0 %v4982_v3  ;;  %3347 = vperm.xlu0 %4629, %v4122_v22  }
0x25f8   :  { %4481 = vmatpush3.bf16.msra.mxu1 %v4720_v23  ;;  %v3610_v23 = vld [vmem:[%s6239_s19] sm:$0xf] }
0x25f9   :  { %4482 = vmatprep.subr.bf16.mxu1 %v4982_v3 }
0x25fa   :  { %4501 = vmatpush3.bf16.msra.mxu0 %v4721_v24  ;;  %v3615_v24 = vsel %vm95_vm0, %v3610_v23, 0 }
0x25fb   :  { %4502 = vmatprep.subr.bf16.mxu0 %v4982_v3 }
0x25fc   :  { %4483 = vmatpush3.bf16.msra.mxu1 %v4722_v27  ;;  %v3607_v27 = vld [vmem:[%s6244_s24] sm:$0xff] }
0x25fd   :  { %4508 = vmatprep.subr.bf16.mxu1 %v4982_v3 }
0x25fe   :  { %4503 = vmatpush3.bf16.msra.mxu0 %v4723_v31  ;;  %v3608_v31 = vld [vmem:[%s6244_s24 + $0x8] sm:$0xff] }
0x25ff   :  { %4485 = vmatmul.mubr.bf16.vlgmr.msra.gmra.mrb[44].mxu1 %v2861_v62  ;;  %4528 = vmatprep.subr.bf16.mxu0 %v4982_v3 }
0x2600   :  { %4509 = vmatpush3.bf16.msra.mxu1 %v4724_v33  ;;  %4524 = vmatprep.mubr.msk.bf16.mxu1 %vm4983_vm1, %v4982_v3  ;;  %v3609_v33 = vpack.c.bf16 %v3608_v31, %v3607_v27 }
0x2601   :  { %4510 = vmatprep.subr.bf16.mxu1 %v4982_v3  ;;  %4505 = vmatmul.mubr.bf16.vlgmr.msra.gmra.mrb[76].mxu0 %v2844_v57 }
0x2602   :  { %4532 = vmatprep.mubr.msk.bf16.mxu0 %vm4983_vm1, %v4982_v3  ;;  %4529 = vmatpush3.bf16.msra.mxu0 %v4732_v53  ;;  %v4998_v53 = vmov 7  }
0x2603   :  { %4530 = vmatprep.subr.bf16.mxu0 %v4982_v3 }
0x2604   :  { %4511 = vmatpush3.bf16.msra.mxu1 %v4725_v55  ;;  %v4116_v55 = vld [vmem:[%s6235_s15] ss:$0 sm:$0xff] }
0x2605   :  { %4512 = vmatprep.subr.bf16.mxu1 %v4982_v3 }
0x2606   :  { %4531 = vmatpush3.bf16.msra.mxu0 %v4733_v59  ;;  %v4741_v59 = vld [vmem:[%s6242_s22 + $0x8] sm:$0xff]  }
0x2607   :  { %4536 = vmatprep.subr.bf16.mxu0 %v4982_v3 }
0x2608   :  { %4513 = vmatpush3.bf16.msra.mxu1 %v4726_v34 }
0x2609   :  { %4514 = vmatprep.subr.bf16.mxu1 %v4982_v3 }
0x260c   :  { %4515 = vmatpush3.bf16.msra.mxu1 %v4727_v35 }
0x260d   :  { %4516 = vmatprep.subr.bf16.mxu1 %v4982_v3 }
0x2610   :  { %4517 = vmatpush3.bf16.msra.mxu1 %v4728_v40 }
0x2611   :  { %4518 = vmatprep.subr.bf16.mxu1 %v4982_v3 }
0x2614   :  { %4519 = vmatpush3.bf16.msra.mxu1 %v4729_v36  ;;  %v3663_v36 = vld [vmem:[%s6240_s20] sm:$0xf]  ;;  %s3842_s20 = sshll.u32 %s4999_s28, 4  ;;  %s3843_s20 = int_to_ptr.vmem [resolvable:$true] %s3842_s20 }
0x2615   :  { %4520 = vmatprep.subr.bf16.mxu1 %v4982_v3  ;;  %p4963_p1 = scmp.lt.s32.totalorder %s3843_s20, %s3843_s20 }
0x2618   :  { %4521 = vmatpush3.bf16.msra.mxu1 %v4730_v28 }
0x2619   :  { %4522 = vmatprep.subr.bf16.mxu1 %v4982_v3 }
0x261c   :  { %4523 = vmatpush3.bf16.msra.mxu1 %v4731_v37 }
0x261d   :  { %4556 = vmatprep.subr.bf16.mxu1 %v4982_v3 }
0x26b2   :  { %v2794_v16 = vpop.f32.mrb[40].mxu1 }
0x26b3   :  { %v4460_v38 = vpop.f32.mrb[41].mxu1 }
0x26b4   :  { %v2797_v32 = vpop.f32.mrb[42].mxu1  ;;  %v2838_v41 = vpop.f32.mrb[72].mxu0 }
0x26b5   :  { %v4461_v39 = vpop.f32.mrb[43].mxu1  ;;  %v3057_v25 = vpack.c.bf16 %v2838_v41, %v2794_v16  ;;  %v4466_v42 = vpop.f32.mrb[73].mxu0  ;;  %v3668_v32 = vsel %vm95_vm0, %v3663_v36, 0  ;;  %v3660_v41 = vld [vmem:[%s6245_s25] sm:$0xff] }
0x26b6   :  { %v2841_v43 = vpop.f32.mrb[74].mxu0  ;;  %v3661_v39 = vld [vmem:[%s6245_s25 + $0x8] sm:$0xff]  ;;  %v4992_v42 = vmov 2  }
0x26b7   :  { %v4467_v44 = vpop.f32.mrb[75].mxu0  ;;  %4525 = vmatmul.mubr.bf16.vlgmr.msra.gmra.mrb[48].mxu1 %v3057_v25  ;;  %v3662_v25 = vpack.c.bf16 %v3661_v39, %v3660_v41  ;;  %4632 = vset.pattern.permute.xlu0 %v4992_v42  ;;  %v3348_v43 = vpop.permute.xlu0 %3347 }
0x26b8   :  { %4558 = vmatprep.mubr.msk.bf16.mxu1 %vm4983_vm1, %v4982_v3  ;;  %4557 = vmatpush3.bf16.msra.mxu1 %v3615_v24 }
0x26b9   :  { %4568 = vmatprep.subr.bf16.mxu1 %v4982_v3 }
0x26bf   :  { %4559 = vmatmul.mubr.msk.bf16.vlgmr.msra.gmra.mrb[52].mxu1 %vm170_vm5, %v3609_v33 }
0x26c0   :  { %4584 = vmatprep.mubr.msk.bf16.mxu1 %vm4983_vm1, %v4982_v3 }
0x26d2   :  { %v2961_v45 = vpop.f32.mrb[44].mxu1 }
0x26d3   :  { %v4486_v46 = vpop.f32.mrb[45].mxu1 }
0x26d4   :  { %v2964_v47 = vpop.f32.mrb[46].mxu1  ;;  %v3050_v18 = vpop.f32.mrb[76].mxu0 }
0x26d5   :  { %v4487_v48 = vpop.f32.mrb[47].mxu1  ;;  %v3051_v51 = vadd.f32 %v3050_v18, %v2961_v45  ;;  %v4506_v20 = vpop.f32.mrb[77].mxu0 }
0x26d6   :  { %v3053_v54 = vpop.f32.mrb[78].mxu0  ;;  %v4994_v20 = vmov 1  }
0x26d7   :  { %v3054_v7 = vadd.f32 %v3053_v54, %v2964_v47  ;;  %v4507_v52 = vpop.f32.mrb[79].mxu0  ;;  %v4995_v54 = vmov 3  }
0x26d8   :  { %v4997_v52 = vmov 6  }
0x278a   :  { %v3157_v61 = vpop.f32.mrb[48].mxu1 }
0x278b   :  { %v3164_v57 = vadd.f32 %v3157_v61, %v3051_v51  ;;  %v4526_v58 = vpop.f32.mrb[49].mxu1  ;;  %v4993_v51 = vmov 5   ;;  %v4742_v61 = vld [vmem:[%s6242_s22 + $0x10] sm:$0xff]  }
0x278c   :  { %v3160_v15 = vpop.f32.mrb[50].mxu1 }
0x278d   :  { %v3173_v12 = vadd.f32 %v4111_v30, %v3164_v57  ;;  %v3165_v63 = vadd.f32 %v3160_v15, %v3054_v7  ;;  %v4527_v60 = vpop.f32.mrb[51].mxu1  ;;  %v4996_v7 = vmov 4   ;;  %v4744_v57 = vld [vmem:[%s6242_s22 + $0x20] sm:$0xff]  }
0x278f   :  { %v3174_v0 = vadd.f32 %v4111_v30, %v3165_v63  ;;  %v3181_v29 = vadd.f32 %v3176_v17, %v3173_v12  ;;  %v4743_v30 = vld [vmem:[%s6242_s22 + $0x18] sm:$0xff]   ;;  %v4745_v12 = vld [vmem:[%s6242_s22 + $0x28] sm:$0xff]  }
0x2791   :  { %v3182_v62 = vadd.f32 %v3178_v13, %v3174_v0 }
0x2792   :  { %v6143_v58 = vpop.f32.mrb[52].mxu1 }
0x2793   :  { %v3183_v2 = vpack.c.bf16 %v3182_v62, %v3181_v29  ;;  %v4560_v63 = vpop.f32.mrb[53].mxu1  ;;  %v4746_v29 = vld [vmem:[%s6242_s22 + $0x30] sm:$0xff]  }
0x2794   :  { %v6150_v60 = vpop.f32.mrb[54].mxu1 }
0x2795   :  { %4533 = vmatmul.mubr.msk.bf16.vlgmr.msra.gmra.mrb[80].mxu0 %vm400_vm4, %v3183_v2  ;;  %v4561_v17 = vpop.f32.mrb[55].mxu1 }
0x2796   :  { %4537 = vmatpush3.bf16.msra.mxu0 %v4734_v1  ;;  %4544 = vmatprep.mubr.msk.bf16.mxu0 %vm4983_vm1, %v4982_v3  ;;  %v4747_v1 = vld [vmem:[%s6242_s22 + $0x38] sm:$0xff]  }
0x2797   :  { %4538 = vmatprep.subr.bf16.mxu0 %v4982_v3 }
0x279a   :  { %4539 = vmatpush3.bf16.msra.mxu0 %v4735_v56 }
0x279b   :  { %4540 = vmatprep.subr.bf16.mxu0 %v4982_v3 }
0x279e   :  { %4541 = vmatpush3.bf16.msra.mxu0 %v4736_v26 }
0x279f   :  { %4542 = vmatprep.subr.bf16.mxu0 %v4982_v3 }
0x27a2   :  { %4543 = vmatpush3.bf16.msra.mxu0 %v4737_v4 }
0x27a3   :  { %4548 = vmatprep.subr.bf16.mxu0 %v4982_v3 }
0x2868   :  { %v3244_v11 = vpop.f32.mrb[80].mxu0 }
0x2869   :  { %v4534_v14 = vpop.f32.mrb[81].mxu0  ;;  %v3245_v21 = vadd.f32 %v4112_v6, %v3244_v11 }
0x286a   :  { %v3247_v10 = vpop.f32.mrb[82].mxu0  ;;  %v6165_v14 = vld [vmem:[%s6238_s18] sm:$0xff] }
0x286b   :  { %v3248_v8 = vadd.f32 %v4112_v6, %v3247_v10  ;;  %v4535_v5 = vpop.f32.mrb[83].mxu0 }
0x286d   :  { %v3251_v49 = vpack.c.bf16 %v3248_v8, %v3245_v21 }
0x286f   :  { %4545 = vmatmul.mubr.msk.bf16.vlgmr.msra.gmra.mrb[84].mxu0 %vm1276_vm7, %v3251_v49 }
0x2870   :  { %4552 = vmatprep.mubr.msk.bf16.mxu0 %vm4983_vm1, %v4982_v3  ;;  %4549 = vmatpush3.bf16.msra.mxu0 %v4738_v50 }
0x2871   :  { %4550 = vmatprep.subr.bf16.mxu0 %v4982_v3 }
0x2874   :  { %4551 = vmatpush3.bf16.msra.mxu0 %v4739_v19 }
0x2875   :  { %4562 = vmatprep.subr.bf16.mxu0 %v4982_v3 }
0x2942   :  { %v3328_v34 = vpop.f32.mrb[84].mxu0 }
0x2943   :  { %v4546_v35 = vpop.f32.mrb[85].mxu0  ;;  %v3329_v28 = vadd.f32 %v4116_v55, %v3328_v34 }
0x2944   :  { %v3331_v40 = vpop.f32.mrb[86].mxu0 }
0x2945   :  { %v3332_v37 = vadd.f32 %v4116_v55, %v3331_v40  ;;  %v4547_v16 = vpop.f32.mrb[87].mxu0 }
0x2947   :  { %v3335_v38 = vpack.c.bf16 %v3332_v37, %v3329_v28 }
0x2949   :  { %4553 = vmatmul.mubr.msk.bf16.vlgmr.msra.gmra.mrb[88].mxu0 %vm400_vm4, %v3335_v38 }
0x294a   :  { %4563 = vmatpush3.bf16.msra.mxu0 %v3668_v32  ;;  %4564 = vmatprep.mubr.msk.bf16.mxu0 %vm4983_vm1, %v4982_v3  ;;  %vm3596_vm1 = vcmask 1045504  }
0x2951   :  { %4565 = vmatmul.mubr.msk.bf16.vlgmr.msra.gmra.mrb[92].mxu0 %vm170_vm5, %v3662_v25 }
0x2a1c   :  { %v3399_v44 = vpop.f32.mrb[88].mxu0 }
0x2a1d   :  { %v3400_v45 = vadd.f32 %v3399_v44, %v3348_v43  ;;  %v4554_v46 = vpop.f32.mrb[89].mxu0 }
0x2a1e   :  { %v3402_v47 = vpop.f32.mrb[90].mxu0 }
0x2a1f   :  { %3406 = vst.msk [vmem:[%s6247_s27] sm:$0xff] %vm170_vm5, %v3400_v45  ;;  %v3403_v18 = vadd.f32 %v3402_v47, %v3348_v43  ;;  %3433 = vperm.xlu0 %4632, %v3400_v45   ;;  %3411 = vperm.xlu1 %4630, %v3400_v45   ;;  %v4555_v48 = vpop.f32.mrb[91].mxu0 }
0x2a21   :  { %3407 = vst.msk [vmem:[%s6247_s27 + $0x8] sm:$0xff] %vm170_vm5, %v3403_v18 }
0x2a23   :  { %4635 = vset.pattern.permute.xlu0 %v4993_v51  ;;  %4631 = vset.pattern.permute.xlu1 %v4994_v20 }
0x2a24   :  { %3466 = vperm.xlu0 %4635, %v3400_v45   ;;  %3422 = vperm.xlu1 %4631, %v3400_v45   ;;  %v6145_v15 = vpop.f32.mrb[92].mxu0 }
0x2a25   :  { %v4566_v0 = vpop.f32.mrb[93].mxu0 }
0x2a26   :  { %v6153_v13 = vpop.f32.mrb[94].mxu0 }
0x2a27   :  { %v4567_v62 = vpop.f32.mrb[95].mxu0 }
0x2a28   :  { %4637 = vset.pattern.permute.xlu0 %v4984_v9  ;;  %4633 = vset.pattern.permute.xlu1 %v4995_v54  ;;  %v4740_v9 = vld [vmem:[%s6242_s22] sm:$0xff]  }
0x2a29   :  { %3444 = vperm.xlu1 %4633, %v3400_v45   ;;  %3500 = vperm.xlu0 %4637, %v3403_v18  }
0x2a2a   :  { %4569 = vmatpush3.bf16.msra.mxu1 %v4740_v9 }
0x2a2b   :  { %4570 = vmatprep.subr.bf16.mxu1 %v4982_v3 }
0x2a2d   :  { %4634 = vset.pattern.permute.xlu1 %v4996_v7  ;;  %4640 = vset.pattern.permute.xlu0 %v4995_v54 }
0x2a2e   :  { %3455 = vperm.xlu1 %4634, %v3400_v45   ;;  %3533 = vperm.xlu0 %4640, %v3403_v18  }
0x2a2f   :  { %4571 = vmatpush3.bf16.msra.mxu1 %v4741_v59 }
0x2a30   :  { %4572 = vmatprep.subr.bf16.mxu1 %v4982_v3 }
0x2a32   :  { %4636 = vset.pattern.permute.xlu1 %v4997_v52  ;;  %4643 = vset.pattern.permute.xlu0 %v4997_v52 }
0x2a33   :  { %3477 = vperm.xlu1 %4636, %v3400_v45   ;;  %3566 = vperm.xlu0 %4643, %v3403_v18  }
0x2a34   :  { %4573 = vmatpush3.bf16.msra.mxu1 %v4742_v61 }
0x2a35   :  { %4574 = vmatprep.subr.bf16.mxu1 %v4982_v3 }
0x2a37   :  { %4638 = vset.pattern.permute.xlu1 %v4994_v20  ;;  %4645 = vset.pattern.permute.xlu0 %v4998_v53 }
0x2a38   :  { %3511 = vperm.xlu1 %4638, %v3403_v18   ;;  %4575 = vmatpush3.bf16.msra.mxu1 %v4743_v30 }
0x2a39   :  { %4576 = vmatprep.subr.bf16.mxu1 %v4982_v3 }
0x2a3c   :  { %4639 = vset.pattern.permute.xlu1 %v4992_v42  ;;  %4577 = vmatpush3.bf16.msra.mxu1 %v4744_v57 }
0x2a3d   :  { %3522 = vperm.xlu1 %4639, %v3403_v18   ;;  %4578 = vmatprep.subr.bf16.mxu1 %v4982_v3 }
0x2a40   :  { %4579 = vmatpush3.bf16.msra.mxu1 %v4745_v12 }
0x2a41   :  { %4641 = vset.pattern.permute.xlu1 %v4996_v7  ;;  %4580 = vmatprep.subr.bf16.mxu1 %v4982_v3 }
0x2a42   :  { %3544 = vperm.xlu1 %4641, %v3403_v18  }
0x2a44   :  { %4581 = vmatpush3.bf16.msra.mxu1 %v4746_v29 }
0x2a45   :  { %4582 = vmatprep.subr.bf16.mxu1 %v4982_v3 }
0x2a46   :  { %4642 = vset.pattern.permute.xlu1 %v4993_v51 }
0x2a47   :  { %3555 = vperm.xlu1 %4642, %v3403_v18  }
0x2a48   :  { %4583 = vmatpush3.bf16.msra.mxu1 %v4747_v1 }
0x2a4b   :  { %4644 = vset.pattern.permute.xlu1 %v4998_v53 }
0x2a4c   :  { %3488 = vperm.xlu1 %4644, %v3400_v45  }
0x2a50   :  { %3577 = vperm.xlu1 %4644, %v3403_v18  }
0x2a9e   :  { %v3412_v2 = vpop.permute.xlu1 %3411  ;;  %v3434_v26 = vpop.permute.xlu0 %3433 }
0x2a9f   :  { %v3414_v10 = vmul.f32 %v3412_v2, %v6165_v14  ;;  %v3436_v5 = vmul.f32 %v3434_v26, %v6165_v14 }
0x2aa1   :  { %v3415_v49 = vrot.slane %v3414_v10, 4  ;;  %v3437_v31 = vrot.slane %v3436_v5, 4 }
0x2aa3   :  { %v3423_v56 = vpop.permute.xlu1 %3422  ;;  %v3467_v11 = vpop.permute.xlu0 %3466  ;;  %v3416_v33 = vadd.f32 %v3415_v49, %v3414_v10  ;;  %v3438_v38 = vadd.f32 %v3437_v31, %v3436_v5 }
0x2aa4   :  { %v3425_v3 = vmul.f32 %v3423_v56, %v6165_v14  ;;  %v3469_v55 = vmul.f32 %v3467_v11, %v6165_v14 }
0x2aa5   :  { %v3417_v39 = vrot.slane %v3416_v33, 2  ;;  %v3439_v51 = vrot.slane %v3438_v38, 2 }
0x2aa6   :  { %v3426_v50 = vrot.slane %v3425_v3, 4  ;;  %v3470_v25 = vrot.slane %v3469_v55, 4 }
0x2aa7   :  { %v3418_v52 = vadd.f32 %v3417_v39, %v3416_v33  ;;  %v3440_v29 = vadd.f32 %v3439_v51, %v3438_v38 }
0x2aa8   :  { %v3445_v4 = vpop.permute.xlu1 %3444  ;;  %v3501_v8 = vpop.permute.xlu0 %3500  ;;  %v3427_v35 = vadd.f32 %v3426_v50, %v3425_v3  ;;  %v3471_v53 = vadd.f32 %v3470_v25, %v3469_v55 }
0x2aa9   :  { %v3447_v19 = vmul.f32 %v3445_v4, %v6165_v14  ;;  %v3503_v23 = vmul.f32 %v3501_v8, %v6165_v14  ;;  %v3419_v2 = vrot.slane %v3418_v52, 1 }
0x2aaa   :  { %v3428_v43 = vrot.slane %v3427_v35, 2  ;;  %v3472_v56 = vrot.slane %v3471_v53, 2 }
0x2aab   :  { %v3448_v40 = vrot.slane %v3447_v19, 4  ;;  %v3504_v36 = vrot.slane %v3503_v23, 4 }
0x2aac   :  { %v3429_v61 = vadd.f32 %v3428_v43, %v3427_v35  ;;  %v3473_v31 = vadd.f32 %v3472_v56, %v3471_v53 }
0x2aad   :  { %v3456_v6 = vpop.permute.xlu1 %3455  ;;  %v3534_v34 = vpop.permute.xlu0 %3533  ;;  %v3449_v44 = vadd.f32 %v3448_v40, %v3447_v19  ;;  %v3505_v46 = vadd.f32 %v3504_v36, %v3503_v23 }
0x2aae   :  { %v3458_v24 = vmul.f32 %v3456_v6, %v6165_v14  ;;  %v3536_v42 = vmul.f32 %v3534_v34, %v6165_v14  ;;  %v3430_v11 = vrot.slane %v3429_v61, 1  ;;  %v3474_v43 = vrot.slane %v3473_v31, 1 }
0x2aaf   :  { %v3450_v30 = vrot.slane %v3449_v44, 2  ;;  %v3506_v12 = vrot.slane %v3505_v46, 2 }
0x2ab0   :  { %v3459_v28 = vrot.slane %v3458_v24, 4  ;;  %v3537_v9 = vrot.slane %v3536_v42, 4  ;;  %v3431_v55 = vadd.f32 %v3430_v11, %v3429_v61 }
0x2ab1   :  { %v3451_v10 = vadd.f32 %v3450_v30, %v3449_v44  ;;  %v3507_v8 = vadd.f32 %v3506_v12, %v3505_v46 }
0x2ab2   :  { %v3478_v21 = vpop.permute.xlu1 %3477  ;;  %v3460_v47 = vadd.f32 %v3459_v28, %v3458_v24  ;;  %v3567_v18 = vpop.permute.xlu0 %3566  ;;  %v3538_v26 = vadd.f32 %v3537_v9, %v3536_v42  ;;  %v3441_v24 = vrot.slane %v3440_v29, 1 }
0x2ab3   :  { %v3480_v32 = vmul.f32 %v3478_v21, %v6165_v14  ;;  %v3569_v57 = vmul.f32 %v3567_v18, %v6165_v14  ;;  %v3452_v34 = vrot.slane %v3451_v10, 1  ;;  %v3508_v28 = vrot.slane %v3507_v8, 1 }
0x2ab4   :  { %v3461_v63 = vrot.slane %v3460_v47, 2  ;;  %v3539_v33 = vrot.slane %v3538_v26, 2  ;;  %v3442_v42 = vadd.f32 %v3441_v24, %v3440_v29 }
0x2ab5   :  { %v3481_v20 = vrot.slane %v3480_v32, 4  ;;  %v3570_v21 = vrot.slane %v3569_v57, 4 }
0x2ab6   :  { %v3462_v5 = vadd.f32 %v3461_v63, %v3460_v47  ;;  %v3540_v44 = vadd.f32 %v3539_v33, %v3538_v26  ;;  %v3453_v47 = vadd.f32 %v3452_v34, %v3451_v10 }
0x2ab7   :  { %v3512_v22 = vpop.permute.xlu1 %3511  ;;  %v3482_v62 = vadd.f32 %v3481_v20, %v3480_v32  ;;  %v3571_v35 = vadd.f32 %v3570_v21, %v3569_v57  ;;  %v3509_v20 = vadd.f32 %v3508_v28, %v3507_v8 }
0x2ab8   :  { %v3514_v27 = vmul.f32 %v3512_v22, %v6165_v14  ;;  %v3541_v30 = vrot.slane %v3540_v44, 1 }
0x2ab9   :  { %v3483_v50 = vrot.slane %v3482_v62, 2  ;;  %v3572_v18 = vrot.slane %v3571_v35, 2 }
0x2aba   :  { %v3515_v37 = vrot.slane %v3514_v27, 4  ;;  %v3542_v11 = vadd.f32 %v3541_v30, %v3540_v44 }
0x2abb   :  { %v3484_v32 = vadd.f32 %v3483_v50, %v3482_v62 }
0x2abc   :  { %v3523_v16 = vpop.permute.xlu1 %3522  ;;  %v3516_v48 = vadd.f32 %v3515_v37, %v3514_v27  ;;  %v3420_v27 = vadd.f32 %v3419_v2, %v3418_v52  ;;  %v3463_v37 = vrot.slane %v3462_v5, 1 }
0x2abd   :  { %v3525_v41 = vmul.f32 %v3523_v16, %v6165_v14  ;;  %v3485_v9 = vrot.slane %v3484_v32, 1 }
0x2abe   :  { %v3517_v0 = vrot.slane %v3516_v48, 2  ;;  %v3588_v46 = vsel %vm3587_vm12, %v3420_v27, %v3431_v55  ;;  %v3464_v53 = vadd.f32 %v3463_v37, %v3462_v5  ;;  %v4128_v37 = vld [vmem:[%s6241_s21] ss:$0 sm:$0xff]  ;;  %s4958_s21 = scalar_lea.vmem %s3843_s20, 256 }
0x2abf   :  { %v3526_v45 = vrot.slane %v3525_v41, 4  ;;  %v3590_v29 = vsel %vm3589_vm13, %v3588_v46, %v3442_v42  ;;  %p4959_p0 = scmp.ne.s32.totalorder %s3843_s20, %s4958_s21  ;;  %p4964_p2 = scmp.lt.s32.totalorder %s4958_s21, %s4958_s21 }
0x2ac0   :  { %v3518_v49 = vadd.f32 %v3517_v0, %v3516_v48  ;;  %v3475_v0 = vadd.f32 %v3474_v43, %v3473_v31  ;;  %v3592_v56 = vsel %vm3591_vm14, %v3590_v29, %v3453_v47 }
0x2ac1   :  { %v3527_v54 = vadd.f32 %v3526_v45, %v3525_v41  ;;  %v3545_v7 = vpop.permute.xlu1 %3544  ;;  %p4965_p3 = por %p4964_p2, %p4963_p1 }
0x2ac2   :  { %v3547_v59 = vmul.f32 %v3545_v7, %v6165_v14  ;;  %v3519_v16 = vrot.slane %v3518_v49, 1 }
0x2ac3   :  { %v3528_v1 = vrot.slane %v3527_v54, 2  ;;  %p4966_p4 = pnand %p4965_p3, %p4959_p0 }
0x2ac4   :  { %v3548_v17 = vrot.slane %v3547_v59, 4 }
0x2ac5   :  { %v3529_v19 = vadd.f32 %v3528_v1, %v3527_v54  ;;  %v3520_v54 = vadd.f32 %v3519_v16, %v3518_v49 }
0x2ac6   :  { %v3549_v4 = vadd.f32 %v3548_v17, %v3547_v59  ;;  %v3556_v6 = vpop.permute.xlu1 %3555  ;;  %v3573_v17 = vadd.f32 %v3572_v18, %v3571_v35 }
0x2ac7   :  { %v3558_v3 = vmul.f32 %v3556_v6, %v6165_v14  ;;  %v3530_v41 = vrot.slane %v3529_v19, 1  ;;  %v3600_v62 = vsel %vm3587_vm12, %v3509_v20, %v3520_v54  ;;  %v3593_v6 = vsel %vm95_vm0, %v3592_v56, %v3464_v53 }
0x2ac8   :  { %v3550_v22 = vrot.slane %v3549_v4, 2  ;;  %v3574_v8 = vrot.slane %v3573_v17, 1  ;;  %v3595_v50 = vsel %vm3594_vm15, %v3593_v6, %v3475_v0 }
0x2ac9   :  { %v3559_v23 = vrot.slane %v3558_v3, 4  ;;  %v3531_v59 = vadd.f32 %v3530_v41, %v3529_v19 }
0x2aca   :  { %v3551_v39 = vadd.f32 %v3550_v22, %v3549_v4  ;;  %v3575_v33 = vadd.f32 %v3574_v8, %v3573_v17 }
0x2acb   :  { %v3560_v40 = vadd.f32 %v3559_v23, %v3558_v3  ;;  %v3489_v36 = vpop.permute.xlu1 %3488  ;;  %v3601_v26 = vsel %vm3589_vm13, %v3600_v62, %v3531_v59 }
0x2acc   :  { %v3491_v38 = vmul.f32 %v3489_v36, %v6165_v14  ;;  %v3552_v61 = vrot.slane %v3551_v39, 1  ;;  %v3602_v19 = vsel %vm3591_vm14, %v3601_v26, %v3542_v11 }
0x2acd   :  { %v3561_v25 = vrot.slane %v3560_v40, 2 }
0x2ace   :  { %v3492_v45 = vrot.slane %v3491_v38, 4  ;;  %v3553_v4 = vadd.f32 %v3552_v61, %v3551_v39 }
0x2acf   :  { %v3562_v48 = vadd.f32 %v3561_v25, %v3560_v40  ;;  %v3578_v51 = vpop.permute.xlu1 %3577 }
0x2ad0   :  { %v3493_v7 = vadd.f32 %v3492_v45, %v3491_v38  ;;  %v3580_v52 = vmul.f32 %v3578_v51, %v6165_v14  ;;  %v3486_v14 = vadd.f32 %v3485_v9, %v3484_v32  ;;  %v3603_v23 = vsel %vm95_vm0, %v3602_v19, %v3553_v4 }
0x2ad1   :  { %v3563_v57 = vrot.slane %v3562_v48, 1 }
0x2ad2   :  { %v3494_v12 = vrot.slane %v3493_v7, 2  ;;  %v3581_v63 = vrot.slane %v3580_v52, 4  ;;  %v3597_v22 = vsel %vm3596_vm1, %v3595_v50, %v3486_v14 }
0x2ad3   :  { %v3564_v10 = vadd.f32 %v3563_v57, %v3562_v48 }
0x2ad4   :  { %v3495_v1 = vadd.f32 %v3494_v12, %v3493_v7  ;;  %v3582_v2 = vadd.f32 %v3581_v63, %v3580_v52 }
0x2ad5   :  { %v3604_v31 = vsel %vm3594_vm15, %v3603_v23, %v3564_v10 }
0x2ad6   :  { %v3496_v21 = vrot.slane %v3495_v1, 1  ;;  %v3583_v3 = vrot.slane %v3582_v2, 2  ;;  %v3605_v40 = vsel %vm3596_vm1, %v3604_v31, %v3575_v33 }
0x2ad8   :  { %v3584_v5 = vadd.f32 %v3583_v3, %v3582_v2  ;;  %v3497_v49 = vadd.f32 %v3496_v21, %v3495_v1 }
0x2ada   :  { %v3585_v24 = vrot.slane %v3584_v5, 1  ;;  %v3599_v27 = vsel %vm3598_vm2, %v3597_v22, %v3497_v49 }
0x2adb   :  { %v3658_v55 = vadd.f32 %v6143_v58, %v3599_v27  ;;  %v4129_v58 = vld [vmem:[%s6243_s23] ss:$0 sm:$0xff] }
0x2adc   :  { %v3586_v34 = vadd.f32 %v3585_v24, %v3584_v5 }
0x2add   :  { %v3711_v35 = vadd.f32 %v6145_v15, %v3658_v55 }
0x2ade   :  { %v3606_v36 = vsel %vm3598_vm2, %v3605_v40, %v3586_v34 }
0x2adf   :  { %v3659_v28 = vadd.f32 %v6150_v60, %v3606_v36  ;;  %v3720_v38 = vadd.f32 %v4128_v37, %v3711_v35 }
0x2ae1   :  { %v3712_v16 = vadd.f32 %v6153_v13, %v3659_v28 }
0x2ae3   :  { %v3721_v32 = vadd.f32 %v4128_v37, %v3712_v16 }
0x2ae5   :  { %v3722_v41 = vpack.c.bf16 %v3721_v32, %v3720_v38 }
0x2ae7   :  { %4585 = vmatmul.mubr.bf16.vlgmr.msra.gmra.mrb[56].mxu1 %v3722_v41 }
0x2bba   :  { %v3828_v15 = vpop.f32.mrb[56].mxu1 }
0x2bbb   :  { %v3829_v39 = vadd.f32 %v4129_v58, %v3828_v15  ;;  %v4586_v25 = vpop.f32.mrb[57].mxu1 }
0x2bbc   :  { %v3831_v60 = vpop.f32.mrb[58].mxu1 }
0x2bbd   :  { %3835 = vst.msk [vmem:[#allocation3] sm:$0xff] %vm170_vm5, %v3829_v39  ;;  %v3832_v42 = vadd.f32 %v4129_v58, %v3831_v60  ;;  %v4587_v43 = vpop.f32.mrb[59].mxu1 }
0x2bbf   :  { %3836 = vst.msk [vmem:[#allocation3 + $0x8] sm:$0xff] %vm170_vm5, %v3832_v42 }
0x2bc0   :  { %4969 = shalt.err (!%p4966_p4)
}
0x2bc1   :  { %s4970_s25 = scalar_lea.hbm %s6246_s26, 256 }
0x2bc2   :  { %p4971_p5 = scmp.ne.s32.totalorder %s6246_s26, %s4970_s25  ;;  %p4974_p6 = scmp.lt.u32.totalorder %s4970_s25, %s6246_s26 }
0x2bc4   :  { %p4976_p7 = pnand %p4974_p6, %p4971_p5 }
0x2bc6   :  { %4979 = shalt.err (!%p4976_p7)
}
0x2bc7   :  { %s5000_s14 = smov 128  }
0x2bc8   :  { %3848 = dma.vmem_to_hbm [thread:$0]  %s3843_s20, 256, %s6246_s26, [#allocation4], %s5000_s14, %s5000_s14, %s4991_s11  }
0x2bc9   :  { %4980 = dma.done.wait [#allocation4], 256  }
0x2bca   :  { %4981 = vsyncadd [#allocation4], 4294967040 }
0x2bcb   :  { %3856 = vsyncpa [#allocation4], 1 }

</bundles_post_ra>
